<compile_context>
chip_gen: v7x
topology: tpu7x:2x2x1
jax: 0.10.0
libtpu: 0.0.40
codegen_flags: <defaults>
</compile_context>

<pallas_src>
import functools
import math

import jax
import jax.numpy as jnp
from jax.experimental import pallas as pl
from jax.experimental.pallas import tpu as pltpu

_VMEM_LIMIT_BYTES = 48 * 1024 * 1024  # safe headroom on v5e/v6e (128 MiB) and v7x (64 MiB)


def _pick_tile(dim: int, target: int, base: int) -> int:
    """Largest tile <= target that divides `dim` and is a multiple of `base`.
    Falls back to the full dimension (always legal) if no such tile exists."""
    t = min(target, dim)
    t -= t % base
    while t >= base:
        if dim % t == 0:
            return t
        t -= base
    return dim


# ---------------------------------------------------------------------------
# Linear projection kernel: y = x @ W + b
#   x: [M, K], W: [K, N] (pre-transposed vs. PyTorch's [N, K]), b: [1, N]
#   f32 accumulator held in VMEM across the K grid axis; bias-add fused into finalize.
# ---------------------------------------------------------------------------
def _linear_kernel(x_ref, w_ref, b_ref, o_ref, acc_ref):
    kk = pl.program_id(2)

    @pl.when(kk == 0)
    def _init():
        acc_ref[...] = jnp.zeros_like(acc_ref)

    acc_ref[...] += jnp.dot(x_ref[...], w_ref[...],
                            preferred_element_type=jnp.float32)

    @pl.when(kk == pl.num_programs(2) - 1)
    def _finalize():
        o_ref[...] = (acc_ref[...] + b_ref[...]).astype(o_ref.dtype)


def linear(x, w, b, *, block_m=256, block_n=512, block_k=512):
    m, k = x.shape
    k2, n = w.shape
    assert k == k2 and b.shape == (n,)
    bm = _pick_tile(m, block_m, 8)
    bn = _pick_tile(n, block_n, 128)
    bk = _pick_tile(k, block_k, 128)
    grid = (m // bm, n // bn, k // bk)
    return pl.pallas_call(
        _linear_kernel,
        out_shape=jax.ShapeDtypeStruct((m, n), x.dtype),
        grid_spec=pltpu.PrefetchScalarGridSpec(
            num_scalar_prefetch=0,
            grid=grid,
            in_specs=[
                pl.BlockSpec((bm, bk), lambda i, j, kk: (i, kk)),
                pl.BlockSpec((bk, bn), lambda i, j, kk: (kk, j)),
                pl.BlockSpec((1, bn), lambda i, j, kk: (0, j)),
            ],
            out_specs=pl.BlockSpec((bm, bn), lambda i, j, kk: (i, j)),
            scratch_shapes=[pltpu.VMEM((bm, bn), jnp.float32)],
        ),
        compiler_params=pltpu.CompilerParams(
            dimension_semantics=("parallel", "parallel", "arbitrary"),
            vmem_limit_bytes=_VMEM_LIMIT_BYTES,
        ),
    )(x, w, b.reshape(1, n))


# ---------------------------------------------------------------------------
# Flash attention kernel (per batch, per head, online softmax over KV blocks).
#   q_ref: (bq, Dh)  k_ref/v_ref: (bk, Dh)  o_ref: (bq, Dh)
#   m/l/acc: f32 VMEM scratch carried across the (last, "arbitrary") KV grid axis.
# ---------------------------------------------------------------------------
def _flash_attn_kernel(q_ref, k_ref, v_ref, o_ref, m_sc, l_sc, acc_sc):
    kv = pl.program_id(3)

    @pl.when(kv == 0)
    def _init():
        m_sc[...] = jnp.full_like(m_sc, -jnp.inf)
        l_sc[...] = jnp.zeros_like(l_sc)
        acc_sc[...] = jnp.zeros_like(acc_sc)

    q = q_ref[...]            # (bq, Dh)  -- 1/sqrt(Dh) already folded into the Q projection
    k = k_ref[...]            # (bk, Dh)
    v = v_ref[...]            # (bk, Dh)

    # scores = Q @ K^T without an explicit in-kernel transpose (contract last dims).
    s = jax.lax.dot_general(q, k, (((1,), (1,)), ((), ())),
                            preferred_element_type=jnp.float32)   # (bq, bk)

    m_prev = m_sc[...]
    m_new = jnp.maximum(m_prev, jnp.max(s, axis=-1, keepdims=True))
    alpha = jnp.exp(m_prev - m_new)                               # EUP
    p = jnp.exp(s - m_new)                                        # EUP

    l_sc[...] = alpha * l_sc[...] + jnp.sum(p, axis=-1, keepdims=True)
    acc_sc[...] = alpha * acc_sc[...] + jnp.dot(
        p.astype(v.dtype), v, preferred_element_type=jnp.float32)
    m_sc[...] = m_new

    @pl.when(kv == pl.num_programs(3) - 1)
    def _finalize():
        inv_l = pl.reciprocal(l_sc[...], approx=True)
        o_ref[...] = (acc_sc[...] * inv_l).astype(o_ref.dtype)


def flash_attention(q, k, v, *, n_heads, block_q=256, block_k=512):
    """q: [B, Tq, d_model], k/v: [B, Tk, d_model]; heads are lane-packed along d_model.
    Returns the attention context as [B, Tq, d_model] with the same lane packing
    (identical to PyTorch's transpose(1, 2).reshape(B, Tq, d_model))."""
    batch, q_time, d_model = q.shape
    k_time = k.shape[1]
    assert d_model % n_heads == 0
    head_dim = d_model // n_heads  # best when a multiple of 128 (lane-dense loads/stores)

    bq = _pick_tile(q_time, block_q, 8)
    bk = _pick_tile(k_time, block_k, 8)
    grid = (batch, n_heads, q_time // bq, k_time // bk)

    q_map = lambda b, h, qi, ki: (b, qi, h)
    kv_map = lambda b, h, qi, ki: (b, ki, h)
    o_map = lambda b, h, qi, ki: (b, qi, h)

    return pl.pallas_call(
        _flash_attn_kernel,
        out_shape=jax.ShapeDtypeStruct((batch, q_time, d_model), q.dtype),
        grid_spec=pltpu.PrefetchScalarGridSpec(
            num_scalar_prefetch=0,
            grid=grid,
            in_specs=[
                pl.BlockSpec((None, bq, head_dim), q_map),
                pl.BlockSpec((None, bk, head_dim), kv_map),
                pl.BlockSpec((None, bk, head_dim), kv_map),
            ],
            out_specs=pl.BlockSpec((None, bq, head_dim), o_map),
            scratch_shapes=[
                pltpu.VMEM((bq, 1), jnp.float32),          # running max m
                pltpu.VMEM((bq, 1), jnp.float32),          # running sum l
                pltpu.VMEM((bq, head_dim), jnp.float32),   # f32 accumulator
            ],
        ),
        compiler_params=pltpu.CompilerParams(
            dimension_semantics=("parallel", "parallel", "parallel", "arbitrary"),
            vmem_limit_bytes=_VMEM_LIMIT_BYTES,
        ),
    )(q, k, v)


# ---------------------------------------------------------------------------
# Full MultiHeadAttention forward pass.
# ---------------------------------------------------------------------------
@functools.partial(jax.jit, static_argnames=("n_heads", "fused_qkv"))
def multi_head_attention(q_in, k_in, v_in, params, *, n_heads, fused_qkv=False):
    batch, q_time, d_model = q_in.shape
    k_time = k_in.shape[1]
    head_dim = d_model // n_heads

    # Fold the 1/sqrt(head_dim) score scale into the Q projection (free).
    scale = 1.0 / math.sqrt(head_dim)
    wq = params["wq"] * scale
    bq = params["bq"] * scale

    if fused_qkv:
        # Self-attention: one pass over the activations instead of three.
        w_qkv = jnp.concatenate([wq, params["wk"], params["wv"]], axis=1)
        b_qkv = jnp.concatenate([bq, params["bk"], params["bv"]], axis=0)
        qkv = linear(q_in.reshape(batch * q_time, d_model), w_qkv, b_qkv)
        qkv = qkv.reshape(batch, q_time, 3 * d_model)
        q_p = qkv[..., :d_model]
        k_p = qkv[..., d_model:2 * d_model]
        v_p = qkv[..., 2 * d_model:]
    else:
        q_p = linear(q_in.reshape(batch * q_time, d_model), wq, bq)
        q_p = q_p.reshape(batch, q_time, d_model)
        k_p = linear(k_in.reshape(batch * k_time, d_model), params["wk"], params["bk"])
        k_p = k_p.reshape(batch, k_time, d_model)
        v_p = linear(v_in.reshape(batch * k_time, d_model), params["wv"], params["bv"])
        v_p = v_p.reshape(batch, k_time, d_model)

    # Context comes back as [B, Tq, d_model] (heads lane-packed) -> no reshape needed.
    ctx = flash_attention(q_p, k_p, v_p, n_heads=n_heads)
    out = linear(ctx.reshape(batch * q_time, d_model), params["wo"], params["bo"])
    return out.reshape(batch, q_time, d_model)


# ---------------------------------------------------------------------------
# Pure-JAX reference (mirrors the PyTorch module, mask=None / dropout disabled).
# ---------------------------------------------------------------------------
def _mha_reference(q_in, k_in, v_in, params, n_heads):
    d_model = q_in.shape[-1]
    head_dim = d_model // n_heads
    q = q_in @ params["wq"] + params["bq"]
    k = k_in @ params["wk"] + params["bk"]
    v = v_in @ params["wv"] + params["bv"]
    batch, q_time, _ = q.shape
    k_time = k.shape[1]
    q = q.reshape(batch, q_time, n_heads, head_dim).transpose(0, 2, 1, 3)
    k = k.reshape(batch, k_time, n_heads, head_dim).transpose(0, 2, 1, 3)
    v = v.reshape(batch, k_time, n_heads, head_dim).transpose(0, 2, 1, 3)
    s = jnp.einsum("bhqd,bhkd->bhqk", q, k) / math.sqrt(head_dim)
    p = jax.nn.softmax(s, axis=-1)
    ctx = jnp.einsum("bhqk,bhkd->bhqd", p, v)
    ctx = ctx.transpose(0, 2, 1, 3).reshape(batch, q_time, d_model)
    return ctx @ params["wo"] + params["bo"]


if __name__ == "__main__":
    # Small, deterministic config: head_dim = d_model / n_heads = 128 (lane-dense).
    batch, seq, d_model, n_heads = 2, 128, 256, 2

    key = jax.random.PRNGKey(0)
    kx, kq, kk_, kv_, ko, kbq, kbk, kbv, kbo = jax.random.split(key, 9)

    def w_init(k, shape):
        return 0.05 * jax.random.normal(k, shape, dtype=jnp.float32)

    params = {
        "wq": w_init(kq, (d_model, d_model)),   # stored as [d_in, d_out] (pre-transposed)
        "wk": w_init(kk_, (d_model, d_model)),
        "wv": w_init(kv_, (d_model, d_model)),
        "wo": w_init(ko, (d_model, d_model)),
        "bq": w_init(kbq, (d_model,)),
        "bk": w_init(kbk, (d_model,)),
        "bv": w_init(kbv, (d_model,)),
        "bo": w_init(kbo, (d_model,)),
    }
    x = jax.random.normal(kx, (batch, seq, d_model), dtype=jnp.float32)

    # Self-attention (q = k = v) -> fused QKV projection path.
    out = multi_head_attention(x, x, x, params, n_heads=n_heads, fused_qkv=True)
    out = jax.block_until_ready(out)

    ref = _mha_reference(x, x, x, params, n_heads)
    if not jnp.allclose(out, ref, rtol=2e-2, atol=2e-2):
        max_err = float(jnp.max(jnp.abs(out - ref)))
        raise AssertionError(f"Pallas MHA mismatch vs reference (max abs err {max_err})")

    # Also exercise the non-fused (cross-attention style) path for coverage.
    out2 = multi_head_attention(x, x, x, params, n_heads=n_heads, fused_qkv=False)
    out2 = jax.block_until_ready(out2)
    if not jnp.allclose(out2, ref, rtol=2e-2, atol=2e-2):
        max_err = float(jnp.max(jnp.abs(out2 - ref)))
        raise AssertionError(f"Pallas MHA (unfused) mismatch vs reference (max abs err {max_err})")

    print("KERNEL_OK")
</pallas_src>

<mosaic_0001>
module attributes {stable_mosaic.version = 11 : i64} {
  func.func @_flash_attn_kernel(%arg0: i32, %arg1: i32, %arg2: i32, %arg3: i32, %arg4: memref<1x128x128xf32, #tpu.memory_space<vmem>>, %arg5: memref<1x128x128xf32, #tpu.memory_space<vmem>>, %arg6: memref<1x128x128xf32, #tpu.memory_space<vmem>>, %arg7: memref<1x128x128xf32, #tpu.memory_space<vmem>>, %arg8: memref<128x1xf32, #tpu.memory_space<vmem>>, %arg9: memref<128x1xf32, #tpu.memory_space<vmem>>, %arg10: memref<128x128xf32, #tpu.memory_space<vmem>>) attributes {dimension_semantics = [#tpu.dimension_semantics<parallel>, #tpu.dimension_semantics<parallel>, #tpu.dimension_semantics<parallel>, #tpu.dimension_semantics<arbitrary>], iteration_bounds = array<i64: 2, 2, 1, 1>, scalar_prefetch = 0 : i64, scratch_operands = 3 : i64, tpu.core_type = #tpu.core_type<tc>, window_params = [{transform_indices = @transform_0, window_bounds = array<i64: 1, 128, 128>}, {transform_indices = @transform_1, window_bounds = array<i64: 1, 128, 128>}, {transform_indices = @transform_2, window_bounds = array<i64: 1, 128, 128>}, {transform_indices = @transform_3, window_bounds = array<i64: 1, 128, 128>}]} {
    %c0_i32 = arith.constant 0 : i32
    %0 = arith.cmpi eq, %arg3, %c0_i32 : i32
    %1 = arith.extui %0 : i1 to i32
    %c0_i32_0 = arith.constant 0 : i32
    %2 = arith.cmpi ne, %1, %c0_i32_0 : i32
    scf.if %2 {
      %cst_26 = arith.constant 0xFF800000 : f32
      %35 = vector.broadcast %cst_26 : f32 to vector<128x1xf32>
      %c0_27 = arith.constant 0 : index
      %c0_28 = arith.constant 0 : index
      %36 = vector.load %arg8[%c0_27, %c0_28] : memref<128x1xf32, #tpu.memory_space<vmem>>, vector<128x1xf32>
      tpu.vector_store %arg8[%c0_27, %c0_28], %35 {strides = array<i32>} : memref<128x1xf32, #tpu.memory_space<vmem>>, vector<128x1xf32>,
      %cst_29 = arith.constant 0.000000e+00 : f32
      %37 = vector.broadcast %cst_29 : f32 to vector<128x1xf32>
      %c0_30 = arith.constant 0 : index
      %c0_31 = arith.constant 0 : index
      %38 = vector.load %arg9[%c0_30, %c0_31] : memref<128x1xf32, #tpu.memory_space<vmem>>, vector<128x1xf32>
      tpu.vector_store %arg9[%c0_30, %c0_31], %37 {strides = array<i32>} : memref<128x1xf32, #tpu.memory_space<vmem>>, vector<128x1xf32>,
      %cst_32 = arith.constant 0.000000e+00 : f32
      %39 = vector.broadcast %cst_32 : f32 to vector<128x128xf32>
      %c0_33 = arith.constant 0 : index
      %c0_34 = arith.constant 0 : index
      %40 = vector.load %arg10[%c0_33, %c0_34] : memref<128x128xf32, #tpu.memory_space<vmem>>, vector<128x128xf32>
      tpu.vector_store %arg10[%c0_33, %c0_34], %39 {strides = array<i32>} : memref<128x128xf32, #tpu.memory_space<vmem>>, vector<128x128xf32>,
    } else {
    }
    %c0 = arith.constant 0 : index
    %c0_1 = arith.constant 0 : index
    %c0_2 = arith.constant 0 : index
    %3 = vector.load %arg4[%c0, %c0_1, %c0_2] : memref<1x128x128xf32, #tpu.memory_space<vmem>>, vector<1x128x128xf32>
    %4 = vector.shape_cast %3 : vector<1x128x128xf32> to vector<128x128xf32>
    %c0_3 = arith.constant 0 : index
    %c0_4 = arith.constant 0 : index
    %c0_5 = arith.constant 0 : index
    %5 = vector.load %arg5[%c0_3, %c0_4, %c0_5] : memref<1x128x128xf32, #tpu.memory_space<vmem>>, vector<1x128x128xf32>
    %6 = vector.shape_cast %5 : vector<1x128x128xf32> to vector<128x128xf32>
    %c0_6 = arith.constant 0 : index
    %c0_7 = arith.constant 0 : index
    %c0_8 = arith.constant 0 : index
    %7 = vector.load %arg6[%c0_6, %c0_7, %c0_8] : memref<1x128x128xf32, #tpu.memory_space<vmem>>, vector<1x128x128xf32>
    %8 = vector.shape_cast %7 : vector<1x128x128xf32> to vector<128x128xf32>
    %cst = arith.constant dense<0.000000e+00> : vector<128x128xf32>
    %9 = tpu.matmul %4, %6, %cst {dimension_numbers = #tpu.dot_dimension_numbers<[1], [1], [0], [0], [0, 0, 1, 0], [], []>} : vector<128x128xf32>, vector<128x128xf32>, vector<128x128xf32> -> vector<128x128xf32>
    %c0_9 = arith.constant 0 : index
    %c0_10 = arith.constant 0 : index
    %10 = vector.load %arg8[%c0_9, %c0_10] : memref<128x1xf32, #tpu.memory_space<vmem>>, vector<128x1xf32>
    %cst_11 = arith.constant dense<0xFF800000> : vector<128xf32>
    %11 = vector.multi_reduction <maximumf>, %9, %cst_11 [1] : vector<128x128xf32> to vector<128xf32>
    %12 = vector.shape_cast %11 : vector<128xf32> to vector<128x1xf32>
    %13 = arith.maximumf %10, %12 : vector<128x1xf32>
    %14 = arith.subf %10, %13 : vector<128x1xf32>
    %15 = math.exp %14 : vector<128x1xf32>
    %16 = vector.broadcast %13 : vector<128x1xf32> to vector<128x128xf32>
    %17 = arith.subf %9, %16 : vector<128x128xf32>
    %18 = math.exp %17 : vector<128x128xf32>
    %c0_12 = arith.constant 0 : index
    %c0_13 = arith.constant 0 : index
    %19 = vector.load %arg9[%c0_12, %c0_13] : memref<128x1xf32, #tpu.memory_space<vmem>>, vector<128x1xf32>
    %20 = arith.mulf %15, %19 : vector<128x1xf32>
    %cst_14 = arith.constant dense<0.000000e+00> : vector<128xf32>
    %21 = vector.multi_reduction <add>, %18, %cst_14 [1] : vector<128x128xf32> to vector<128xf32>
    %22 = vector.shape_cast %21 : vector<128xf32> to vector<128x1xf32>
    %23 = arith.addf %20, %22 : vector<128x1xf32>
    %c0_15 = arith.constant 0 : index
    %c0_16 = arith.constant 0 : index
    %24 = vector.load %arg9[%c0_15, %c0_16] : memref<128x1xf32, #tpu.memory_space<vmem>>, vector<128x1xf32>
    tpu.vector_store %arg9[%c0_15, %c0_16], %23 {strides = array<i32>} : memref<128x1xf32, #tpu.memory_space<vmem>>, vector<128x1xf32>,
    %c0_17 = arith.constant 0 : index
    %c0_18 = arith.constant 0 : index
    %25 = vector.load %arg10[%c0_17, %c0_18] : memref<128x128xf32, #tpu.memory_space<vmem>>, vector<128x128xf32>
    %26 = vector.broadcast %15 : vector<128x1xf32> to vector<128x128xf32>
    %27 = arith.mulf %26, %25 : vector<128x128xf32>
    %cst_19 = arith.constant dense<0.000000e+00> : vector<128x128xf32>
    %28 = tpu.matmul %18, %8, %cst_19 {dimension_numbers = #tpu.dot_dimension_numbers<[1], [0], [0], [1], [0, 0, 1, 1], [], []>} : vector<128x128xf32>, vector<128x128xf32>, vector<128x128xf32> -> vector<128x128xf32>
    %29 = arith.addf %27, %28 : vector<128x128xf32>
    %c0_20 = arith.constant 0 : index
    %c0_21 = arith.constant 0 : index
    %30 = vector.load %arg10[%c0_20, %c0_21] : memref<128x128xf32, #tpu.memory_space<vmem>>, vector<128x128xf32>
    tpu.vector_store %arg10[%c0_20, %c0_21], %29 {strides = array<i32>} : memref<128x128xf32, #tpu.memory_space<vmem>>, vector<128x128xf32>,
    %c0_22 = arith.constant 0 : index
    %c0_23 = arith.constant 0 : index
    %31 = vector.load %arg8[%c0_22, %c0_23] : memref<128x1xf32, #tpu.memory_space<vmem>>, vector<128x1xf32>
    tpu.vector_store %arg8[%c0_22, %c0_23], %13 {strides = array<i32>} : memref<128x1xf32, #tpu.memory_space<vmem>>, vector<128x1xf32>,
    %c0_i32_24 = arith.constant 0 : i32
    %32 = arith.cmpi eq, %arg3, %c0_i32_24 : i32
    %33 = arith.extui %32 : i1 to i32
    %c0_i32_25 = arith.constant 0 : i32
    %34 = arith.cmpi ne, %33, %c0_i32_25 : i32
    scf.if %34 {
      %c0_26 = arith.constant 0 : index
      %c0_27 = arith.constant 0 : index
      %35 = vector.load %arg9[%c0_26, %c0_27] : memref<128x1xf32, #tpu.memory_space<vmem>>, vector<128x1xf32>
      %36 = tpu.reciprocal %35 {approx = true} : vector<128x1xf32> -> vector<128x1xf32>
      %c0_28 = arith.constant 0 : index
      %c0_29 = arith.constant 0 : index
      %37 = vector.load %arg10[%c0_28, %c0_29] : memref<128x128xf32, #tpu.memory_space<vmem>>, vector<128x128xf32>
      %38 = vector.broadcast %36 : vector<128x1xf32> to vector<128x128xf32>
      %39 = arith.mulf %37, %38 : vector<128x128xf32>
      %c0_30 = arith.constant 0 : index
      %c0_31 = arith.constant 0 : index
      %c0_32 = arith.constant 0 : index
      %40 = vector.load %arg7[%c0_30, %c0_31, %c0_32] : memref<1x128x128xf32, #tpu.memory_space<vmem>>, vector<1x128x128xf32>
      %41 = vector.shape_cast %40 : vector<1x128x128xf32> to vector<128x128xf32>
      %42 = vector.shape_cast %39 : vector<128x128xf32> to vector<1x128x128xf32>
      tpu.vector_store %arg7[%c0_30, %c0_31, %c0_32], %42 {strides = array<i32>} : memref<1x128x128xf32, #tpu.memory_space<vmem>>, vector<1x128x128xf32>,
    } else {
    }
    return
  }
  func.func @transform_0(%arg0: i32, %arg1: i32, %arg2: i32, %arg3: i32) -> (i32, i32, i32) {
    %c0_i32 = arith.constant 0 : i32
    return %arg0, %arg2, %arg1 : i32, i32, i32
  }
  func.func @transform_1(%arg0: i32, %arg1: i32, %arg2: i32, %arg3: i32) -> (i32, i32, i32) {
    %c0_i32 = arith.constant 0 : i32
    return %arg0, %arg3, %arg1 : i32, i32, i32
  }
  func.func @transform_2(%arg0: i32, %arg1: i32, %arg2: i32, %arg3: i32) -> (i32, i32, i32) {
    %c0_i32 = arith.constant 0 : i32
    return %arg0, %arg3, %arg1 : i32, i32, i32
  }
  func.func @transform_3(%arg0: i32, %arg1: i32, %arg2: i32, %arg3: i32) -> (i32, i32, i32) {
    %c0_i32 = arith.constant 0 : i32
    return %arg0, %arg2, %arg1 : i32, i32, i32
  }
}

module attributes {stable_mosaic.version = 11 : i64} {
  func.func @_linear_kernel(%arg0: i32, %arg1: i32, %arg2: i32, %arg3: memref<256x256xf32, #tpu.memory_space<vmem>>, %arg4: memref<256x384xf32, #tpu.memory_space<vmem>>, %arg5: memref<1x384xf32, #tpu.memory_space<vmem>>, %arg6: memref<256x384xf32, #tpu.memory_space<vmem>>, %arg7: memref<256x384xf32, #tpu.memory_space<vmem>>) attributes {dimension_semantics = [#tpu.dimension_semantics<parallel>, #tpu.dimension_semantics<parallel>, #tpu.dimension_semantics<arbitrary>], iteration_bounds = array<i64: 1, 2, 1>, scalar_prefetch = 0 : i64, scratch_operands = 1 : i64, tpu.core_type = #tpu.core_type<tc>, window_params = [{transform_indices = @transform_0, window_bounds = array<i64: 256, 256>}, {transform_indices = @transform_1, window_bounds = array<i64: 256, 384>}, {transform_indices = @transform_2, window_bounds = array<i64: 1, 384>}, {transform_indices = @transform_3, window_bounds = array<i64: 256, 384>}]} {
    %c0_i32 = arith.constant 0 : i32
    %0 = arith.cmpi eq, %arg2, %c0_i32 : i32
    %1 = arith.extui %0 : i1 to i32
    %c0_i32_0 = arith.constant 0 : i32
    %2 = arith.cmpi ne, %1, %c0_i32_0 : i32
    scf.if %2 {
      %cst_10 = arith.constant 0.000000e+00 : f32
      %12 = vector.broadcast %cst_10 : f32 to vector<256x384xf32>
      %c0_11 = arith.constant 0 : index
      %c0_12 = arith.constant 0 : index
      %13 = vector.load %arg7[%c0_11, %c0_12] : memref<256x384xf32, #tpu.memory_space<vmem>>, vector<256x384xf32>
      tpu.vector_store %arg7[%c0_11, %c0_12], %12 {strides = array<i32>} : memref<256x384xf32, #tpu.memory_space<vmem>>, vector<256x384xf32>,
    } else {
    }
    %c0 = arith.constant 0 : index
    %c0_1 = arith.constant 0 : index
    %3 = vector.load %arg7[%c0, %c0_1] : memref<256x384xf32, #tpu.memory_space<vmem>>, vector<256x384xf32>
    %c0_2 = arith.constant 0 : index
    %c0_3 = arith.constant 0 : index
    %4 = vector.load %arg3[%c0_2, %c0_3] : memref<256x256xf32, #tpu.memory_space<vmem>>, vector<256x256xf32>
    %c0_4 = arith.constant 0 : index
    %c0_5 = arith.constant 0 : index
    %5 = vector.load %arg4[%c0_4, %c0_5] : memref<256x384xf32, #tpu.memory_space<vmem>>, vector<256x384xf32>
    %cst = arith.constant dense<0.000000e+00> : vector<256x384xf32>
    %6 = tpu.matmul %4, %5, %cst {dimension_numbers = #tpu.dot_dimension_numbers<[1], [0], [0], [1], [0, 0, 1, 1], [], []>} : vector<256x256xf32>, vector<256x384xf32>, vector<256x384xf32> -> vector<256x384xf32>
    %7 = arith.addf %3, %6 : vector<256x384xf32>
    %c0_6 = arith.constant 0 : index
    %c0_7 = arith.constant 0 : index
    %8 = vector.load %arg7[%c0_6, %c0_7] : memref<256x384xf32, #tpu.memory_space<vmem>>, vector<256x384xf32>
    tpu.vector_store %arg7[%c0_6, %c0_7], %7 {strides = array<i32>} : memref<256x384xf32, #tpu.memory_space<vmem>>, vector<256x384xf32>,
    %c0_i32_8 = arith.constant 0 : i32
    %9 = arith.cmpi eq, %arg2, %c0_i32_8 : i32
    %10 = arith.extui %9 : i1 to i32
    %c0_i32_9 = arith.constant 0 : i32
    %11 = arith.cmpi ne, %10, %c0_i32_9 : i32
    scf.if %11 {
      %c0_10 = arith.constant 0 : index
      %c0_11 = arith.constant 0 : index
      %12 = vector.load %arg7[%c0_10, %c0_11] : memref<256x384xf32, #tpu.memory_space<vmem>>, vector<256x384xf32>
      %c0_12 = arith.constant 0 : index
      %c0_13 = arith.constant 0 : index
      %13 = vector.load %arg5[%c0_12, %c0_13] : memref<1x384xf32, #tpu.memory_space<vmem>>, vector<1x384xf32>
      %14 = vector.broadcast %13 : vector<1x384xf32> to vector<256x384xf32>
      %15 = arith.addf %12, %14 : vector<256x384xf32>
      %c0_14 = arith.constant 0 : index
      %c0_15 = arith.constant 0 : index
      %16 = vector.load %arg6[%c0_14, %c0_15] : memref<256x384xf32, #tpu.memory_space<vmem>>, vector<256x384xf32>
      tpu.vector_store %arg6[%c0_14, %c0_15], %15 {strides = array<i32>} : memref<256x384xf32, #tpu.memory_space<vmem>>, vector<256x384xf32>,
    } else {
    }
    return
  }
  func.func @transform_0(%arg0: i32, %arg1: i32, %arg2: i32) -> (i32, i32) {
    %c0_i32 = arith.constant 0 : i32
    return %arg0, %arg2 : i32, i32
  }
  func.func @transform_1(%arg0: i32, %arg1: i32, %arg2: i32) -> (i32, i32) {
    %c0_i32 = arith.constant 0 : i32
    return %arg2, %arg1 : i32, i32
  }
  func.func @transform_2(%arg0: i32, %arg1: i32, %arg2: i32) -> (i32, i32) {
    %c0_i32 = arith.constant 0 : i32
    %c0_i32_0 = arith.constant 0 : i32
    return %c0_i32, %arg1 : i32, i32
  }
  func.func @transform_3(%arg0: i32, %arg1: i32, %arg2: i32) -> (i32, i32) {
    %c0_i32 = arith.constant 0 : i32
    return %arg0, %arg1 : i32, i32
  }
}

module attributes {stable_mosaic.version = 11 : i64} {
  func.func @_linear_kernel(%arg0: i32, %arg1: i32, %arg2: i32, %arg3: memref<256x256xf32, #tpu.memory_space<vmem>>, %arg4: memref<256x256xf32, #tpu.memory_space<vmem>>, %arg5: memref<1x256xf32, #tpu.memory_space<vmem>>, %arg6: memref<256x256xf32, #tpu.memory_space<vmem>>, %arg7: memref<256x256xf32, #tpu.memory_space<vmem>>) attributes {dimension_semantics = [#tpu.dimension_semantics<parallel>, #tpu.dimension_semantics<parallel>, #tpu.dimension_semantics<arbitrary>], iteration_bounds = array<i64: 1, 1, 1>, scalar_prefetch = 0 : i64, scratch_operands = 1 : i64, tpu.core_type = #tpu.core_type<tc>, window_params = [{transform_indices = @transform_0, window_bounds = array<i64: 256, 256>}, {transform_indices = @transform_1, window_bounds = array<i64: 256, 256>}, {transform_indices = @transform_2, window_bounds = array<i64: 1, 256>}, {transform_indices = @transform_3, window_bounds = array<i64: 256, 256>}]} {
    %c0_i32 = arith.constant 0 : i32
    %0 = arith.cmpi eq, %arg2, %c0_i32 : i32
    %1 = arith.extui %0 : i1 to i32
    %c0_i32_0 = arith.constant 0 : i32
    %2 = arith.cmpi ne, %1, %c0_i32_0 : i32
    scf.if %2 {
      %cst_10 = arith.constant 0.000000e+00 : f32
      %12 = vector.broadcast %cst_10 : f32 to vector<256x256xf32>
      %c0_11 = arith.constant 0 : index
      %c0_12 = arith.constant 0 : index
      %13 = vector.load %arg7[%c0_11, %c0_12] : memref<256x256xf32, #tpu.memory_space<vmem>>, vector<256x256xf32>
      tpu.vector_store %arg7[%c0_11, %c0_12], %12 {strides = array<i32>} : memref<256x256xf32, #tpu.memory_space<vmem>>, vector<256x256xf32>,
    } else {
    }
    %c0 = arith.constant 0 : index
    %c0_1 = arith.constant 0 : index
    %3 = vector.load %arg7[%c0, %c0_1] : memref<256x256xf32, #tpu.memory_space<vmem>>, vector<256x256xf32>
    %c0_2 = arith.constant 0 : index
    %c0_3 = arith.constant 0 : index
    %4 = vector.load %arg3[%c0_2, %c0_3] : memref<256x256xf32, #tpu.memory_space<vmem>>, vector<256x256xf32>
    %c0_4 = arith.constant 0 : index
    %c0_5 = arith.constant 0 : index
    %5 = vector.load %arg4[%c0_4, %c0_5] : memref<256x256xf32, #tpu.memory_space<vmem>>, vector<256x256xf32>
    %cst = arith.constant dense<0.000000e+00> : vector<256x256xf32>
    %6 = tpu.matmul %4, %5, %cst {dimension_numbers = #tpu.dot_dimension_numbers<[1], [0], [0], [1], [0, 0, 1, 1], [], []>} : vector<256x256xf32>, vector<256x256xf32>, vector<256x256xf32> -> vector<256x256xf32>
    %7 = arith.addf %3, %6 : vector<256x256xf32>
    %c0_6 = arith.constant 0 : index
    %c0_7 = arith.constant 0 : index
    %8 = vector.load %arg7[%c0_6, %c0_7] : memref<256x256xf32, #tpu.memory_space<vmem>>, vector<256x256xf32>
    tpu.vector_store %arg7[%c0_6, %c0_7], %7 {strides = array<i32>} : memref<256x256xf32, #tpu.memory_space<vmem>>, vector<256x256xf32>,
    %c0_i32_8 = arith.constant 0 : i32
    %9 = arith.cmpi eq, %arg2, %c0_i32_8 : i32
    %10 = arith.extui %9 : i1 to i32
    %c0_i32_9 = arith.constant 0 : i32
    %11 = arith.cmpi ne, %10, %c0_i32_9 : i32
    scf.if %11 {
      %c0_10 = arith.constant 0 : index
      %c0_11 = arith.constant 0 : index
      %12 = vector.load %arg7[%c0_10, %c0_11] : memref<256x256xf32, #tpu.memory_space<vmem>>, vector<256x256xf32>
      %c0_12 = arith.constant 0 : index
      %c0_13 = arith.constant 0 : index
      %13 = vector.load %arg5[%c0_12, %c0_13] : memref<1x256xf32, #tpu.memory_space<vmem>>, vector<1x256xf32>
      %14 = vector.broadcast %13 : vector<1x256xf32> to vector<256x256xf32>
      %15 = arith.addf %12, %14 : vector<256x256xf32>
      %c0_14 = arith.constant 0 : index
      %c0_15 = arith.constant 0 : index
      %16 = vector.load %arg6[%c0_14, %c0_15] : memref<256x256xf32, #tpu.memory_space<vmem>>, vector<256x256xf32>
      tpu.vector_store %arg6[%c0_14, %c0_15], %15 {strides = array<i32>} : memref<256x256xf32, #tpu.memory_space<vmem>>, vector<256x256xf32>,
    } else {
    }
    return
  }
  func.func @transform_0(%arg0: i32, %arg1: i32, %arg2: i32) -> (i32, i32) {
    %c0_i32 = arith.constant 0 : i32
    return %arg0, %arg2 : i32, i32
  }
  func.func @transform_1(%arg0: i32, %arg1: i32, %arg2: i32) -> (i32, i32) {
    %c0_i32 = arith.constant 0 : i32
    return %arg2, %arg1 : i32, i32
  }
  func.func @transform_2(%arg0: i32, %arg1: i32, %arg2: i32) -> (i32, i32) {
    %c0_i32 = arith.constant 0 : i32
    %c0_i32_0 = arith.constant 0 : i32
    return %c0_i32, %arg1 : i32, i32
  }
  func.func @transform_3(%arg0: i32, %arg1: i32, %arg2: i32) -> (i32, i32) {
    %c0_i32 = arith.constant 0 : i32
    return %arg0, %arg1 : i32, i32
  }
}

</mosaic_0001>

<bundles_post_ra>
// kernel: multi_head_attention.4
= control target key start
LH: loop header
LB: loop body
LE: loop exit
PB: predicated region body
PF: predicated region fallthrough
CT: control target
= control target key end

     0   :  { %s2330_s12 = smov 0   ;;  %s2332_s13 = smov 0   ;;  %s2987_s0 = inlined_call_operand.vmem [shape: f32[2,128,256], index: 0, kind: input, shape index: {}]   ;;  %s2988_s1 = inlined_call_operand.vmem [shape: f32[2,128,256], index: 1, kind: input, shape index: {}]   ;;  %s2989_s2 = inlined_call_operand.vmem [shape: f32[2,128,256], index: 2, kind: input, shape index: {}]   ;;  %s2990_s3 = inlined_call_operand.vmem [shape: f32[2,128,256], index: 3, kind: output, shape index: {}]  }
   0x1   :  { %s2334_s14 = smov 0   ;;  %s2336_s15 = smov 0  }
   0x2   :  { %s2338_s16 = smov 0   ;;  %s2340_s17 = smov 0  }
   0x3   :  { %s2342_s18 = smov 0  }
   0x4 LB: > { %s35_s19 = sadd.s32 1, %s2297_s16  ;;  %s39_s20 = sadd.s32 1, %s2301_s17  ;;  %s2305_s18 = sphi %s2342_s18, %s13_s18   ;;  %s2301_s17 = sphi %s2340_s17, %s3012_s17   ;;  %s2297_s16 = sphi %s2338_s16, %s3011_s16   ;;  %s2293_s15 = sphi %s2336_s15, %s3010_s15   ;;  %s2289_s14 = sphi %s2334_s14, %s3009_s14   ;;  %s2285_s13 = sphi %s2332_s13, %s3008_s13   ;;  %s2281_s12 = sphi %s2330_s12, %s3007_s12  }
   0x5   : > { %p37_p0 = scmp.ge.s32.totalorder %s35_s19, 2  ;;  %s1831_s21 = sadd.s32 4294967295, %s2305_s18  }
   0x6   : > { %p57_p1 = scmp.ne.s32.totalorder %s2285_s13, %s2281_s12  ;;  %p58_p2 = scmp.eq.s32.totalorder %s2305_s18, 0 }
   0x7   : > { %s3014_s19 = smov (%p37_p0, %s35_s19), 0  ;;  %s3016_s20 = smov (!%p37_p0, %s39_s20), %s2301_s17 }
   0x8   : > { %p41_p3 = scmp.ge.s32.totalorder %s3016_s20, 2  ;;  %p151_p4 = scmp.eq.s32.totalorder %s1831_s21, 3 }
   0x9   : > { %s46_s22 = ssub.s32 %s2297_s16, %s3014_s19  ;;  %p2376_p5 = por %p58_p2, %p57_p1 }
   0xa   : > { %s3018_s20 = smov (%p41_p3, %s3016_s20), 0  ;;  %p2382_p6 = por %p151_p4, %p57_p1 }
   0xb   : > { %s43_s25 = ssub.s32 %s2301_s17, %s3018_s20  ;;  %s50_s27 = sadd.s32 1, %s2285_s13 }
   0xc   : > { %s47_s26 = sor.u32 %s46_s22, %s43_s25  ;;  %p1834_p8 = scmp.ge.s32.totalorder %s2305_s18, 4 }
   0xd   : > { %p48_p7 = scmp.eq.s32.totalorder %s47_s26, 0 }
   0xe   : > { %173 = sbr.rel (%p1834_p8) target bundleno = 63 (0x3f), region = 16 }
   0xf   : > { %s2390_s28 = scalar_select %p48_p7, %s2285_s13, %s50_s27  }
  0x15   : > { %176 = sbr.rel (!%p2376_p5) target bundleno = 35 (0x23), region = 20  ;;  %s178_s29 = sand.u32 (%p2376_p5), 1, %s2285_s13  }
  0x16   : > { %s1836_s30 = sshll.u32 (%p2376_p5), %s2301_s17, 5  ;;  %s1835_s4 = sshll.u32 (%p2376_p5), %s178_s29, 7 }
  0x17   : > { %s185_s5 = sadd.s32 (%p2376_p5), %s2297_s16, %s1836_s30  ;;  %s180_s10 = scalar_lea.vmem (%p2376_p5), [#allocation5], %s1835_s4 }
  0x18   : > { %s1837_s6 = sshll.u32 (%p2376_p5), %s185_s5, 3 }
  0x19   : > { %s2401_s9 = scalar_lea.vmem (%p2376_p5), %s2987_s0, %s1837_s6 }
  0x1a   : > { %v245_v0 = vld [vmem:[%s2401_s9] sm:$0xff] (%p2376_p5)  ;;  %v247_v1 = vld [vmem:[%s2401_s9 + $0x10] sm:$0xff] (%p2376_p5) }
  0x1b   : > { %v249_v2 = vld [vmem:[%s2401_s9 + $0x20] sm:$0xff] (%p2376_p5)  ;;  %246 = vst [vmem:[%s180_s10] sm:$0xff] (%p2376_p5), %v245_v0  ;;  %248 = vst [vmem:[%s180_s10 + $0x8] sm:$0xff] (%p2376_p5), %v247_v1  ;;  %v251_v3 = vld [vmem:[%s2401_s9 + $0x30] sm:$0xff] (%p2376_p5) }
  0x1c   : > { %250 = vst [vmem:[%s180_s10 + $0x10] sm:$0xff] %v249_v2  ;;  %v253_v4 = vld [vmem:[%s2401_s9 + $0x40] sm:$0xff]  ;;  %v255_v5 = vld [vmem:[%s2401_s9 + $0x50] sm:$0xff]  ;;  %252 = vst [vmem:[%s180_s10 + $0x18] sm:$0xff] %v251_v3 }
  0x1d   : > { %254 = vst [vmem:[%s180_s10 + $0x20] sm:$0xff] %v253_v4  ;;  %256 = vst [vmem:[%s180_s10 + $0x28] sm:$0xff] %v255_v5  ;;  %v257_v6 = vld [vmem:[%s2401_s9 + $0x60] sm:$0xff]  ;;  %v259_v7 = vld [vmem:[%s2401_s9 + $0x70] sm:$0xff] }
  0x1e   : > { %v261_v8 = vld [vmem:[%s2401_s9 + $0x80] sm:$0xff]  ;;  %258 = vst [vmem:[%s180_s10 + $0x30] sm:$0xff] %v257_v6  ;;  %260 = vst [vmem:[%s180_s10 + $0x38] sm:$0xff] %v259_v7  ;;  %v263_v9 = vld [vmem:[%s2401_s9 + $0x90] sm:$0xff] }
  0x1f   : > { %262 = vst [vmem:[%s180_s10 + $0x40] sm:$0xff] %v261_v8  ;;  %v265_v10 = vld [vmem:[%s2401_s9 + $0xa0] sm:$0xff]  ;;  %v267_v11 = vld [vmem:[%s2401_s9 + $0xb0] sm:$0xff]  ;;  %264 = vst [vmem:[%s180_s10 + $0x48] sm:$0xff] %v263_v9 }
  0x20   : > { %266 = vst [vmem:[%s180_s10 + $0x50] sm:$0xff] %v265_v10  ;;  %268 = vst [vmem:[%s180_s10 + $0x58] sm:$0xff] %v267_v11  ;;  %v269_v12 = vld [vmem:[%s2401_s9 + $0xc0] sm:$0xff]  ;;  %v271_v13 = vld [vmem:[%s2401_s9 + $0xd0] sm:$0xff] }
  0x21   : > { %v273_v14 = vld [vmem:[%s2401_s9 + $0xe0] sm:$0xff]  ;;  %270 = vst [vmem:[%s180_s10 + $0x60] sm:$0xff] %v269_v12  ;;  %272 = vst [vmem:[%s180_s10 + $0x68] sm:$0xff] %v271_v13  ;;  %v275_v15 = vld [vmem:[%s2401_s9 + $0xf0] sm:$0xff] }
  0x22   : > { %274 = vst [vmem:[%s180_s10 + $0x70] sm:$0xff] %v273_v14  ;;  %276 = vst [vmem:[%s180_s10 + $0x78] sm:$0xff] %v275_v15 }
  0x23 PF: > { %282 = sbr.rel (!%p2376_p5) target bundleno = 49 (0x31), region = 58  ;;  %s284_s11 = sand.u32 (%p2376_p5), 1, %s2285_s13  }
  0x24   : > { %s1839_s21 = sshll.u32 (%p2376_p5), %s2301_s17, 5  ;;  %s1838_s22 = sshll.u32 (%p2376_p5), %s284_s11, 7 }
  0x25   : > { %s291_s25 = sadd.s32 (%p2376_p5), %s2297_s16, %s1839_s21  ;;  %s286_s4 = scalar_lea.vmem (%p2376_p5), [#allocation6], %s1838_s22 }
  0x26   : > { %s1840_s26 = sshll.u32 (%p2376_p5), %s291_s25, 3 }
  0x27   : > { %s2427_s30 = scalar_lea.vmem (%p2376_p5), %s2988_s1, %s1840_s26 }
  0x28   : > { %v351_v16 = vld [vmem:[%s2427_s30] sm:$0xff] (%p2376_p5)  ;;  %v353_v17 = vld [vmem:[%s2427_s30 + $0x10] sm:$0xff] (%p2376_p5) }
  0x29   : > { %v355_v18 = vld [vmem:[%s2427_s30 + $0x20] sm:$0xff] (%p2376_p5)  ;;  %352 = vst [vmem:[%s286_s4] sm:$0xff] (%p2376_p5), %v351_v16  ;;  %354 = vst [vmem:[%s286_s4 + $0x8] sm:$0xff] (%p2376_p5), %v353_v17  ;;  %v357_v19 = vld [vmem:[%s2427_s30 + $0x30] sm:$0xff] (%p2376_p5) }
  0x2a   : > { %356 = vst [vmem:[%s286_s4 + $0x10] sm:$0xff] %v355_v18  ;;  %v359_v20 = vld [vmem:[%s2427_s30 + $0x40] sm:$0xff]  ;;  %v361_v21 = vld [vmem:[%s2427_s30 + $0x50] sm:$0xff]  ;;  %358 = vst [vmem:[%s286_s4 + $0x18] sm:$0xff] %v357_v19 }
  0x2b   : > { %360 = vst [vmem:[%s286_s4 + $0x20] sm:$0xff] %v359_v20  ;;  %362 = vst [vmem:[%s286_s4 + $0x28] sm:$0xff] %v361_v21  ;;  %v363_v22 = vld [vmem:[%s2427_s30 + $0x60] sm:$0xff]  ;;  %v365_v23 = vld [vmem:[%s2427_s30 + $0x70] sm:$0xff] }
  0x2c   : > { %v367_v24 = vld [vmem:[%s2427_s30 + $0x80] sm:$0xff]  ;;  %364 = vst [vmem:[%s286_s4 + $0x30] sm:$0xff] %v363_v22  ;;  %366 = vst [vmem:[%s286_s4 + $0x38] sm:$0xff] %v365_v23  ;;  %v369_v25 = vld [vmem:[%s2427_s30 + $0x90] sm:$0xff] }
  0x2d   : > { %368 = vst [vmem:[%s286_s4 + $0x40] sm:$0xff] %v367_v24  ;;  %v371_v26 = vld [vmem:[%s2427_s30 + $0xa0] sm:$0xff]  ;;  %v373_v27 = vld [vmem:[%s2427_s30 + $0xb0] sm:$0xff]  ;;  %370 = vst [vmem:[%s286_s4 + $0x48] sm:$0xff] %v369_v25 }
  0x2e   : > { %372 = vst [vmem:[%s286_s4 + $0x50] sm:$0xff] %v371_v26  ;;  %374 = vst [vmem:[%s286_s4 + $0x58] sm:$0xff] %v373_v27  ;;  %v375_v28 = vld [vmem:[%s2427_s30 + $0xc0] sm:$0xff]  ;;  %v377_v29 = vld [vmem:[%s2427_s30 + $0xd0] sm:$0xff] }
  0x2f   : > { %v379_v30 = vld [vmem:[%s2427_s30 + $0xe0] sm:$0xff]  ;;  %376 = vst [vmem:[%s286_s4 + $0x60] sm:$0xff] %v375_v28  ;;  %378 = vst [vmem:[%s286_s4 + $0x68] sm:$0xff] %v377_v29  ;;  %v381_v31 = vld [vmem:[%s2427_s30 + $0xf0] sm:$0xff] }
  0x30   : > { %380 = vst [vmem:[%s286_s4 + $0x70] sm:$0xff] %v379_v30  ;;  %382 = vst [vmem:[%s286_s4 + $0x78] sm:$0xff] %v381_v31 }
  0x31 PF: > { %388 = sbr.rel (!%p2376_p5) target bundleno = 63 (0x3f), region = 96  ;;  %s390_s5 = sand.u32 (%p2376_p5), 1, %s2285_s13  }
  0x32   : > { %s1842_s6 = sshll.u32 (%p2376_p5), %s2301_s17, 5  ;;  %s1841_s7 = sshll.u32 (%p2376_p5), %s390_s5, 7 }
  0x33   : > { %s397_s8 = sadd.s32 (%p2376_p5), %s2297_s16, %s1842_s6  ;;  %s392_s23 = scalar_lea.vmem (%p2376_p5), [#allocation7], %s1841_s7 }
  0x34   : > { %s1843_s9 = sshll.u32 (%p2376_p5), %s397_s8, 3 }
  0x35   : > { %s2453_s21 = scalar_lea.vmem (%p2376_p5), %s2989_s2, %s1843_s9 }
  0x36   : > { %v457_v32 = vld [vmem:[%s2453_s21] sm:$0xff] (%p2376_p5)  ;;  %v459_v33 = vld [vmem:[%s2453_s21 + $0x10] sm:$0xff] (%p2376_p5) }
  0x37   : > { %v461_v34 = vld [vmem:[%s2453_s21 + $0x20] sm:$0xff] (%p2376_p5)  ;;  %458 = vst [vmem:[%s392_s23] sm:$0xff] (%p2376_p5), %v457_v32  ;;  %460 = vst [vmem:[%s392_s23 + $0x8] sm:$0xff] (%p2376_p5), %v459_v33  ;;  %v463_v35 = vld [vmem:[%s2453_s21 + $0x30] sm:$0xff] (%p2376_p5) }
  0x38   : > { %462 = vst [vmem:[%s392_s23 + $0x10] sm:$0xff] %v461_v34  ;;  %v465_v36 = vld [vmem:[%s2453_s21 + $0x40] sm:$0xff]  ;;  %v467_v37 = vld [vmem:[%s2453_s21 + $0x50] sm:$0xff]  ;;  %464 = vst [vmem:[%s392_s23 + $0x18] sm:$0xff] %v463_v35 }
  0x39   : > { %466 = vst [vmem:[%s392_s23 + $0x20] sm:$0xff] %v465_v36  ;;  %468 = vst [vmem:[%s392_s23 + $0x28] sm:$0xff] %v467_v37  ;;  %v469_v38 = vld [vmem:[%s2453_s21 + $0x60] sm:$0xff]  ;;  %v471_v39 = vld [vmem:[%s2453_s21 + $0x70] sm:$0xff] }
  0x3a   : > { %v473_v40 = vld [vmem:[%s2453_s21 + $0x80] sm:$0xff]  ;;  %470 = vst [vmem:[%s392_s23 + $0x30] sm:$0xff] %v469_v38  ;;  %472 = vst [vmem:[%s392_s23 + $0x38] sm:$0xff] %v471_v39  ;;  %v475_v41 = vld [vmem:[%s2453_s21 + $0x90] sm:$0xff] }
  0x3b   : > { %474 = vst [vmem:[%s392_s23 + $0x40] sm:$0xff] %v473_v40  ;;  %v477_v42 = vld [vmem:[%s2453_s21 + $0xa0] sm:$0xff]  ;;  %v479_v43 = vld [vmem:[%s2453_s21 + $0xb0] sm:$0xff]  ;;  %476 = vst [vmem:[%s392_s23 + $0x48] sm:$0xff] %v475_v41 }
  0x3c   : > { %478 = vst [vmem:[%s392_s23 + $0x50] sm:$0xff] %v477_v42  ;;  %480 = vst [vmem:[%s392_s23 + $0x58] sm:$0xff] %v479_v43  ;;  %v481_v44 = vld [vmem:[%s2453_s21 + $0xc0] sm:$0xff]  ;;  %v483_v45 = vld [vmem:[%s2453_s21 + $0xd0] sm:$0xff] }
  0x3d   : > { %v485_v46 = vld [vmem:[%s2453_s21 + $0xe0] sm:$0xff]  ;;  %482 = vst [vmem:[%s392_s23 + $0x60] sm:$0xff] %v481_v44  ;;  %484 = vst [vmem:[%s392_s23 + $0x68] sm:$0xff] %v483_v45  ;;  %v487_v47 = vld [vmem:[%s2453_s21 + $0xf0] sm:$0xff] }
  0x3e   : > { %486 = vst [vmem:[%s392_s23 + $0x70] sm:$0xff] %v485_v46  ;;  %488 = vst [vmem:[%s392_s23 + $0x78] sm:$0xff] %v487_v47 }
  0x3f PF: > { %p1844_p9 = scmp.ge.s32.totalorder %s2305_s18, 1  ;;  %p493_p10 = scmp.lt.s32.totalorder %s2305_s18, 5 }
  0x41   : > { %p494_p11 = pnand %p1844_p9, %p493_p10 }
  0x42   : > { %s500_s22 = sand.u32 (!%p494_p11), 1, %s2281_s12   ;;  %vm552_vm0 = vcmask (!%p494_p11), 7168   ;;  %v2307_v24 = vmov (!%p494_p11), -inf   ;;  %v2308_v35 = vmov (!%p494_p11), 0   ;;  %v2309_v40 = vmov (!%p494_p11), 0.0  }
  0x43   : > { %497 = sbr.rel (%p494_p11) target bundleno = 982 (0x3d6), region = 134  ;;  %s2474_s25 = sshll.u32 (!%p494_p11), %s500_s22, 7  ;;  %553 = vst.msk [vmem:[#allocation2] sm:$0xff] (!%p494_p11), %vm552_vm0, %v2307_v24  ;;  %554 = vst.msk [vmem:[#allocation2 + $0x8] sm:$0xff] (!%p494_p11), %vm552_vm0, %v2307_v24  ;;  %2153 = vset.pattern.permute.xlu0 (!%p494_p11), %v2308_v35  ;;  %2154 = vset.pattern.permute.xlu1 (!%p494_p11), %v2308_v35 }
  0x44   : > { %s2477_s26 = scalar_lea.vmem (!%p494_p11), [#allocation6], %s2474_s25  ;;  %s2484_s12 = scalar_lea.vmem (!%p494_p11), [#allocation5], %s2474_s25  ;;  %555 = vst.msk [vmem:[#allocation2 + $0x10] sm:$0xff] (!%p494_p11), %vm552_vm0, %v2307_v24  ;;  %556 = vst.msk [vmem:[#allocation2 + $0x18] sm:$0xff] (!%p494_p11), %vm552_vm0, %v2307_v24 }
  0x45   : > { %v617_v48 = vld [vmem:[%s2477_s26] sm:$0xff] (!%p494_p11)  ;;  %v618_v49 = vld [vmem:[%s2477_s26 + $0x8] sm:$0xff] (!%p494_p11)  ;;  %v619_v50 = vld [vmem:[%s2477_s26 + $0x10] sm:$0xff] (!%p494_p11)  ;;  %557 = vst.msk [vmem:[#allocation2 + $0x20] sm:$0xff] (!%p494_p11), %vm552_vm0, %v2307_v24  ;;  %s2595_s27 = scalar_lea.vmem (!%p494_p11), [#allocation7], %s2474_s25  ;;  %s2916_s29 = scalar_lea.vmem (!%p494_p11), [#allocation8], %s2474_s25 }
  0x46   : > { %v2030_v51 = vpack.c.bf16 (!%p494_p11), %v618_v49, %v617_v48  ;;  %v620_v52 = vld [vmem:[%s2477_s26 + $0x18] sm:$0xff] (!%p494_p11)  ;;  %v601_v54 = vld [vmem:[%s2484_s12] sm:$0xff] (!%p494_p11)  ;;  %v622_v56 = vld [vmem:[%s2477_s26 + $0x28] sm:$0xff] (!%p494_p11)  ;;  %558 = vst.msk [vmem:[#allocation2 + $0x28] sm:$0xff] (!%p494_p11), %vm552_vm0, %v2307_v24 }
  0x47   : > { %v2034_v53 = vpack.c.bf16 (!%p494_p11), %v620_v52, %v619_v50  ;;  %v621_v55 = vld [vmem:[%s2477_s26 + $0x20] sm:$0xff] (!%p494_p11)  ;;  %1950 = vmatprep.mubr.f32.mxu0 (!%p494_p11), %v601_v54  ;;  %v623_v58 = vld [vmem:[%s2477_s26 + $0x30] sm:$0xff] (!%p494_p11)  ;;  %v624_v59 = vld [vmem:[%s2477_s26 + $0x38] sm:$0xff] (!%p494_p11)  ;;  %559 = vst.msk [vmem:[#allocation2 + $0x30] sm:$0xff] (!%p494_p11), %vm552_vm0, %v2307_v24 }
  0x48   : > { %2031 = vmatprep.subr.bf16.mxu0 (!%p494_p11), %v2030_v51  ;;  %v2038_v57 = vpack.c.bf16 (!%p494_p11), %v622_v56, %v621_v55  ;;  %v2042_v60 = vpack.c.bf16 (!%p494_p11), %v624_v59, %v623_v58  ;;  %v625_v61 = vld [vmem:[%s2477_s26 + $0x40] sm:$0xff] (!%p494_p11)  ;;  %v626_v62 = vld [vmem:[%s2477_s26 + $0x48] sm:$0xff] (!%p494_p11)  ;;  %v627_v0 = vld [vmem:[%s2477_s26 + $0x50] sm:$0xff] (!%p494_p11)  ;;  %560 = vst.msk [vmem:[#allocation2 + $0x38] sm:$0xff] (!%p494_p11), %vm552_vm0, %v2307_v24 }
  0x49   : > { %2033 = vmatpush3.bf16.xpose.msra.mxu0 (!%p494_p11), %v2030_v51  ;;  %v2046_v63 = vpack.c.bf16 (!%p494_p11), %v626_v62, %v625_v61  ;;  %v628_v1 = vld [vmem:[%s2477_s26 + $0x58] sm:$0xff] (!%p494_p11)  ;;  %v629_v3 = vld [vmem:[%s2477_s26 + $0x60] sm:$0xff] (!%p494_p11)  ;;  %v630_v4 = vld [vmem:[%s2477_s26 + $0x68] sm:$0xff] (!%p494_p11)  ;;  %561 = vst.msk [vmem:[#allocation2 + $0x40] sm:$0xff] (!%p494_p11), %vm552_vm0, %v2307_v24 }
  0x4a   : > { %2035 = vmatprep.subr.bf16.mxu0 %v2034_v53  ;;  %v2050_v2 = vpack.c.bf16 %v628_v1, %v627_v0  ;;  %v2054_v5 = vpack.c.bf16 %v630_v4, %v629_v3  ;;  %v631_v6 = vld [vmem:[%s2477_s26 + $0x70] sm:$0xff]  ;;  %v632_v7 = vld [vmem:[%s2477_s26 + $0x78] sm:$0xff]  ;;  %v602_v9 = vld [vmem:[%s2484_s12 + $0x8] sm:$0xff]  ;;  %562 = vst.msk [vmem:[#allocation2 + $0x48] sm:$0xff] %vm552_vm0, %v2307_v24  ;;  %s1850_s30 = sshll.u32 (%p2382_p6), %s2293_s15, 5 }
  0x4b   : > { %v2058_v8 = vpack.c.bf16 %v632_v7, %v631_v6  ;;  %v603_v10 = vld [vmem:[%s2484_s12 + $0x10] sm:$0xff]  ;;  %v604_v11 = vld [vmem:[%s2484_s12 + $0x18] sm:$0xff]  ;;  %v605_v12 = vld [vmem:[%s2484_s12 + $0x20] sm:$0xff]  ;;  %563 = vst.msk [vmem:[#allocation2 + $0x50] sm:$0xff] %vm552_vm0, %v2307_v24  ;;  %s1610_s24 = sadd.s32 (%p2382_p6), %s2289_s14, %s1850_s30 }
  0x4c   : > { %v606_v13 = vld [vmem:[%s2484_s12 + $0x28] sm:$0xff]  ;;  %v607_v14 = vld [vmem:[%s2484_s12 + $0x30] sm:$0xff]  ;;  %v608_v15 = vld [vmem:[%s2484_s12 + $0x38] sm:$0xff]  ;;  %564 = vst.msk [vmem:[#allocation2 + $0x58] sm:$0xff] %vm552_vm0, %v2307_v24  ;;  %s1851_s4 = sshll.u32 (%p2382_p6), %s1610_s24, 3 }
  0x4d   : > { %v609_v16 = vld [vmem:[%s2484_s12 + $0x40] sm:$0xff]  ;;  %v610_v17 = vld [vmem:[%s2484_s12 + $0x48] sm:$0xff]  ;;  %v611_v18 = vld [vmem:[%s2484_s12 + $0x50] sm:$0xff]  ;;  %565 = vst.msk [vmem:[#allocation2 + $0x60] sm:$0xff] %vm552_vm0, %v2307_v24  ;;  %s1612_s7 = scalar_lea.vmem (%p2382_p6), %s2990_s3, %s1851_s4 }
  0x4e   : > { %v612_v19 = vld [vmem:[%s2484_s12 + $0x58] sm:$0xff]  ;;  %v613_v20 = vld [vmem:[%s2484_s12 + $0x60] sm:$0xff]  ;;  %v614_v21 = vld [vmem:[%s2484_s12 + $0x68] sm:$0xff]  ;;  %566 = vst.msk [vmem:[#allocation2 + $0x68] sm:$0xff] %vm552_vm0, %v2307_v24 }
  0x4f   : > { %v615_v22 = vld [vmem:[%s2484_s12 + $0x70] sm:$0xff]  ;;  %v616_v23 = vld [vmem:[%s2484_s12 + $0x78] sm:$0xff]  ;;  %567 = vst.msk [vmem:[#allocation2 + $0x70] sm:$0xff] %vm552_vm0, %v2307_v24  ;;  %568 = vst.msk [vmem:[#allocation2 + $0x78] sm:$0xff] %vm552_vm0, %v2307_v24 }
  0x50   : > { %569 = vst.msk [vmem:[#allocation3] sm:$0xff] %vm552_vm0, %v2309_v40  ;;  %570 = vst.msk [vmem:[#allocation3 + $0x8] sm:$0xff] %vm552_vm0, %v2309_v40  ;;  %v633_v43 = vld [vmem:[%s2595_s27] sm:$0xff]  ;;  %v634_v44 = vld [vmem:[%s2595_s27 + $0x8] sm:$0xff] }
  0x51   : > { %2037 = vmatpush3.bf16.xpose.msra.mxu0 %v2034_v53  ;;  %571 = vst.msk [vmem:[#allocation3 + $0x10] sm:$0xff] %vm552_vm0, %v2309_v40  ;;  %572 = vst.msk [vmem:[#allocation3 + $0x18] sm:$0xff] %vm552_vm0, %v2309_v40  ;;  %v635_v45 = vld [vmem:[%s2595_s27 + $0x10] sm:$0xff]  ;;  %v2062_v46 = vpack.c.bf16 %v634_v44, %v633_v43  ;;  %v636_v47 = vld [vmem:[%s2595_s27 + $0x18] sm:$0xff] }
  0x52   : > { %2039 = vmatprep.subr.bf16.mxu0 %v2038_v57  ;;  %573 = vst.msk [vmem:[#allocation3 + $0x20] sm:$0xff] %vm552_vm0, %v2309_v40  ;;  %574 = vst.msk [vmem:[#allocation3 + $0x28] sm:$0xff] %vm552_vm0, %v2309_v40  ;;  %v2066_v48 = vpack.c.bf16 %v636_v47, %v635_v45  ;;  %v637_v49 = vld [vmem:[%s2595_s27 + $0x20] sm:$0xff]  ;;  %v638_v50 = vld [vmem:[%s2595_s27 + $0x28] sm:$0xff] }
  0x53   : > { %575 = vst.msk [vmem:[#allocation3 + $0x30] sm:$0xff] %vm552_vm0, %v2309_v40  ;;  %576 = vst.msk [vmem:[#allocation3 + $0x38] sm:$0xff] %vm552_vm0, %v2309_v40  ;;  %2063 = vmatprep.subr.bf16.mxu1 %v2062_v46  ;;  %v2070_v51 = vpack.c.bf16 %v638_v50, %v637_v49  ;;  %v639_v52 = vld [vmem:[%s2595_s27 + $0x30] sm:$0xff]  ;;  %v640_v53 = vld [vmem:[%s2595_s27 + $0x38] sm:$0xff] }
  0x54   : > { %577 = vst.msk [vmem:[#allocation3 + $0x40] sm:$0xff] %vm552_vm0, %v2309_v40  ;;  %578 = vst.msk [vmem:[#allocation3 + $0x48] sm:$0xff] %vm552_vm0, %v2309_v40  ;;  %2065 = vmatpush3.bf16.msra.mxu1 %v2062_v46  ;;  %v2074_v54 = vpack.c.bf16 %v640_v53, %v639_v52  ;;  %v2605_v55 = vld [vmem:[#allocation2] sm:$0xff]  ;;  %v2610_v58 = vld [vmem:[#allocation2 + $0x18] sm:$0xff] }
  0x55   : > { %579 = vst.msk [vmem:[#allocation3 + $0x50] sm:$0xff] %vm552_vm0, %v2309_v40  ;;  %580 = vst.msk [vmem:[#allocation3 + $0x58] sm:$0xff] %vm552_vm0, %v2309_v40  ;;  %2067 = vmatprep.subr.bf16.mxu1 %v2066_v48  ;;  %v2612_v59 = vld [vmem:[#allocation2 + $0x8] sm:$0xff]  ;;  %v641_v62 = vld [vmem:[%s2595_s27 + $0x40] sm:$0xff] }
  0x56   : > { %581 = vst.msk [vmem:[#allocation3 + $0x60] sm:$0xff] %vm552_vm0, %v2309_v40  ;;  %582 = vst.msk [vmem:[#allocation3 + $0x68] sm:$0xff] %vm552_vm0, %v2309_v40  ;;  %v2627_v4 = vld [vmem:[#allocation2 + $0x10] sm:$0xff]  ;;  %v2633_v6 = vld [vmem:[#allocation2 + $0x20] sm:$0xff] }
  0x57   : > { %583 = vst.msk [vmem:[#allocation3 + $0x70] sm:$0xff] %vm552_vm0, %v2309_v40  ;;  %584 = vst.msk [vmem:[#allocation3 + $0x78] sm:$0xff] %vm552_vm0, %v2309_v40  ;;  %v2666_v35 = vld [vmem:[#allocation2 + $0x38] sm:$0xff]  ;;  %v2675_v44 = vld [vmem:[#allocation2 + $0x40] sm:$0xff] }
  0x58   : > { %2069 = vmatpush3.bf16.msra.mxu1 %v2066_v48  ;;  %v647_v47 = vld [vmem:[%s2595_s27 + $0x70] sm:$0xff]  ;;  %v648_v48 = vld [vmem:[%s2595_s27 + $0x78] sm:$0xff]  ;;  %v2687_v52 = vld [vmem:[#allocation2 + $0x48] sm:$0xff] }
  0x59   : > { %2041 = vmatpush3.bf16.xpose.msra.mxu0 %v2038_v57  ;;  %2071 = vmatprep.subr.bf16.mxu1 %v2070_v51 }
  0x5a   : > { %2043 = vmatprep.subr.bf16.mxu0 %v2042_v60 }
  0x5c   : > { %2073 = vmatpush3.bf16.msra.mxu1 %v2070_v51  ;;  %v2090_v51 = vpack.c.bf16 %v648_v48, %v647_v47 }
  0x5d   : > { %2075 = vmatprep.subr.bf16.mxu1 %v2074_v54 }
  0x60   : > { %2077 = vmatpush3.bf16.msra.mxu1 %v2074_v54 }
  0x61   : > { %2045 = vmatpush3.bf16.xpose.msra.mxu0 %v2042_v60 }
  0x62   : > { %2047 = vmatprep.subr.bf16.mxu0 %v2046_v63 }
  0x69   : > { %2049 = vmatpush3.bf16.xpose.msra.mxu0 %v2046_v63  ;;  %v642_v63 = vld [vmem:[%s2595_s27 + $0x48] sm:$0xff] }
  0x6a   : > { %2051 = vmatprep.subr.bf16.mxu0 %v2050_v2 }
  0x71   : > { %2053 = vmatpush3.bf16.xpose.msra.mxu0 %v2050_v2  ;;  %v2078_v2 = vpack.c.bf16 %v642_v63, %v641_v62 }
  0x72   : > { %2055 = vmatprep.subr.bf16.mxu0 %v2054_v5 }
  0x73   : > { %2079 = vmatprep.subr.bf16.mxu1 %v2078_v2 }
  0x74   : > { %2081 = vmatpush3.bf16.msra.mxu1 %v2078_v2  ;;  %v2706_v2 = vld [vmem:[#allocation2 + $0x58] sm:$0xff] }
  0x79   : > { %2057 = vmatpush3.bf16.xpose.msra.mxu0 %v2054_v5 }
  0x7a   : > { %2059 = vmatprep.subr.bf16.mxu0 %v2058_v8 }
  0x81   : > { %2061 = vmatpush3.bf16.xpose.msra.mxu0 %v2058_v8 }
  0x88   : > { %1951 = vmatmul.mubr.f32.vlgmr.msra.gmra.mrb[0].mxu0 %v602_v9  ;;  %v643_v9 = vld [vmem:[%s2595_s27 + $0x50] sm:$0xff] }
  0x89   : > { %1953 = vmatprep.mubr.f32.mxu0 %v603_v10  ;;  %v644_v10 = vld [vmem:[%s2595_s27 + $0x58] sm:$0xff] }
  0x8c   : > { %1954 = vmatmul.mubr.f32.gmra.mrb[2].mxu0 %v604_v11 }
  0x8d   : > { %1956 = vmatprep.mubr.f32.mxu0 %v605_v12 }
  0x90   : > { %1957 = vmatmul.mubr.f32.gmra.mrb[4].mxu0 %v606_v13  ;;  %v2082_v13 = vpack.c.bf16 %v644_v10, %v643_v9  ;;  %v2716_v10 = vld [vmem:[#allocation2 + $0x60] sm:$0xff] }
  0x91   : > { %1959 = vmatprep.mubr.f32.mxu0 %v607_v14  ;;  %v2645_v14 = vld [vmem:[#allocation2 + $0x28] sm:$0xff] }
  0x92   : > { %2083 = vmatprep.subr.bf16.mxu1 %v2082_v13 }
  0x93   : > { %2085 = vmatpush3.bf16.msra.mxu1 %v2082_v13 }
  0x94   : > { %1960 = vmatmul.mubr.f32.gmra.mrb[6].mxu0 %v608_v15 }
  0x95   : > { %1962 = vmatprep.mubr.f32.mxu0 %v609_v16 }
  0x98   : > { %1963 = vmatmul.mubr.f32.gmra.mrb[8].mxu0 %v610_v17  ;;  %v2654_v17 = vld [vmem:[#allocation2 + $0x30] sm:$0xff] }
  0x99   : > { %1965 = vmatprep.mubr.f32.mxu0 %v611_v18 }
  0x9c   : > { %1966 = vmatmul.mubr.f32.gmra.mrb[10].mxu0 %v612_v19 }
  0x9d   : > { %1968 = vmatprep.mubr.f32.mxu0 %v613_v20  ;;  %v645_v20 = vld [vmem:[%s2595_s27 + $0x60] sm:$0xff] }
  0xa0   : > { %1969 = vmatmul.mubr.f32.gmra.mrb[12].mxu0 %v614_v21  ;;  %v646_v21 = vld [vmem:[%s2595_s27 + $0x68] sm:$0xff] }
  0xa1   : > { %1971 = vmatprep.mubr.f32.mxu0 %v615_v22  ;;  %v2086_v24 = vpack.c.bf16 %v646_v21, %v645_v20  ;;  %v2726_v21 = vld [vmem:[#allocation2 + $0x68] sm:$0xff] }
  0xa3   : > { %2087 = vmatprep.subr.bf16.mxu1 %v2086_v24 }
  0xa4   : > { %1972 = vmatmul.mubr.f32.gmra.mrb[14].mxu0 %v616_v23  ;;  %2089 = vmatpush3.bf16.msra.mxu1 %v2086_v24 }
  0xa5   : > { %2091 = vmatprep.subr.bf16.mxu1 %v2090_v51 }
  0xa8   : > { %2093 = vmatpush3.bf16.msra.mxu1 %v2090_v51 }
 0x15b   : > { %v2530_v25 = vpop.f32.mrb[0].mxu0 }
 0x15c   : > { %v2532_v26 = vpop.f32.mrb[1].mxu0 }
 0x15d   : > { %810 = vmax.xlane.f32.xlu0 %v2532_v26 }
 0x15f   : > { %v2535_v27 = vpop.f32.mrb[2].mxu0 }
 0x160   : > { %816 = vmax.xlane.f32.xlu1 %v2535_v27  ;;  %v2538_v28 = vpop.f32.mrb[3].mxu0 }
 0x161   : > { %812 = vmax.xlane.f32.xlu0 %v2530_v25 }
 0x163   : > { %v2541_v29 = vpop.f32.mrb[4].mxu0 }
 0x164   : > { %814 = vmax.xlane.f32.xlu1 %v2538_v28  ;;  %v2544_v30 = vpop.f32.mrb[5].mxu0 }
 0x165   : > { %818 = vmax.xlane.f32.xlu0 %v2544_v30 }
 0x167   : > { %v2547_v31 = vpop.f32.mrb[6].mxu0 }
 0x168   : > { %820 = vmax.xlane.f32.xlu1 %v2541_v29  ;;  %v2550_v32 = vpop.f32.mrb[7].mxu0 }
 0x169   : > { %822 = vmax.xlane.f32.xlu0 %v2550_v32 }
 0x16b   : > { %v2553_v33 = vpop.f32.mrb[8].mxu0 }
 0x16c   : > { %824 = vmax.xlane.f32.xlu1 %v2547_v31  ;;  %v2556_v34 = vpop.f32.mrb[9].mxu0 }
 0x16d   : > { %826 = vmax.xlane.f32.xlu0 %v2556_v34 }
 0x16f   : > { %v2559_v36 = vpop.f32.mrb[10].mxu0 }
 0x170   : > { %828 = vmax.xlane.f32.xlu1 %v2553_v33  ;;  %v2562_v37 = vpop.f32.mrb[11].mxu0 }
 0x171   : > { %830 = vmax.xlane.f32.xlu0 %v2562_v37 }
 0x173   : > { %v2565_v38 = vpop.f32.mrb[12].mxu0 }
 0x174   : > { %832 = vmax.xlane.f32.xlu1 %v2559_v36  ;;  %v2568_v39 = vpop.f32.mrb[13].mxu0 }
 0x175   : > { %834 = vmax.xlane.f32.xlu0 %v2568_v39 }
 0x177   : > { %v2587_v41 = vpop.f32.mrb[14].mxu0 }
 0x178   : > { %836 = vmax.xlane.f32.xlu1 %v2565_v38  ;;  %v2590_v42 = vpop.f32.mrb[15].mxu0 }
 0x179   : > { %838 = vmax.xlane.f32.xlu0 %v2590_v42 }
 0x17c   : > { %840 = vmax.xlane.f32.xlu1 %v2587_v41 }
 0x1ea   : > { %v811_v56 = vpop.xlane.xlu0 %810 }
 0x1eb   : > { %v2608_v57 = vmax.f32 %v2605_v55, %v811_v56  ;;  %v2696_v56 = vld [vmem:[#allocation2 + $0x50] sm:$0xff] }
 0x1ed   : > { %1420 = vst.msk [vmem:[#allocation2] sm:$0xff] %vm552_vm0, %v2608_v57  ;;  %v817_v61 = vpop.xlane.xlu1 %816  ;;  %908 = vperm.xlu0 %2153, %v2608_v57  }
 0x1ee   : > { %v2622_v0 = vmax.f32 %v2610_v58, %v817_v61  ;;  %v813_v1 = vpop.xlane.xlu0 %812 }
 0x1ef   : > { %v2625_v3 = vmax.f32 %v2612_v59, %v813_v1 }
 0x1f0   : > { %1423 = vst.msk [vmem:[#allocation2 + $0x18] sm:$0xff] %vm552_vm0, %v2622_v0 }
 0x1f1   : > { %v859_v7 = vsub.f32 %v2612_v59, %v2625_v3  ;;  %1421 = vst.msk [vmem:[#allocation2 + $0x8] sm:$0xff] %vm552_vm0, %v2625_v3  ;;  %v815_v8 = vpop.xlane.xlu1 %814  ;;  %913 = vperm.xlu1 %2154, %v2625_v3   ;;  %v2995_v59 = vsub.f32 %v2610_v58, %v2622_v0 }
 0x1f2   : > { %v2643_v11 = vmax.f32 %v2627_v4, %v815_v8  ;;  %v819_v12 = vpop.xlane.xlu0 %818 }
 0x1f3   : > { %v2648_v15 = vmax.f32 %v2633_v6, %v819_v12  ;;  %v880_v3 = vmul.f32 1.442695, %v2995_v59 }
 0x1f4   : > { %v860_v16 = vsub.f32 %v2627_v4, %v2643_v11  ;;  %1422 = vst.msk [vmem:[#allocation2 + $0x10] sm:$0xff] %vm552_vm0, %v2643_v11 }
 0x1f5   : > { %v821_v18 = vpop.xlane.xlu1 %820  ;;  %923 = vperm.xlu1 %2154, %v2622_v0   ;;  %1424 = vst.msk [vmem:[#allocation2 + $0x20] sm:$0xff] %vm552_vm0, %v2648_v15 }
 0x1f6   : > { %v2664_v22 = vmax.f32 %v2645_v14, %v821_v18  ;;  %v823_v23 = vpop.xlane.xlu0 %822 }
 0x1f7   : > { %v2669_v40 = vmax.f32 %v2654_v17, %v823_v23 }
 0x1f8   : > { %1425 = vst.msk [vmem:[#allocation2 + $0x28] sm:$0xff] %vm552_vm0, %v2664_v22 }
 0x1f9   : > { %v825_v45 = vpop.xlane.xlu1 %824  ;;  %918 = vperm.xlu1 %2154, %v2643_v11   ;;  %1426 = vst.msk [vmem:[#allocation2 + $0x30] sm:$0xff] %vm552_vm0, %v2669_v40 }
 0x1fa   : > { %v2685_v49 = vmax.f32 %v2666_v35, %v825_v45  ;;  %v827_v50 = vpop.xlane.xlu0 %826  ;;  %v2736_v45 = vld [vmem:[#allocation2 + $0x70] sm:$0xff] }
 0x1fb   : > { %v2690_v53 = vmax.f32 %v2675_v44, %v827_v50 }
 0x1fc   : > { %1427 = vst.msk [vmem:[#allocation2 + $0x38] sm:$0xff] %vm552_vm0, %v2685_v49  ;;  %v2999_v58 = vsub.f32 %v2666_v35, %v2685_v49 }
 0x1fd   : > { %v829_v61 = vpop.xlane.xlu1 %828  ;;  %933 = vperm.xlu1 %2154, %v2664_v22   ;;  %1428 = vst.msk [vmem:[#allocation2 + $0x40] sm:$0xff] %vm552_vm0, %v2690_v53 }
 0x1fe   : > { %v2704_v63 = vmax.f32 %v2687_v52, %v829_v61  ;;  %v831_v1 = vpop.xlane.xlu0 %830  ;;  %v2746_v61 = vld [vmem:[#allocation2 + $0x78] sm:$0xff]  ;;  %v888_v0 = vmul.f32 1.442695, %v2999_v58 }
 0x1ff   : > { %v2709_v8 = vmax.f32 %v2696_v56, %v831_v1 }
 0x200   : > { %1429 = vst.msk [vmem:[#allocation2 + $0x48] sm:$0xff] %vm552_vm0, %v2704_v63  ;;  %953 = vperm.xlu0 %2153, %v2704_v63  }
 0x201   : > { %v833_v12 = vpop.xlane.xlu1 %832  ;;  %928 = vperm.xlu1 %2154, %v2648_v15   ;;  %1430 = vst.msk [vmem:[#allocation2 + $0x50] sm:$0xff] %vm552_vm0, %v2709_v8 }
 0x202   : > { %v2724_v18 = vmax.f32 %v2706_v2, %v833_v12  ;;  %v835_v20 = vpop.xlane.xlu0 %834 }
 0x203   : > { %v2729_v23 = vmax.f32 %v2716_v10, %v835_v20 }
 0x204   : > { %1431 = vst.msk [vmem:[#allocation2 + $0x58] sm:$0xff] %vm552_vm0, %v2724_v18  ;;  %963 = vperm.xlu0 %2153, %v2724_v18  }
 0x205   : > { %v837_v47 = vpop.xlane.xlu1 %836  ;;  %943 = vperm.xlu1 %2154, %v2685_v49   ;;  %1432 = vst.msk [vmem:[#allocation2 + $0x60] sm:$0xff] %vm552_vm0, %v2729_v23  ;;  %v3002_v35 = vsub.f32 %v2716_v10, %v2729_v23 }
 0x206   : > { %v2744_v50 = vmax.f32 %v2726_v21, %v837_v47  ;;  %v839_v51 = vpop.xlane.xlu0 %838 }
 0x207   : > { %v2749_v1 = vmax.f32 %v2736_v45, %v839_v51  ;;  %v898_v49 = vmul.f32 1.442695, %v3002_v35 }
 0x208   : > { %1433 = vst.msk [vmem:[#allocation2 + $0x68] sm:$0xff] %vm552_vm0, %v2744_v50  ;;  %973 = vperm.xlu0 %2153, %v2744_v50   ;;  %v3005_v10 = vsub.f32 %v2726_v21, %v2744_v50 }
 0x209   : > { %938 = vperm.xlu1 %2154, %v2669_v40   ;;  %v841_v20 = vpop.xlane.xlu1 %840  ;;  %1434 = vst.msk [vmem:[#allocation2 + $0x70] sm:$0xff] %vm552_vm0, %v2749_v1 }
 0x20a   : > { %v2762_v51 = vmax.f32 %v2746_v61, %v841_v20 }
 0x20c   : > { %1435 = vst.msk [vmem:[#allocation2 + $0x78] sm:$0xff] %vm552_vm0, %v2762_v51  ;;  %983 = vperm.xlu0 %2153, %v2762_v51  }
 0x20d   : > { %948 = vperm.xlu1 %2154, %v2690_v53  }
 0x211   : > { %958 = vperm.xlu1 %2154, %v2709_v8  }
 0x215   : > { %968 = vperm.xlu1 %2154, %v2729_v23  }
 0x219   : > { %978 = vperm.xlu1 %2154, %v2749_v1  }
 0x26c   : > { %v909_v47 = vpop.permute.xlu0 %908 }
 0x26d   : > { %v986_v20 = vsub.f32 %v2532_v26, %v909_v47 }
 0x26f   : > { %v1002_v24 = vmul.f32 1.442695, %v986_v20 }
 0x270   : > { %v914_v48 = vpop.permute.xlu1 %913 }
 0x271   : > { %2155 = vpow2.f32 %v1002_v24  ;;  %v987_v12 = vsub.f32 %v2530_v25, %v914_v48 }
 0x273   : > { %v1004_v9 = vmul.f32 1.442695, %v987_v12 }
 0x274   : > { %v924_v13 = vpop.permute.xlu1 %923 }
 0x275   : > { %2157 = vpow2.f32 %v1004_v9  ;;  %v989_v54 = vsub.f32 %v2535_v27, %v924_v13 }
 0x277   : > { %v1008_v62 = vmul.f32 1.442695, %v989_v54 }
 0x278   : > { %v919_v43 = vpop.permute.xlu1 %918 }
 0x279   : > { %2159 = vpow2.f32 %v1008_v62  ;;  %v988_v46 = vsub.f32 %v2538_v28, %v919_v43 }
 0x27b   : > { %v2156_v5 = vpop.eup %2155  ;;  %v1006_v19 = vmul.f32 1.442695, %v988_v46 }
 0x27c   : > { %v934_v60 = vpop.permute.xlu1 %933  ;;  %1066 = vadd.xlane.f32.xlu1 %v2156_v5  ;;  %2006 = vmatprep.mubr.f32.mxu1 %v2156_v5 }
 0x27d   : > { %2161 = vpow2.f32 %v1006_v19  ;;  %v991_v26 = vsub.f32 %v2541_v29, %v934_v60 }
 0x27f   : > { %v2158_v24 = vpop.eup %2157  ;;  %v1012_v25 = vmul.f32 1.442695, %v991_v26  ;;  %v954_v48 = vpop.permute.xlu0 %953 }
 0x280   : > { %v929_v12 = vpop.permute.xlu1 %928  ;;  %1068 = vadd.xlane.f32.xlu0 %v2158_v24  ;;  %2007 = vmatmul.mubr.f32.vlgmr.msra.gmra.mrb[0].mxu1 %v2158_v24  ;;  %v995_v19 = vsub.f32 %v2553_v33, %v954_v48 }
 0x281   : > { %2163 = vpow2.f32 %v1012_v25  ;;  %v990_v27 = vsub.f32 %v2544_v30, %v929_v12 }
 0x282   : > { %v1020_v30 = vmul.f32 1.442695, %v995_v19 }
 0x283   : > { %v2160_v54 = vpop.eup %2159  ;;  %v1010_v62 = vmul.f32 1.442695, %v990_v27  ;;  %v964_v28 = vpop.permute.xlu0 %963 }
 0x284   : > { %v944_v43 = vpop.permute.xlu1 %943  ;;  %1072 = vadd.xlane.f32.xlu1 %v2160_v54  ;;  %v997_v47 = vsub.f32 %v2559_v36, %v964_v28 }
 0x285   : > { %2165 = vpow2.f32 %v1010_v62  ;;  %v993_v5 = vsub.f32 %v2547_v31, %v944_v43 }
 0x286   : > { %v1024_v33 = vmul.f32 1.442695, %v997_v47 }
 0x287   : > { %v2162_v29 = vpop.eup %2161  ;;  %v1016_v60 = vmul.f32 1.442695, %v993_v5  ;;  %v974_v9 = vpop.permute.xlu0 %973 }
 0x288   : > { %v939_v46 = vpop.permute.xlu1 %938  ;;  %1070 = vadd.xlane.f32.xlu0 %v2162_v29  ;;  %2009 = vmatprep.mubr.f32.mxu1 %v2162_v29  ;;  %v999_v25 = vsub.f32 %v2565_v38, %v974_v9 }
 0x289   : > { %2167 = vpow2.f32 %v1016_v60  ;;  %v992_v13 = vsub.f32 %v2550_v32, %v939_v46  ;;  %2010 = vmatmul.mubr.f32.gmra.mrb[2].mxu1 %v2160_v54 }
 0x28a   : > { %v1028_v36 = vmul.f32 1.442695, %v999_v25  ;;  %v2994_v25 = vsub.f32 %v2633_v6, %v2648_v15  ;;  %v2998_v6 = vsub.f32 %v2675_v44, %v2690_v53  ;;  %v3001_v44 = vsub.f32 %v2687_v52, %v2704_v63 }
 0x28b   : > { %v2164_v20 = vpop.eup %2163  ;;  %v1014_v26 = vmul.f32 1.442695, %v992_v13  ;;  %v984_v12 = vpop.permute.xlu0 %983  ;;  %v3004_v52 = vsub.f32 %v2736_v45, %v2749_v1  ;;  %v3006_v45 = vsub.f32 %v2746_v61, %v2762_v51  ;;  %v1034_v51 = vld [vmem:[#allocation3] sm:$0xff] }
 0x28c   : > { %v949_v24 = vpop.permute.xlu1 %948  ;;  %1076 = vadd.xlane.f32.xlu1 %v2164_v20  ;;  %v1001_v54 = vsub.f32 %v2587_v41, %v984_v12  ;;  %v890_v15 = vmul.f32 1.442695, %v2998_v6  ;;  %v892_v53 = vmul.f32 1.442695, %v3001_v44  ;;  %v1042_v44 = vld [vmem:[#allocation3 + $0x40] sm:$0xff] }
 0x28d   : > { %2169 = vpow2.f32 %v1014_v26  ;;  %v994_v31 = vsub.f32 %v2556_v34, %v949_v24  ;;  %v876_v26 = vmul.f32 1.442695, %v859_v7  ;;  %v878_v24 = vmul.f32 1.442695, %v860_v16 }
 0x28e   : > { %2171 = vpow2.f32 %v1020_v30  ;;  %v1032_v5 = vmul.f32 1.442695, %v1001_v54  ;;  %v2996_v7 = vsub.f32 %v2654_v17, %v2669_v40  ;;  %v902_v63 = vmul.f32 1.442695, %v3004_v52 }
 0x28f   : > { %v2166_v48 = vpop.eup %2165  ;;  %v1018_v27 = vmul.f32 1.442695, %v994_v31  ;;  %v2993_v31 = vsub.f32 %v2605_v55, %v2608_v57  ;;  %v2997_v55 = vsub.f32 %v2645_v14, %v2664_v22  ;;  %v3000_v14 = vsub.f32 %v2696_v56, %v2709_v8 }
 0x290   : > { %v959_v62 = vpop.permute.xlu1 %958  ;;  %1074 = vadd.xlane.f32.xlu0 %v2166_v48  ;;  %2012 = vmatprep.mubr.f32.mxu1 %v2166_v48  ;;  %v882_v48 = vmul.f32 1.442695, %v2994_v25  ;;  %v886_v4 = vmul.f32 1.442695, %v2996_v7  ;;  %v3003_v56 = vsub.f32 %v2706_v2, %v2724_v18  ;;  %v900_v2 = vmul.f32 1.442695, %v3005_v10 }
 0x291   : > { %2173 = vpow2.f32 %v1018_v27  ;;  %v996_v32 = vsub.f32 %v2562_v37, %v959_v62  ;;  %2013 = vmatmul.mubr.f32.gmra.mrb[4].mxu1 %v2164_v20  ;;  %v884_v57 = vmul.f32 1.442695, %v2997_v55  ;;  %v894_v17 = vmul.f32 1.442695, %v3000_v14  ;;  %v1041_v7 = vld [vmem:[#allocation3 + $0x38] sm:$0xff] }
 0x292   : > { %2175 = vpow2.f32 %v1024_v33  ;;  %v874_v33 = vmul.f32 1.442695, %v2993_v31  ;;  %v896_v8 = vmul.f32 1.442695, %v3003_v56  ;;  %v904_v1 = vmul.f32 1.442695, %v3006_v45 }
 0x293   : > { %v2168_v28 = vpop.eup %2167  ;;  %v1022_v34 = vmul.f32 1.442695, %v996_v32  ;;  %v1047_v45 = vld [vmem:[#allocation3 + $0x68] sm:$0xff] }
 0x294   : > { %v969_v43 = vpop.permute.xlu1 %968  ;;  %1080 = vadd.xlane.f32.xlu1 %v2168_v28 }
 0x295   : > { %2177 = vpow2.f32 %v1022_v34  ;;  %v998_v38 = vsub.f32 %v2568_v39, %v969_v43 }
 0x296   : > { %2179 = vpow2.f32 %v1028_v36 }
 0x297   : > { %v2170_v19 = vpop.eup %2169  ;;  %v1026_v29 = vmul.f32 1.442695, %v998_v38  ;;  %v1035_v38 = vld [vmem:[#allocation3 + $0x8] sm:$0xff] }
 0x298   : > { %v2172_v60 = vpop.eup %2171  ;;  %1078 = vadd.xlane.f32.xlu0 %v2170_v19  ;;  %v979_v46 = vpop.permute.xlu1 %978  ;;  %2015 = vmatprep.mubr.f32.mxu1 %v2170_v19 }
 0x299   : > { %2181 = vpow2.f32 %v1026_v29  ;;  %v1000_v37 = vsub.f32 %v2590_v42, %v979_v46  ;;  %1084 = vadd.xlane.f32.xlu1 %v2172_v60  ;;  %2016 = vmatmul.mubr.f32.gmra.mrb[6].mxu1 %v2168_v28 }
 0x29a   : > { %2183 = vpow2.f32 %v1032_v5 }
 0x29b   : > { %v2174_v41 = vpop.eup %2173  ;;  %v1030_v9 = vmul.f32 1.442695, %v1000_v37 }
 0x29c   : > { %v2176_v13 = vpop.eup %2175  ;;  %1082 = vadd.xlane.f32.xlu0 %v2174_v41  ;;  %2018 = vmatprep.mubr.f32.mxu1 %v2174_v41 }
 0x29d   : > { %2185 = vpow2.f32 %v1030_v9  ;;  %1088 = vadd.xlane.f32.xlu1 %v2176_v13  ;;  %2019 = vmatmul.mubr.f32.gmra.mrb[8].mxu1 %v2172_v60  ;;  %v1037_v60 = vld [vmem:[#allocation3 + $0x18] sm:$0xff]  ;;  %v1036_v9 = vld [vmem:[#allocation3 + $0x10] sm:$0xff] }
 0x29e   : > { %2187 = vpow2.f32 %v876_v26 }
 0x29f   : > { %v2178_v39 = vpop.eup %2177  ;;  %2189 = vpow2.f32 %v878_v24 }
 0x2a0   : > { %v2180_v30 = vpop.eup %2179  ;;  %1086 = vadd.xlane.f32.xlu0 %v2178_v39  ;;  %2021 = vmatprep.mubr.f32.mxu1 %v2178_v39  ;;  %2191 = vpow2.f32 %v874_v33  ;;  %v1038_v33 = vld [vmem:[#allocation3 + $0x20] sm:$0xff] }
 0x2a1   : > { %1092 = vadd.xlane.f32.xlu1 %v2180_v30  ;;  %2022 = vmatmul.mubr.f32.gmra.mrb[10].mxu1 %v2176_v13  ;;  %2193 = vpow2.f32 %v882_v48 }
 0x2a2   : > { %2195 = vpow2.f32 %v880_v3 }
 0x2a3   : > { %v2182_v47 = vpop.eup %2181  ;;  %2197 = vpow2.f32 %v886_v4 }
 0x2a4   : > { %v2184_v20 = vpop.eup %2183  ;;  %1090 = vadd.xlane.f32.xlu0 %v2182_v47  ;;  %2024 = vmatprep.mubr.f32.mxu1 %v2182_v47  ;;  %2199 = vpow2.f32 %v884_v57 }
 0x2a5   : > { %1096 = vadd.xlane.f32.xlu1 %v2184_v20  ;;  %2025 = vmatmul.mubr.f32.gmra.mrb[12].mxu1 %v2180_v30  ;;  %2201 = vpow2.f32 %v890_v15  ;;  %v1040_v15 = vld [vmem:[#allocation3 + $0x30] sm:$0xff] }
 0x2a6   : > { %2203 = vpow2.f32 %v888_v0  ;;  %v1043_v0 = vld [vmem:[#allocation3 + $0x48] sm:$0xff] }
 0x2a7   : > { %v2186_v42 = vpop.eup %2185  ;;  %2205 = vpow2.f32 %v894_v17 }
 0x2a8   : > { %1094 = vadd.xlane.f32.xlu0 %v2186_v42  ;;  %2027 = vmatprep.mubr.f32.mxu1 %v2186_v42  ;;  %v2188_v11 = vpop.eup %2187  ;;  %2207 = vpow2.f32 %v892_v53 }
 0x2a9   : > { %2028 = vmatmul.mubr.f32.gmra.mrb[14].mxu1 %v2184_v20  ;;  %v2813_v16 = vpop.eup %2189  ;;  %2209 = vpow2.f32 %v898_v49  ;;  %v1051_v19 = vmul.f32 %v2188_v11, %v1035_v38  ;;  %v1039_v20 = vld [vmem:[#allocation3 + $0x28] sm:$0xff] }
 0x2aa   : > { %v2192_v22 = vpop.eup %2191  ;;  %2211 = vpow2.f32 %v896_v8  ;;  %v1052_v30 = vmul.f32 %v2813_v16, %v1036_v9 }
 0x2ab   : > { %v2822_v40 = vpop.eup %2193  ;;  %2213 = vpow2.f32 %v902_v63  ;;  %v1050_v34 = vmul.f32 %v2192_v22, %v1034_v51 }
 0x2ac   : > { %v2196_v12 = vpop.eup %2195  ;;  %2215 = vpow2.f32 %v900_v2  ;;  %v1054_v59 = vmul.f32 %v2822_v40, %v1038_v33 }
 0x2ad   : > { %v2831_v27 = vpop.eup %2197  ;;  %2217 = vpow2.f32 %v904_v1  ;;  %v1053_v37 = vmul.f32 %v2196_v12, %v1037_v60 }
 0x2ae   : > { %v2200_v62 = vpop.eup %2199  ;;  %v1056_v17 = vmul.f32 %v2831_v27, %v1040_v15 }
 0x2af   : > { %v2840_v32 = vpop.eup %2201  ;;  %v1055_v24 = vmul.f32 %v2200_v62, %v1039_v20 }
 0x2b0   : > { %v2204_v18 = vpop.eup %2203  ;;  %v1058_v52 = vmul.f32 %v2840_v32, %v1042_v44 }
 0x2b1   : > { %v2846_v23 = vpop.eup %2205  ;;  %v1057_v57 = vmul.f32 %v2204_v18, %v1041_v7 }
 0x2b2   : > { %v2852_v36 = vpop.eup %2207 }
 0x2b3   : > { %v2854_v54 = vpop.eup %2209 }
 0x2b4   : > { %v2858_v21 = vpop.eup %2211 }
 0x2b5   : > { %v2860_v50 = vpop.eup %2213 }
 0x2b6   : > { %1154 = vperm.xlu1 %2154, %v2188_v11   ;;  %v2864_v28 = vpop.eup %2215 }
 0x2b7   : > { %v2867_v61 = vpop.eup %2217 }
 0x2ba   : > { %1159 = vperm.xlu1 %2154, %v2813_v16  }
 0x2be   : > { %1169 = vperm.xlu1 %2154, %v2822_v40   ;;  %1149 = vperm.xlu0 %2153, %v2192_v22   ;;  %v1059_v22 = vmul.f32 %v2852_v36, %v1043_v0 }
 0x2c2   : > { %1179 = vperm.xlu1 %2154, %v2831_v27   ;;  %1164 = vperm.xlu0 %2153, %v2196_v12   ;;  %v1045_v12 = vld [vmem:[#allocation3 + $0x58] sm:$0xff] }
 0x2c3   : > { %v1061_v27 = vmul.f32 %v2858_v21, %v1045_v12 }
 0x2c6   : > { %1189 = vperm.xlu1 %2154, %v2840_v32   ;;  %1174 = vperm.xlu0 %2153, %v2200_v62   ;;  %v1044_v62 = vld [vmem:[#allocation3 + $0x50] sm:$0xff]  ;;  %v1063_v32 = vmul.f32 %v2864_v28, %v1047_v45 }
 0x2c7   : > { %v1060_v51 = vmul.f32 %v2846_v23, %v1044_v62 }
 0x2ca   : > { %1199 = vperm.xlu1 %2154, %v2846_v23   ;;  %1184 = vperm.xlu0 %2153, %v2204_v18  }
 0x2ce   : > { %1209 = vperm.xlu1 %2154, %v2854_v54   ;;  %1194 = vperm.xlu0 %2153, %v2852_v36  }
 0x2d2   : > { %1219 = vperm.xlu1 %2154, %v2860_v50   ;;  %1204 = vperm.xlu0 %2153, %v2858_v21   ;;  %v1046_v21 = vld [vmem:[#allocation3 + $0x60] sm:$0xff] }
 0x2d6   : > { %1214 = vperm.xlu0 %2153, %v2864_v28  }
 0x2da   : > { %1224 = vperm.xlu0 %2153, %v2867_v61  }
 0x309   : > { %v1067_v43 = vpop.xlane.xlu1 %1066 }
 0x30a   : > { %v1098_v5 = vadd.f32 %v1067_v43, %v1050_v34 }
 0x30c   : > { %1115 = vst.msk [vmem:[#allocation3] sm:$0xff] %vm552_vm0, %v1098_v5 }
 0x30d   : > { %v1069_v29 = vpop.xlane.xlu0 %1068 }
 0x30e   : > { %v1099_v46 = vadd.f32 %v1069_v29, %v1051_v19  ;;  %v1049_v19 = vld [vmem:[#allocation3 + $0x78] sm:$0xff] }
 0x30f   : > { %v1065_v23 = vmul.f32 %v2867_v61, %v1049_v19 }
 0x310   : > { %1116 = vst.msk [vmem:[#allocation3 + $0x8] sm:$0xff] %vm552_vm0, %v1099_v46  ;;  %v1062_v46 = vmul.f32 %v2854_v54, %v1046_v21 }
 0x311   : > { %v1073_v41 = vpop.xlane.xlu1 %1072 }
 0x312   : > { %v1101_v13 = vadd.f32 %v1073_v41, %v1053_v37  ;;  %v1048_v41 = vld [vmem:[#allocation3 + $0x70] sm:$0xff] }
 0x313   : > { %v1439_v39 = vld [vmem:[#allocation3] sm:$0xff]  ;;  %v1064_v20 = vmul.f32 %v2860_v50, %v1048_v41 }
 0x314   : > { %1118 = vst.msk [vmem:[#allocation3 + $0x18] sm:$0xff] %vm552_vm0, %v1101_v13  ;;  %2219 = vrcp.f32 %v1439_v39 }
 0x315   : > { %v1071_v47 = vpop.xlane.xlu0 %1070 }
 0x316   : > { %v1100_v42 = vadd.f32 %v1071_v47, %v1052_v30 }
 0x317   : > { %v1440_v26 = vld [vmem:[#allocation3 + $0x8] sm:$0xff] }
 0x318   : > { %1117 = vst.msk [vmem:[#allocation3 + $0x10] sm:$0xff] %vm552_vm0, %v1100_v42  ;;  %2221 = vrcp.f32 %v1440_v26 }
 0x319   : > { %v1077_v31 = vpop.xlane.xlu1 %1076 }
 0x31a   : > { %v1103_v25 = vadd.f32 %v1077_v31, %v1055_v24 }
 0x31b   : > { %v1442_v48 = vld [vmem:[#allocation3 + $0x18] sm:$0xff] }
 0x31c   : > { %1120 = vst.msk [vmem:[#allocation3 + $0x28] sm:$0xff] %vm552_vm0, %v1103_v25  ;;  %2223 = vrcp.f32 %v1442_v48 }
 0x31d   : > { %v1075_v3 = vpop.xlane.xlu0 %1074 }
 0x31e   : > { %v2220_v4 = vpop.eup %2219  ;;  %v1102_v11 = vadd.f32 %v1075_v3, %v1054_v59 }
 0x31f   : > { %1489 = vperm.xlu1 %2154, %v2220_v4   ;;  %v1441_v55 = vld [vmem:[#allocation3 + $0x10] sm:$0xff] }
 0x320   : > { %1119 = vst.msk [vmem:[#allocation3 + $0x20] sm:$0xff] %vm552_vm0, %v1102_v11  ;;  %2225 = vrcp.f32 %v1441_v55 }
 0x321   : > { %v1081_v6 = vpop.xlane.xlu1 %1080 }
 0x322   : > { %v2222_v16 = vpop.eup %2221  ;;  %v1105_v58 = vadd.f32 %v1081_v6, %v1057_v57 }
 0x323   : > { %1494 = vperm.xlu0 %2153, %v2222_v16   ;;  %v1444_v14 = vld [vmem:[#allocation3 + $0x28] sm:$0xff] }
 0x324   : > { %1122 = vst.msk [vmem:[#allocation3 + $0x38] sm:$0xff] %vm552_vm0, %v1105_v58  ;;  %2227 = vrcp.f32 %v1444_v14 }
 0x325   : > { %v1079_v40 = vpop.xlane.xlu0 %1078 }
 0x326   : > { %v2224_v53 = vpop.eup %2223  ;;  %v1085_v35 = vpop.xlane.xlu1 %1084  ;;  %v1104_v49 = vadd.f32 %v1079_v40, %v1056_v17 }
 0x327   : > { %v1107_v56 = vadd.f32 %v1085_v35, %v1059_v22  ;;  %1504 = vperm.xlu0 %2153, %v2224_v53   ;;  %v1443_v8 = vld [vmem:[#allocation3 + $0x20] sm:$0xff] }
 0x328   : > { %1121 = vst.msk [vmem:[#allocation3 + $0x30] sm:$0xff] %vm552_vm0, %v1104_v49  ;;  %2229 = vrcp.f32 %v1443_v8 }
 0x329   : > { %1124 = vst.msk [vmem:[#allocation3 + $0x48] sm:$0xff] %vm552_vm0, %v1107_v56  ;;  %v1083_v63 = vpop.xlane.xlu0 %1082 }
 0x32a   : > { %v2226_v10 = vpop.eup %2225  ;;  %v1089_v2 = vpop.xlane.xlu1 %1088  ;;  %v1106_v18 = vadd.f32 %v1083_v63, %v1058_v52 }
 0x32b   : > { %v1109_v1 = vadd.f32 %v1089_v2, %v1061_v27  ;;  %1499 = vperm.xlu1 %2154, %v2226_v10   ;;  %v1446_v36 = vld [vmem:[#allocation3 + $0x38] sm:$0xff] }
 0x32c   : > { %1123 = vst.msk [vmem:[#allocation3 + $0x40] sm:$0xff] %vm552_vm0, %v1106_v18  ;;  %2231 = vrcp.f32 %v1446_v36 }
 0x32d   : > { %1126 = vst.msk [vmem:[#allocation3 + $0x58] sm:$0xff] %vm552_vm0, %v1109_v1  ;;  %v1087_v34 = vpop.xlane.xlu0 %1086 }
 0x32e   : > { %v2228_v43 = vpop.eup %2227  ;;  %v1093_v38 = vpop.xlane.xlu1 %1092  ;;  %v1108_v5 = vadd.f32 %v1087_v34, %v1060_v51 }
 0x32f   : > { %v1111_v29 = vadd.f32 %v1093_v38, %v1063_v32  ;;  %1514 = vperm.xlu0 %2153, %v2228_v43   ;;  %v1445_v60 = vld [vmem:[#allocation3 + $0x30] sm:$0xff] }
 0x330   : > { %1125 = vst.msk [vmem:[#allocation3 + $0x50] sm:$0xff] %vm552_vm0, %v1108_v5  ;;  %v1448_v37 = vld [vmem:[#allocation3 + $0x48] sm:$0xff]  ;;  %2233 = vrcp.f32 %v1445_v60 }
 0x331   : > { %1128 = vst.msk [vmem:[#allocation3 + $0x68] sm:$0xff] %vm552_vm0, %v1111_v29  ;;  %v1091_v28 = vpop.xlane.xlu0 %1090  ;;  %2235 = vrcp.f32 %v1448_v37 }
 0x332   : > { %v2230_v9 = vpop.eup %2229  ;;  %v1097_v13 = vpop.xlane.xlu1 %1096  ;;  %v1110_v39 = vadd.f32 %v1091_v28, %v1062_v46 }
 0x333   : > { %v1113_v30 = vadd.f32 %v1097_v13, %v1065_v23  ;;  %1509 = vperm.xlu1 %2154, %v2230_v9   ;;  %v1447_v47 = vld [vmem:[#allocation3 + $0x40] sm:$0xff] }
 0x334   : > { %1127 = vst.msk [vmem:[#allocation3 + $0x60] sm:$0xff] %vm552_vm0, %v1110_v39  ;;  %v1450_v54 = vld [vmem:[#allocation3 + $0x58] sm:$0xff]  ;;  %2237 = vrcp.f32 %v1447_v47 }
 0x335   : > { %1130 = vst.msk [vmem:[#allocation3 + $0x78] sm:$0xff] %vm552_vm0, %v1113_v30  ;;  %v1095_v42 = vpop.xlane.xlu0 %1094  ;;  %2239 = vrcp.f32 %v1450_v54 }
 0x336   : > { %v2232_v61 = vpop.eup %2231  ;;  %v1112_v26 = vadd.f32 %v1095_v42, %v1064_v20  ;;  %v1155_v44 = vpop.permute.xlu1 %1154 }
 0x337   : > { %1524 = vperm.xlu0 %2153, %v2232_v61   ;;  %v1449_v24 = vld [vmem:[#allocation3 + $0x50] sm:$0xff]  ;;  %v1228_v46 = vmul.f32 0.0, %v1155_v44 }
 0x338   : > { %1129 = vst.msk [vmem:[#allocation3 + $0x70] sm:$0xff] %vm552_vm0, %v1112_v26  ;;  %v1452_v31 = vld [vmem:[#allocation3 + $0x68] sm:$0xff]  ;;  %2241 = vrcp.f32 %v1449_v24 }
 0x339   : > { %2243 = vrcp.f32 %v1452_v31 }
 0x33a   : > { %v2234_v33 = vpop.eup %2233  ;;  %v1160_v8 = vpop.permute.xlu1 %1159 }
 0x33b   : > { %v2236_v25 = vpop.eup %2235  ;;  %1519 = vperm.xlu1 %2154, %v2234_v33   ;;  %v1451_v48 = vld [vmem:[#allocation3 + $0x60] sm:$0xff]  ;;  %v1229_v30 = vmul.f32 0.0, %v1160_v8 }
 0x33c   : > { %1534 = vperm.xlu0 %2153, %v2236_v25   ;;  %v1454_v50 = vld [vmem:[#allocation3 + $0x78] sm:$0xff]  ;;  %2245 = vrcp.f32 %v1451_v48 }
 0x33d   : > { %2247 = vrcp.f32 %v1454_v50  ;;  %v1150_v49 = vpop.permute.xlu0 %1149 }
 0x33e   : > { %v2238_v59 = vpop.eup %2237  ;;  %v1170_v62 = vpop.permute.xlu1 %1169  ;;  %v1227_v5 = vmul.f32 0.0, %v1150_v49 }
 0x33f   : > { %v2240_v3 = vpop.eup %2239  ;;  %1529 = vperm.xlu1 %2154, %v2238_v59   ;;  %v1453_v7 = vld [vmem:[#allocation3 + $0x70] sm:$0xff]  ;;  %v1231_v31 = vmul.f32 0.0, %v1170_v62 }
 0x340   : > { %1544 = vperm.xlu0 %2153, %v2240_v3   ;;  %2249 = vrcp.f32 %v1453_v7 }
 0x341   : > { %v1165_v63 = vpop.permute.xlu0 %1164 }
 0x342   : > { %v2242_v4 = vpop.eup %2241  ;;  %v1180_v45 = vpop.permute.xlu1 %1179  ;;  %v1230_v41 = vmul.f32 0.0, %v1165_v63 }
 0x343   : > { %v2244_v11 = vpop.eup %2243  ;;  %1539 = vperm.xlu1 %2154, %v2242_v4   ;;  %v1233_v4 = vmul.f32 0.0, %v1180_v45 }
 0x344   : > { %1554 = vperm.xlu0 %2153, %v2244_v11  }
 0x345   : > { %v1175_v18 = vpop.permute.xlu0 %1174 }
 0x346   : > { %v2246_v55 = vpop.eup %2245  ;;  %v1190_v36 = vpop.permute.xlu1 %1189  ;;  %v1232_v42 = vmul.f32 0.0, %v1175_v18 }
 0x347   : > { %v2248_v57 = vpop.eup %2247  ;;  %1549 = vperm.xlu1 %2154, %v2246_v55  }
 0x348   : > { %1564 = vperm.xlu0 %2153, %v2248_v57  }
 0x349   : > { %v1185_v1 = vpop.permute.xlu0 %1184 }
 0x34a   : > { %v2250_v6 = vpop.eup %2249  ;;  %v1200_v32 = vpop.permute.xlu1 %1199  ;;  %v1234_v50 = vmul.f32 0.0, %v1185_v1 }
 0x34b   : > { %1559 = vperm.xlu1 %2154, %v2250_v6   ;;  %v1237_v8 = vmul.f32 0.0, %v1200_v32 }
 0x34d   : > { %v1195_v51 = vpop.permute.xlu0 %1194 }
 0x34e   : > { %v2911_v21 = vpop.permute.xlu1 %1209  ;;  %v1236_v55 = vmul.f32 0.0, %v1195_v51 }
 0x351   : > { %v1205_v34 = vpop.permute.xlu0 %1204 }
 0x352   : > { %v2913_v38 = vpop.permute.xlu1 %1219 }
 0x353   : > { %v2008_v15 = vpop.f32.mrb[0].mxu1 }
 0x354   : > { %v1309_v16 = vpop.f32.mrb[1].mxu1  ;;  %v1389_v23 = vadd.f32 %v2008_v15, %v1228_v46 }
 0x355   : > { %v1215_v43 = vpop.permute.xlu0 %1214  ;;  %v1388_v19 = vadd.f32 %v1309_v16, %v1227_v5  ;;  %v1235_v16 = vmul.f32 0.0, %v1190_v36 }
 0x359   : > { %v1225_v29 = vpop.permute.xlu0 %1224 }
 0x35a   : > { %v1242_v51 = vmul.f32 0.0, %v1225_v29 }
 0x35c   : > { %v2011_v58 = vpop.f32.mrb[2].mxu1 }
 0x35d   : > { %v1319_v0 = vpop.f32.mrb[3].mxu1  ;;  %v1391_v13 = vadd.f32 %v2011_v58, %v1230_v41 }
 0x35e   : > { %v1390_v20 = vadd.f32 %v1319_v0, %v1229_v30 }
 0x364   : > { %v2014_v14 = vpop.f32.mrb[4].mxu1 }
 0x365   : > { %v1329_v17 = vpop.f32.mrb[5].mxu1  ;;  %v1393_v26 = vadd.f32 %v2014_v14, %v1232_v42  ;;  %v1238_v14 = vmul.f32 0.0, %v1205_v34 }
 0x366   : > { %v1392_v25 = vadd.f32 %v1329_v17, %v1231_v31 }
 0x36c   : > { %v2017_v22 = vpop.f32.mrb[6].mxu1 }
 0x36d   : > { %v1339_v40 = vpop.f32.mrb[7].mxu1  ;;  %v1395_v3 = vadd.f32 %v2017_v22, %v1234_v50 }
 0x36e   : > { %v1394_v57 = vadd.f32 %v1339_v40, %v1233_v4 }
 0x370   : > { %v2020_v53 = vpop.f32.mrb[8].mxu1 }
 0x371   : > { %v2897_v35 = vpop.f32.mrb[9].mxu1  ;;  %v1397_v6 = vadd.f32 %v2020_v53, %v1236_v55  ;;  %v1240_v53 = vmul.f32 0.0, %v1215_v43 }
 0x372   : > { %v1396_v22 = vadd.f32 %v2897_v35, %v1235_v16  ;;  %v1239_v35 = vmul.f32 0.0, %v2911_v21 }
 0x374   : > { %v2899_v12 = vpop.f32.mrb[10].mxu1 }
 0x375   : > { %v2901_v56 = vpop.f32.mrb[11].mxu1  ;;  %v1399_v44 = vadd.f32 %v2899_v12, %v1238_v14 }
 0x376   : > { %v1398_v18 = vadd.f32 %v2901_v56, %v1237_v8 }
 0x378   : > { %v2903_v52 = vpop.f32.mrb[12].mxu1 }
 0x379   : > { %v2905_v27 = vpop.f32.mrb[13].mxu1  ;;  %v1401_v45 = vadd.f32 %v2903_v52, %v1240_v53  ;;  %v1241_v52 = vmul.f32 0.0, %v2913_v38 }
 0x37a   : > { %v1400_v34 = vadd.f32 %v2905_v27, %v1239_v35 }
 0x37c   : > { %v2907_v10 = vpop.f32.mrb[14].mxu1 }
 0x37d   : > { %v2909_v2 = vpop.f32.mrb[15].mxu1  ;;  %v1403_v43 = vadd.f32 %v2907_v10, %v1242_v51 }
 0x37e   : > { %v1402_v21 = vadd.f32 %v2909_v2, %v1241_v52 }
 0x39e   : > { %v1490_v60 = vpop.permute.xlu1 %1489 }
 0x39f   : > { %v1567_v37 = vmul.f32 %v1490_v60, %v1388_v19 }
 0x3a1   : > { %1583 = vst [vmem:[%s2916_s29] sm:$0xff] %v1567_v37 }
 0x3a2   : > { %v1495_v28 = vpop.permute.xlu0 %1494 }
 0x3a3   : > { %v1568_v9 = vmul.f32 %v1495_v28, %v1389_v23 }
 0x3a5   : > { %1584 = vst [vmem:[%s2916_s29 + $0x8] sm:$0xff] %v1568_v9 }
 0x3a6   : > { %v1505_v39 = vpop.permute.xlu0 %1504 }
 0x3a7   : > { %v1570_v47 = vmul.f32 %v1505_v39, %v1391_v13 }
 0x3a8   : > { %v1670_v27 = vld [vmem:[%s2916_s29] sm:$0xff] (%p2382_p6) }
 0x3a9   : > { %1586 = vst [vmem:[%s2916_s29 + $0x18] sm:$0xff] %v1570_v47  ;;  %1671 = vst [vmem:[%s1612_s7] sm:$0xff] (%p2382_p6), %v1670_v27 }
 0x3aa   : > { %v1500_v54 = vpop.permute.xlu1 %1499 }
 0x3ab   : > { %v1569_v61 = vmul.f32 %v1500_v54, %v1390_v20 }
 0x3ac   : > { %v1672_v10 = vld [vmem:[%s2916_s29 + $0x8] sm:$0xff] (%p2382_p6) }
 0x3ad   : > { %1585 = vst [vmem:[%s2916_s29 + $0x10] sm:$0xff] %v1569_v61  ;;  %1673 = vst [vmem:[%s1612_s7 + $0x10] sm:$0xff] (%p2382_p6), %v1672_v10 }
 0x3ae   : > { %v1515_v24 = vpop.permute.xlu0 %1514 }
 0x3af   : > { %v1572_v33 = vmul.f32 %v1515_v24, %v1393_v26 }
 0x3b0   : > { %v1676_v38 = vld [vmem:[%s2916_s29 + $0x18] sm:$0xff] (%p2382_p6) }
 0x3b1   : > { %1588 = vst [vmem:[%s2916_s29 + $0x28] sm:$0xff] %v1572_v33  ;;  %1677 = vst [vmem:[%s1612_s7 + $0x30] sm:$0xff] (%p2382_p6), %v1676_v38 }
 0x3b2   : > { %v1510_v48 = vpop.permute.xlu1 %1509 }
 0x3b3   : > { %v1571_v59 = vmul.f32 %v1510_v48, %v1392_v25 }
 0x3b4   : > { %v1674_v2 = vld [vmem:[%s2916_s29 + $0x10] sm:$0xff] (%p2382_p6) }
 0x3b5   : > { %1587 = vst [vmem:[%s2916_s29 + $0x20] sm:$0xff] %v1571_v59  ;;  %1675 = vst [vmem:[%s1612_s7 + $0x20] sm:$0xff] (%p2382_p6), %v1674_v2 }
 0x3b6   : > { %v1525_v7 = vpop.permute.xlu0 %1524 }
 0x3b7   : > { %v1574_v11 = vmul.f32 %v1525_v7, %v1395_v3 }
 0x3b8   : > { %v1680_v23 = vld [vmem:[%s2916_s29 + $0x28] sm:$0xff] (%p2382_p6) }
 0x3b9   : > { %1590 = vst [vmem:[%s2916_s29 + $0x38] sm:$0xff] %v1574_v11  ;;  %1681 = vst [vmem:[%s1612_s7 + $0x50] sm:$0xff] (%p2382_p6), %v1680_v23 }
 0x3ba   : > { %v1520_v15 = vpop.permute.xlu1 %1519 }
 0x3bb   : > { %v1573_v58 = vmul.f32 %v1520_v15, %v1394_v57  ;;  %v1535_v0 = vpop.permute.xlu0 %1534 }
 0x3bc   : > { %v1576_v17 = vmul.f32 %v1535_v0, %v1397_v6  ;;  %v1678_v37 = vld [vmem:[%s2916_s29 + $0x20] sm:$0xff] (%p2382_p6) }
 0x3bd   : > { %1589 = vst [vmem:[%s2916_s29 + $0x30] sm:$0xff] %v1573_v58  ;;  %1679 = vst [vmem:[%s1612_s7 + $0x40] sm:$0xff] (%p2382_p6), %v1678_v37 }
 0x3be   : > { %1592 = vst [vmem:[%s2916_s29 + $0x48] sm:$0xff] %v1576_v17  ;;  %v1530_v49 = vpop.permute.xlu1 %1529 }
 0x3bf   : > { %v1575_v40 = vmul.f32 %v1530_v49, %v1396_v22  ;;  %v1545_v63 = vpop.permute.xlu0 %1544 }
 0x3c0   : > { %v1578_v62 = vmul.f32 %v1545_v63, %v1399_v44  ;;  %v1684_v41 = vld [vmem:[%s2916_s29 + $0x38] sm:$0xff] (%p2382_p6) }
 0x3c1   : > { %1591 = vst [vmem:[%s2916_s29 + $0x40] sm:$0xff] %v1575_v40  ;;  %1685 = vst [vmem:[%s1612_s7 + $0x70] sm:$0xff] (%p2382_p6), %v1684_v41 }
 0x3c2   : > { %1594 = vst [vmem:[%s2916_s29 + $0x58] sm:$0xff] %v1578_v62  ;;  %v1540_v1 = vpop.permute.xlu1 %1539 }
 0x3c3   : > { %v1577_v12 = vmul.f32 %v1540_v1, %v1398_v18  ;;  %v1555_v36 = vpop.permute.xlu0 %1554 }
 0x3c4   : > { %v1580_v32 = vmul.f32 %v1555_v36, %v1401_v45  ;;  %v1682_v28 = vld [vmem:[%s2916_s29 + $0x30] sm:$0xff] (%p2382_p6) }
 0x3c5   : > { %1593 = vst [vmem:[%s2916_s29 + $0x50] sm:$0xff] %v1577_v12  ;;  %v1688_v13 = vld [vmem:[%s2916_s29 + $0x48] sm:$0xff] (%p2382_p6)  ;;  %1683 = vst [vmem:[%s1612_s7 + $0x60] sm:$0xff] (%p2382_p6), %v1682_v28 }
 0x3c6   : > { %1596 = vst [vmem:[%s2916_s29 + $0x68] sm:$0xff] %v1580_v32  ;;  %v1550_v56 = vpop.permute.xlu1 %1549  ;;  %1689 = vst [vmem:[%s1612_s7 + $0x90] sm:$0xff] (%p2382_p6), %v1688_v13 }
 0x3c7   : > { %v1579_v5 = vmul.f32 %v1550_v56, %v1400_v34  ;;  %v1565_v19 = vpop.permute.xlu0 %1564  ;;  %1605 = sbr.rel (!%p2382_p6) target bundleno = 982 (0x3d6), region = 158 }
 0x3c8   : > { %v1582_v60 = vmul.f32 %v1565_v19, %v1403_v43  ;;  %v1686_v9 = vld [vmem:[%s2916_s29 + $0x40] sm:$0xff] (%p2382_p6) }
 0x3c9   : > { %1595 = vst [vmem:[%s2916_s29 + $0x60] sm:$0xff] %v1579_v5  ;;  %v1692_v30 = vld [vmem:[%s2916_s29 + $0x58] sm:$0xff] (%p2382_p6)  ;;  %1687 = vst [vmem:[%s1612_s7 + $0x80] sm:$0xff] (%p2382_p6), %v1686_v9 }
 0x3ca   : > { %1598 = vst [vmem:[%s2916_s29 + $0x78] sm:$0xff] %v1582_v60  ;;  %v1560_v46 = vpop.permute.xlu1 %1559  ;;  %1693 = vst [vmem:[%s1612_s7 + $0xb0] sm:$0xff] (%p2382_p6), %v1692_v30 }
 0x3cb   : > { %v1581_v29 = vmul.f32 %v1560_v46, %v1402_v21 }
 0x3cc   : > { %v1690_v39 = vld [vmem:[%s2916_s29 + $0x50] sm:$0xff] (%p2382_p6) }
 0x3cd   : > { %1597 = vst [vmem:[%s2916_s29 + $0x70] sm:$0xff] %v1581_v29  ;;  %1691 = vst [vmem:[%s1612_s7 + $0xa0] sm:$0xff] (%p2382_p6), %v1690_v39  ;;  %v1696_v20 = vld [vmem:[%s2916_s29 + $0x68] sm:$0xff] (%p2382_p6) }
 0x3ce   : > { %1697 = vst [vmem:[%s1612_s7 + $0xd0] sm:$0xff] %v1696_v20 }
 0x3d0   : > { %v1694_v47 = vld [vmem:[%s2916_s29 + $0x60] sm:$0xff] }
 0x3d1   : > { %1695 = vst [vmem:[%s1612_s7 + $0xc0] sm:$0xff] %v1694_v47  ;;  %v1700_v42 = vld [vmem:[%s2916_s29 + $0x78] sm:$0xff] }
 0x3d2   : > { %1701 = vst [vmem:[%s1612_s7 + $0xf0] sm:$0xff] %v1700_v42 }
 0x3d4   : > { %v1698_v54 = vld [vmem:[%s2916_s29 + $0x70] sm:$0xff] }
 0x3d5   : > { %1699 = vst [vmem:[%s1612_s7 + $0xe0] sm:$0xff] %v1698_v54 }
 0x3d6 PF: > { %s13_s18 = sadd.s32 1, %s2305_s18   ;;  %s3007_s12 = smov %s2285_s13 }
 0x3d7   : > { %p10_p12 = scmp.ge.s32.totalorder %s13_s18, 6   ;;  %s3008_s13 = smov %s2390_s28 }
 0x3d8   : > { %s3009_s14 = smov %s2297_s16  ;;  %s3010_s15 = smov %s2301_s17 }
 0x3d9   : > { %s3011_s16 = smov %s3014_s19  ;;  %s3012_s17 = smov %s3018_s20 }
 0x3da   :  { %12 = sbr.rel (!%p10_p12) target bundleno = 4 (0x4), region = 243 }

// kernel: multi_head_attention.5
= control target key start
LH: loop header
LB: loop body
LE: loop exit
PB: predicated region body
PF: predicated region fallthrough
CT: control target
= control target key end

     0   :  { %s1496_s0 = inlined_call_operand.vmem [shape: f32[256,256], index: 0, kind: input, shape index: {}]   ;;  %s1497_s1 = inlined_call_operand.vmem [shape: f32[256,256], index: 1, kind: input, shape index: {}]   ;;  %s1498_s2 = inlined_call_operand.vmem [shape: f32[1,256], index: 2, kind: input, shape index: {}]   ;;  %s1499_s3 = inlined_call_operand.hbm [shape: f32[256,256], index: 3, kind: output, shape index: {}]  }
   0x1   :  { %v212_v0 = vld [vmem:[%s1497_s1 + $0x8] sm:$0xff]  ;;  %v214_v1 = vld [vmem:[%s1497_s1 + $0x18] sm:$0xff]  ;;  %v211_v2 = vld [vmem:[%s1497_s1] sm:$0xff] }
   0x2   :  { %v883_v3 = vpack.c.bf16 %v214_v1, %v212_v0  ;;  %v213_v4 = vld [vmem:[%s1497_s1 + $0x10] sm:$0xff]  ;;  %v216_v5 = vld [vmem:[%s1497_s1 + $0x28] sm:$0xff]  ;;  %v218_v6 = vld [vmem:[%s1497_s1 + $0x38] sm:$0xff] }
   0x3   :  { %v885_v7 = vpack.c.bf16 %v213_v4, %v211_v2  ;;  %v887_v8 = vpack.c.bf16 %v218_v6, %v216_v5  ;;  %v215_v9 = vld [vmem:[%s1497_s1 + $0x20] sm:$0xff]  ;;  %v217_v10 = vld [vmem:[%s1497_s1 + $0x30] sm:$0xff]  ;;  %v220_v11 = vld [vmem:[%s1497_s1 + $0x48] sm:$0xff] }
   0x4   :  { %884 = vmatprep.subr.bf16.mxu0 %v883_v3  ;;  %947 = vmatprep.subr.bf16.mxu1 %v883_v3  ;;  %v222_v12 = vld [vmem:[%s1497_s1 + $0x58] sm:$0xff]  ;;  %v889_v13 = vpack.c.bf16 %v217_v10, %v215_v9  ;;  %v219_v15 = vld [vmem:[%s1497_s1 + $0x40] sm:$0xff]  ;;  %v221_v16 = vld [vmem:[%s1497_s1 + $0x50] sm:$0xff] }
   0x5   :  { %886 = vmatpush1.bf16.msra.mxu0 %v885_v7  ;;  %963 = vmatpush1.bf16.msra.mxu1 %v885_v7  ;;  %v891_v14 = vpack.c.bf16 %v222_v12, %v220_v11  ;;  %v224_v17 = vld [vmem:[%s1497_s1 + $0x68] sm:$0xff]  ;;  %v226_v18 = vld [vmem:[%s1497_s1 + $0x78] sm:$0xff]  ;;  %v893_v19 = vpack.c.bf16 %v221_v16, %v219_v15  ;;  %v223_v21 = vld [vmem:[%s1497_s1 + $0x60] sm:$0xff] }
   0x6   :  { %888 = vmatprep.subr.bf16.mxu0 %v887_v8  ;;  %948 = vmatprep.subr.bf16.mxu1 %v887_v8  ;;  %v895_v20 = vpack.c.bf16 %v226_v18, %v224_v17  ;;  %v225_v22 = vld [vmem:[%s1497_s1 + $0x70] sm:$0xff]  ;;  %v228_v23 = vld [vmem:[%s1497_s1 + $0x88] sm:$0xff]  ;;  %v230_v24 = vld [vmem:[%s1497_s1 + $0x98] sm:$0xff] }
   0x7   :  { %v897_v25 = vpack.c.bf16 %v225_v22, %v223_v21  ;;  %v899_v26 = vpack.c.bf16 %v230_v24, %v228_v23  ;;  %v227_v27 = vld [vmem:[%s1497_s1 + $0x80] sm:$0xff]  ;;  %v229_v28 = vld [vmem:[%s1497_s1 + $0x90] sm:$0xff]  ;;  %v232_v29 = vld [vmem:[%s1497_s1 + $0xa8] sm:$0xff] }
   0x8   :  { %v234_v30 = vld [vmem:[%s1497_s1 + $0xb8] sm:$0xff]  ;;  %v901_v31 = vpack.c.bf16 %v229_v28, %v227_v27  ;;  %v231_v33 = vld [vmem:[%s1497_s1 + $0xa0] sm:$0xff]  ;;  %v233_v34 = vld [vmem:[%s1497_s1 + $0xb0] sm:$0xff] }
   0x9   :  { %890 = vmatpush1.bf16.msra.mxu0 %v889_v13  ;;  %964 = vmatpush1.bf16.msra.mxu1 %v889_v13  ;;  %v903_v32 = vpack.c.bf16 %v234_v30, %v232_v29  ;;  %v236_v35 = vld [vmem:[%s1497_s1 + $0xc8] sm:$0xff]  ;;  %v238_v36 = vld [vmem:[%s1497_s1 + $0xd8] sm:$0xff]  ;;  %v905_v37 = vpack.c.bf16 %v233_v34, %v231_v33  ;;  %v235_v38 = vld [vmem:[%s1497_s1 + $0xc0] sm:$0xff] }
   0xa   :  { %892 = vmatprep.subr.bf16.mxu0 %v891_v14  ;;  %949 = vmatprep.subr.bf16.mxu1 %v891_v14  ;;  %v907_v39 = vpack.c.bf16 %v238_v36, %v236_v35  ;;  %v237_v40 = vld [vmem:[%s1497_s1 + $0xd0] sm:$0xff]  ;;  %v148_v41 = vld [vmem:[%s1496_s0 + $0x8] sm:$0xff]  ;;  %v242_v44 = vld [vmem:[%s1497_s1 + $0xf8] sm:$0xff] }
   0xb   :  { %v180_v42 = vld [vmem:[%s1496_s0 + $0x108] sm:$0xff]  ;;  %339 = vmatprep.mubr.f32.mxu0 %v148_v41  ;;  %v909_v45 = vpack.c.bf16 %v237_v40, %v235_v38  ;;  %v239_v47 = vld [vmem:[%s1497_s1 + $0xe0] sm:$0xff]  ;;  %v241_v48 = vld [vmem:[%s1497_s1 + $0xf0] sm:$0xff] }
   0xc   :  { %v240_v43 = vld [vmem:[%s1497_s1 + $0xe8] sm:$0xff]  ;;  %435 = vmatprep.mubr.f32.mxu1 %v180_v42  ;;  %v246_v50 = vld [vmem:[%s1497_s1 + $0x118] sm:$0xff]  ;;  %v913_v51 = vpack.c.bf16 %v241_v48, %v239_v47  ;;  %v243_v53 = vld [vmem:[%s1497_s1 + $0x100] sm:$0xff] }
   0xd   :  { %894 = vmatpush1.bf16.msra.mxu0 %v893_v19  ;;  %965 = vmatpush1.bf16.msra.mxu1 %v893_v19  ;;  %v911_v46 = vpack.c.bf16 %v242_v44, %v240_v43  ;;  %v244_v49 = vld [vmem:[%s1497_s1 + $0x108] sm:$0xff]  ;;  %v245_v54 = vld [vmem:[%s1497_s1 + $0x110] sm:$0xff]  ;;  %v250_v56 = vld [vmem:[%s1497_s1 + $0x138] sm:$0xff] }
   0xe   :  { %896 = vmatprep.subr.bf16.mxu0 %v895_v20  ;;  %950 = vmatprep.subr.bf16.mxu1 %v895_v20  ;;  %v915_v52 = vpack.c.bf16 %v246_v50, %v244_v49  ;;  %v248_v55 = vld [vmem:[%s1497_s1 + $0x128] sm:$0xff]  ;;  %v917_v57 = vpack.c.bf16 %v245_v54, %v243_v53  ;;  %v247_v59 = vld [vmem:[%s1497_s1 + $0x120] sm:$0xff]  ;;  %v249_v60 = vld [vmem:[%s1497_s1 + $0x130] sm:$0xff] }
   0xf   :  { %v919_v58 = vpack.c.bf16 %v250_v56, %v248_v55  ;;  %v252_v61 = vld [vmem:[%s1497_s1 + $0x148] sm:$0xff]  ;;  %v254_v62 = vld [vmem:[%s1497_s1 + $0x158] sm:$0xff]  ;;  %v921_v63 = vpack.c.bf16 %v249_v60, %v247_v59  ;;  %v251_v1 = vld [vmem:[%s1497_s1 + $0x140] sm:$0xff] }
  0x10   :  { %v923_v0 = vpack.c.bf16 %v254_v62, %v252_v61  ;;  %v253_v2 = vld [vmem:[%s1497_s1 + $0x150] sm:$0xff]  ;;  %v256_v3 = vld [vmem:[%s1497_s1 + $0x168] sm:$0xff]  ;;  %v258_v4 = vld [vmem:[%s1497_s1 + $0x178] sm:$0xff] }
  0x11   :  { %898 = vmatpush1.bf16.msra.mxu0 %v897_v25  ;;  %966 = vmatpush1.bf16.msra.mxu1 %v897_v25  ;;  %v925_v5 = vpack.c.bf16 %v253_v2, %v251_v1  ;;  %v927_v6 = vpack.c.bf16 %v258_v4, %v256_v3  ;;  %v255_v7 = vld [vmem:[%s1497_s1 + $0x160] sm:$0xff]  ;;  %v257_v8 = vld [vmem:[%s1497_s1 + $0x170] sm:$0xff]  ;;  %v260_v9 = vld [vmem:[%s1497_s1 + $0x188] sm:$0xff] }
  0x12   :  { %900 = vmatprep.subr.bf16.mxu0 %v899_v26  ;;  %951 = vmatprep.subr.bf16.mxu1 %v899_v26  ;;  %v262_v10 = vld [vmem:[%s1497_s1 + $0x198] sm:$0xff] }
  0x15   :  { %902 = vmatpush1.bf16.msra.mxu0 %v901_v31  ;;  %967 = vmatpush1.bf16.msra.mxu1 %v901_v31 }
  0x16   :  { %904 = vmatprep.subr.bf16.mxu0 %v903_v32  ;;  %952 = vmatprep.subr.bf16.mxu1 %v903_v32 }
  0x19   :  { %906 = vmatpush1.bf16.msra.mxu0 %v905_v37  ;;  %968 = vmatpush1.bf16.msra.mxu1 %v905_v37 }
  0x1a   :  { %908 = vmatprep.subr.bf16.mxu0 %v907_v39  ;;  %953 = vmatprep.subr.bf16.mxu1 %v907_v39 }
  0x1d   :  { %910 = vmatpush1.bf16.msra.mxu0 %v909_v45  ;;  %969 = vmatpush1.bf16.msra.mxu1 %v909_v45 }
  0x1e   :  { %912 = vmatprep.subr.bf16.mxu0 %v911_v46  ;;  %954 = vmatprep.subr.bf16.mxu1 %v911_v46 }
  0x21   :  { %914 = vmatpush1.bf16.msra.mxu0 %v913_v51  ;;  %970 = vmatpush1.bf16.msra.mxu1 %v913_v51 }
  0x22   :  { %916 = vmatprep.subr.bf16.mxu0 %v915_v52  ;;  %955 = vmatprep.subr.bf16.mxu1 %v915_v52 }
  0x25   :  { %918 = vmatpush1.bf16.msra.mxu0 %v917_v57  ;;  %971 = vmatpush1.bf16.msra.mxu1 %v917_v57 }
  0x26   :  { %920 = vmatprep.subr.bf16.mxu0 %v919_v58  ;;  %956 = vmatprep.subr.bf16.mxu1 %v919_v58 }
  0x29   :  { %922 = vmatpush1.bf16.msra.mxu0 %v921_v63  ;;  %972 = vmatpush1.bf16.msra.mxu1 %v921_v63 }
  0x2a   :  { %924 = vmatprep.subr.bf16.mxu0 %v923_v0  ;;  %957 = vmatprep.subr.bf16.mxu1 %v923_v0 }
  0x2b   :  { %8 = vsyncpa [#allocation4], 0  ;;  %v929_v11 = vpack.c.bf16 %v257_v8, %v255_v7  ;;  %v931_v12 = vpack.c.bf16 %v262_v10, %v260_v9  ;;  %v259_v13 = vld [vmem:[%s1497_s1 + $0x180] sm:$0xff]  ;;  %v261_v14 = vld [vmem:[%s1497_s1 + $0x190] sm:$0xff] }
  0x2c   :  { %v264_v15 = vld [vmem:[%s1497_s1 + $0x1a8] sm:$0xff]  ;;  %v266_v16 = vld [vmem:[%s1497_s1 + $0x1b8] sm:$0xff]  ;;  %v933_v17 = vpack.c.bf16 %v261_v14, %v259_v13  ;;  %v263_v19 = vld [vmem:[%s1497_s1 + $0x1a0] sm:$0xff] }
  0x2d   :  { %926 = vmatpush1.bf16.msra.mxu0 %v925_v5  ;;  %973 = vmatpush1.bf16.msra.mxu1 %v925_v5  ;;  %v935_v18 = vpack.c.bf16 %v266_v16, %v264_v15  ;;  %v265_v20 = vld [vmem:[%s1497_s1 + $0x1b0] sm:$0xff]  ;;  %v268_v21 = vld [vmem:[%s1497_s1 + $0x1c8] sm:$0xff]  ;;  %v270_v22 = vld [vmem:[%s1497_s1 + $0x1d8] sm:$0xff] }
  0x2e   :  { %928 = vmatprep.subr.bf16.mxu0 %v927_v6  ;;  %958 = vmatprep.subr.bf16.mxu1 %v927_v6  ;;  %v937_v23 = vpack.c.bf16 %v265_v20, %v263_v19  ;;  %v939_v24 = vpack.c.bf16 %v270_v22, %v268_v21  ;;  %v267_v25 = vld [vmem:[%s1497_s1 + $0x1c0] sm:$0xff]  ;;  %v269_v26 = vld [vmem:[%s1497_s1 + $0x1d0] sm:$0xff]  ;;  %v272_v27 = vld [vmem:[%s1497_s1 + $0x1e8] sm:$0xff] }
  0x2f   :  { %v274_v28 = vld [vmem:[%s1497_s1 + $0x1f8] sm:$0xff]  ;;  %v941_v29 = vpack.c.bf16 %v269_v26, %v267_v25  ;;  %v271_v31 = vld [vmem:[%s1497_s1 + $0x1e0] sm:$0xff]  ;;  %v273_v32 = vld [vmem:[%s1497_s1 + $0x1f0] sm:$0xff] }
  0x30   :  { %v943_v30 = vpack.c.bf16 %v274_v28, %v272_v27  ;;  %v945_v33 = vpack.c.bf16 %v273_v32, %v271_v31  ;;  %v147_v34 = vld [vmem:[%s1496_s0] sm:$0xff]  ;;  %v150_v36 = vld [vmem:[%s1496_s0 + $0x18] sm:$0xff]  ;;  %v149_v38 = vld [vmem:[%s1496_s0 + $0x10] sm:$0xff]  ;;  %v729_v32 = vlaneseq }
  0x31   :  { %930 = vmatpush1.bf16.msra.mxu0 %v929_v11  ;;  %974 = vmatpush1.bf16.msra.mxu1 %v929_v11  ;;  %v179_v35 = vld [vmem:[%s1496_s0 + $0x100] sm:$0xff]  ;;  %v182_v37 = vld [vmem:[%s1496_s0 + $0x118] sm:$0xff]  ;;  %v181_v39 = vld [vmem:[%s1496_s0 + $0x110] sm:$0xff] }
  0x32   :  { %932 = vmatprep.subr.bf16.mxu0 %v931_v12  ;;  %959 = vmatprep.subr.bf16.mxu1 %v931_v12  ;;  %v152_v40 = vld [vmem:[%s1496_s0 + $0x28] sm:$0xff]  ;;  %v151_v42 = vld [vmem:[%s1496_s0 + $0x20] sm:$0xff]  ;;  %v154_v44 = vld [vmem:[%s1496_s0 + $0x38] sm:$0xff] }
  0x33   :  { %v184_v41 = vld [vmem:[%s1496_s0 + $0x128] sm:$0xff]  ;;  %v183_v43 = vld [vmem:[%s1496_s0 + $0x120] sm:$0xff]  ;;  %v186_v45 = vld [vmem:[%s1496_s0 + $0x138] sm:$0xff] }
  0x34   :  { %v153_v46 = vld [vmem:[%s1496_s0 + $0x30] sm:$0xff]  ;;  %v156_v48 = vld [vmem:[%s1496_s0 + $0x48] sm:$0xff]  ;;  %v155_v50 = vld [vmem:[%s1496_s0 + $0x40] sm:$0xff] }
  0x35   :  { %934 = vmatpush1.bf16.msra.mxu0 %v933_v17  ;;  %975 = vmatpush1.bf16.msra.mxu1 %v933_v17  ;;  %v185_v47 = vld [vmem:[%s1496_s0 + $0x130] sm:$0xff]  ;;  %v188_v49 = vld [vmem:[%s1496_s0 + $0x148] sm:$0xff]  ;;  %v187_v51 = vld [vmem:[%s1496_s0 + $0x140] sm:$0xff] }
  0x36   :  { %936 = vmatprep.subr.bf16.mxu0 %v935_v18  ;;  %960 = vmatprep.subr.bf16.mxu1 %v935_v18  ;;  %v158_v52 = vld [vmem:[%s1496_s0 + $0x58] sm:$0xff]  ;;  %v157_v54 = vld [vmem:[%s1496_s0 + $0x50] sm:$0xff]  ;;  %v160_v56 = vld [vmem:[%s1496_s0 + $0x68] sm:$0xff] }
  0x37   :  { %v190_v53 = vld [vmem:[%s1496_s0 + $0x158] sm:$0xff]  ;;  %v189_v55 = vld [vmem:[%s1496_s0 + $0x150] sm:$0xff]  ;;  %v192_v57 = vld [vmem:[%s1496_s0 + $0x168] sm:$0xff] }
  0x38   :  { %v159_v58 = vld [vmem:[%s1496_s0 + $0x60] sm:$0xff]  ;;  %v162_v60 = vld [vmem:[%s1496_s0 + $0x78] sm:$0xff]  ;;  %v161_v62 = vld [vmem:[%s1496_s0 + $0x70] sm:$0xff] }
  0x39   :  { %938 = vmatpush1.bf16.msra.mxu0 %v937_v23  ;;  %976 = vmatpush1.bf16.msra.mxu1 %v937_v23  ;;  %v191_v59 = vld [vmem:[%s1496_s0 + $0x160] sm:$0xff]  ;;  %v194_v61 = vld [vmem:[%s1496_s0 + $0x178] sm:$0xff]  ;;  %v193_v63 = vld [vmem:[%s1496_s0 + $0x170] sm:$0xff] }
  0x3a   :  { %940 = vmatprep.subr.bf16.mxu0 %v939_v24  ;;  %961 = vmatprep.subr.bf16.mxu1 %v939_v24  ;;  %v164_v0 = vld [vmem:[%s1496_s0 + $0x88] sm:$0xff]  ;;  %v163_v2 = vld [vmem:[%s1496_s0 + $0x80] sm:$0xff]  ;;  %v166_v4 = vld [vmem:[%s1496_s0 + $0x98] sm:$0xff] }
  0x3b   :  { %v196_v1 = vld [vmem:[%s1496_s0 + $0x188] sm:$0xff]  ;;  %v195_v3 = vld [vmem:[%s1496_s0 + $0x180] sm:$0xff]  ;;  %v198_v5 = vld [vmem:[%s1496_s0 + $0x198] sm:$0xff] }
  0x3c   :  { %v165_v6 = vld [vmem:[%s1496_s0 + $0x90] sm:$0xff]  ;;  %v168_v8 = vld [vmem:[%s1496_s0 + $0xa8] sm:$0xff]  ;;  %v167_v10 = vld [vmem:[%s1496_s0 + $0xa0] sm:$0xff] }
  0x3d   :  { %942 = vmatpush1.bf16.msra.mxu0 %v941_v29  ;;  %977 = vmatpush1.bf16.msra.mxu1 %v941_v29  ;;  %v197_v7 = vld [vmem:[%s1496_s0 + $0x190] sm:$0xff]  ;;  %v200_v9 = vld [vmem:[%s1496_s0 + $0x1a8] sm:$0xff]  ;;  %v199_v11 = vld [vmem:[%s1496_s0 + $0x1a0] sm:$0xff] }
  0x3e   :  { %944 = vmatprep.subr.bf16.mxu0 %v943_v30  ;;  %962 = vmatprep.subr.bf16.mxu1 %v943_v30  ;;  %v170_v12 = vld [vmem:[%s1496_s0 + $0xb8] sm:$0xff]  ;;  %v169_v14 = vld [vmem:[%s1496_s0 + $0xb0] sm:$0xff]  ;;  %v172_v16 = vld [vmem:[%s1496_s0 + $0xc8] sm:$0xff] }
  0x3f   :  { %v202_v13 = vld [vmem:[%s1496_s0 + $0x1b8] sm:$0xff]  ;;  %v201_v15 = vld [vmem:[%s1496_s0 + $0x1b0] sm:$0xff]  ;;  %v204_v17 = vld [vmem:[%s1496_s0 + $0x1c8] sm:$0xff] }
  0x40   :  { %v171_v18 = vld [vmem:[%s1496_s0 + $0xc0] sm:$0xff]  ;;  %v174_v20 = vld [vmem:[%s1496_s0 + $0xd8] sm:$0xff]  ;;  %v173_v22 = vld [vmem:[%s1496_s0 + $0xd0] sm:$0xff] }
  0x41   :  { %946 = vmatpush1.bf16.msra.mxu0 %v945_v33  ;;  %978 = vmatpush1.bf16.msra.mxu1 %v945_v33  ;;  %v203_v19 = vld [vmem:[%s1496_s0 + $0x1c0] sm:$0xff]  ;;  %v206_v21 = vld [vmem:[%s1496_s0 + $0x1d8] sm:$0xff]  ;;  %v205_v23 = vld [vmem:[%s1496_s0 + $0x1d0] sm:$0xff]  ;;  %v730_v33 = vshrl.u32 %v729_v32, 7 }
  0x42   :  { %v176_v24 = vld [vmem:[%s1496_s0 + $0xe8] sm:$0xff]  ;;  %v175_v26 = vld [vmem:[%s1496_s0 + $0xe0] sm:$0xff]  ;;  %v178_v28 = vld [vmem:[%s1496_s0 + $0xf8] sm:$0xff] }
  0x43   :  { %v208_v25 = vld [vmem:[%s1496_s0 + $0x1e8] sm:$0xff]  ;;  %v207_v27 = vld [vmem:[%s1496_s0 + $0x1e0] sm:$0xff]  ;;  %v210_v29 = vld [vmem:[%s1496_s0 + $0x1f8] sm:$0xff] }
  0x44   :  { %340 = vmatmul.mubr.f32.vlgmr.msra.gmra.mrb[0].mxu0 %v147_v34  ;;  %436 = vmatmul.mubr.f32.vlgmr.msra.gmra.mrb[0].mxu1 %v179_v35  ;;  %v177_v30 = vld [vmem:[%s1496_s0 + $0xf0] sm:$0xff]  ;;  %v731_v34 = vsub.s32 0, %v730_v33  ;;  %v727_v35 = vld [vmem:[%s1498_s2] sm:$0x3] }
  0x45   :  { %345 = vmatprep.mubr.f32.mxu0 %v150_v36  ;;  %441 = vmatprep.mubr.f32.mxu1 %v182_v37  ;;  %v209_v31 = vld [vmem:[%s1496_s0 + $0x1f0] sm:$0xff]  ;;  %v735_v36 = vsub.s32 1, %v730_v33  ;;  %s1006_s0 = smov [#allocation3]  }
  0x46   :  { %v1416_v37 = vrot.slane %v727_v35, %v731_v34  ;;  %s872_s2 = sshll.u32 %s1006_s0, 4  ;;  %s873_s2 = int_to_ptr.vmem [resolvable:$true] %s872_s2 }
  0x47   :  { %s982_s22 = scalar_lea.vmem %s873_s2, 8192  ;;  %p987_p1 = scmp.lt.s32.totalorder %s873_s2, %s873_s2 }
  0x48   :  { %346 = vmatmul.mubr.f32.gmra.mrb[2].mxu0 %v149_v38  ;;  %442 = vmatmul.mubr.f32.gmra.mrb[2].mxu1 %v181_v39  ;;  %v1418_v38 = vrot.slane %v727_v35, %v735_v36  ;;  %p983_p0 = scmp.ne.s32.totalorder %s873_s2, %s982_s22  ;;  %p988_p2 = scmp.lt.s32.totalorder %s982_s22, %s982_s22 }
  0x49   :  { %351 = vmatprep.mubr.f32.mxu0 %v152_v40  ;;  %447 = vmatprep.mubr.f32.mxu1 %v184_v41 }
  0x4a   :  { %p989_p3 = por %p988_p2, %p987_p1 }
  0x4c   :  { %352 = vmatmul.mubr.f32.gmra.mrb[4].mxu0 %v151_v42  ;;  %448 = vmatmul.mubr.f32.gmra.mrb[4].mxu1 %v183_v43  ;;  %p990_p4 = pnand %p989_p3, %p983_p0 }
  0x4d   :  { %357 = vmatprep.mubr.f32.mxu0 %v154_v44  ;;  %453 = vmatprep.mubr.f32.mxu1 %v186_v45 }
  0x50   :  { %358 = vmatmul.mubr.f32.gmra.mrb[6].mxu0 %v153_v46  ;;  %454 = vmatmul.mubr.f32.gmra.mrb[6].mxu1 %v185_v47 }
  0x51   :  { %363 = vmatprep.mubr.f32.mxu0 %v156_v48  ;;  %459 = vmatprep.mubr.f32.mxu1 %v188_v49 }
  0x54   :  { %364 = vmatmul.mubr.f32.gmra.mrb[8].mxu0 %v155_v50  ;;  %460 = vmatmul.mubr.f32.gmra.mrb[8].mxu1 %v187_v51 }
  0x55   :  { %369 = vmatprep.mubr.f32.mxu0 %v158_v52  ;;  %465 = vmatprep.mubr.f32.mxu1 %v190_v53 }
  0x58   :  { %370 = vmatmul.mubr.f32.gmra.mrb[10].mxu0 %v157_v54  ;;  %466 = vmatmul.mubr.f32.gmra.mrb[10].mxu1 %v189_v55 }
  0x59   :  { %375 = vmatprep.mubr.f32.mxu0 %v160_v56  ;;  %471 = vmatprep.mubr.f32.mxu1 %v192_v57 }
  0x5c   :  { %376 = vmatmul.mubr.f32.gmra.mrb[12].mxu0 %v159_v58  ;;  %472 = vmatmul.mubr.f32.gmra.mrb[12].mxu1 %v191_v59 }
  0x5d   :  { %381 = vmatprep.mubr.f32.mxu0 %v162_v60  ;;  %477 = vmatprep.mubr.f32.mxu1 %v194_v61 }
  0x60   :  { %382 = vmatmul.mubr.f32.gmra.mrb[14].mxu0 %v161_v62  ;;  %478 = vmatmul.mubr.f32.gmra.mrb[14].mxu1 %v193_v63 }
  0x61   :  { %387 = vmatprep.mubr.f32.mxu0 %v164_v0  ;;  %483 = vmatprep.mubr.f32.mxu1 %v196_v1 }
  0x64   :  { %388 = vmatmul.mubr.f32.gmra.mrb[16].mxu0 %v163_v2  ;;  %484 = vmatmul.mubr.f32.gmra.mrb[16].mxu1 %v195_v3 }
  0x65   :  { %393 = vmatprep.mubr.f32.mxu0 %v166_v4  ;;  %489 = vmatprep.mubr.f32.mxu1 %v198_v5 }
  0x68   :  { %394 = vmatmul.mubr.f32.gmra.mrb[18].mxu0 %v165_v6  ;;  %490 = vmatmul.mubr.f32.gmra.mrb[18].mxu1 %v197_v7 }
  0x69   :  { %399 = vmatprep.mubr.f32.mxu0 %v168_v8  ;;  %495 = vmatprep.mubr.f32.mxu1 %v200_v9 }
  0x6c   :  { %400 = vmatmul.mubr.f32.gmra.mrb[20].mxu0 %v167_v10  ;;  %496 = vmatmul.mubr.f32.gmra.mrb[20].mxu1 %v199_v11 }
  0x6d   :  { %405 = vmatprep.mubr.f32.mxu0 %v170_v12  ;;  %501 = vmatprep.mubr.f32.mxu1 %v202_v13 }
  0x70   :  { %406 = vmatmul.mubr.f32.gmra.mrb[22].mxu0 %v169_v14  ;;  %502 = vmatmul.mubr.f32.gmra.mrb[22].mxu1 %v201_v15 }
  0x71   :  { %411 = vmatprep.mubr.f32.mxu0 %v172_v16  ;;  %507 = vmatprep.mubr.f32.mxu1 %v204_v17 }
  0x74   :  { %412 = vmatmul.mubr.f32.gmra.mrb[24].mxu0 %v171_v18  ;;  %508 = vmatmul.mubr.f32.gmra.mrb[24].mxu1 %v203_v19 }
  0x75   :  { %417 = vmatprep.mubr.f32.mxu0 %v174_v20  ;;  %513 = vmatprep.mubr.f32.mxu1 %v206_v21 }
  0x78   :  { %418 = vmatmul.mubr.f32.gmra.mrb[26].mxu0 %v173_v22  ;;  %514 = vmatmul.mubr.f32.gmra.mrb[26].mxu1 %v205_v23 }
  0x79   :  { %423 = vmatprep.mubr.f32.mxu0 %v176_v24  ;;  %519 = vmatprep.mubr.f32.mxu1 %v208_v25 }
  0x7c   :  { %424 = vmatmul.mubr.f32.gmra.mrb[28].mxu0 %v175_v26  ;;  %520 = vmatmul.mubr.f32.gmra.mrb[28].mxu1 %v207_v27 }
  0x7d   :  { %429 = vmatprep.mubr.f32.mxu0 %v178_v28  ;;  %525 = vmatprep.mubr.f32.mxu1 %v210_v29 }
  0x80   :  { %430 = vmatmul.mubr.f32.gmra.mrb[30].mxu0 %v177_v30  ;;  %526 = vmatmul.mubr.f32.gmra.mrb[30].mxu1 %v209_v31 }
 0x117   :  { %v341_v39 = vpop.f32.mrb[0].mxu0  ;;  %v437_v40 = vpop.f32.mrb[0].mxu1 }
 0x118   :  { %v739_v41 = vadd.f32 %v1416_v37, %v341_v39  ;;  %v771_v42 = vadd.f32 %v1416_v37, %v437_v40  ;;  %v343_v43 = vpop.f32.mrb[1].mxu0  ;;  %v439_v44 = vpop.f32.mrb[1].mxu1 }
 0x119   :  { %v740_v45 = vadd.f32 %v1418_v38, %v343_v43  ;;  %v772_v46 = vadd.f32 %v1418_v38, %v439_v44 }
 0x11a   :  { %803 = vst [vmem:[#allocation3] sm:$0xff] %v739_v41  ;;  %835 = vst [vmem:[#allocation3 + $0x100] sm:$0xff] %v771_v42 }
 0x11b   :  { %804 = vst [vmem:[#allocation3 + $0x8] sm:$0xff] %v740_v45  ;;  %836 = vst [vmem:[#allocation3 + $0x108] sm:$0xff] %v772_v46  ;;  %v347_v47 = vpop.f32.mrb[2].mxu0  ;;  %v443_v48 = vpop.f32.mrb[2].mxu1 }
 0x11c   :  { %v741_v49 = vadd.f32 %v1416_v37, %v347_v47  ;;  %v773_v50 = vadd.f32 %v1416_v37, %v443_v48  ;;  %v349_v51 = vpop.f32.mrb[3].mxu0  ;;  %v445_v52 = vpop.f32.mrb[3].mxu1 }
 0x11d   :  { %v742_v53 = vadd.f32 %v1418_v38, %v349_v51  ;;  %v774_v54 = vadd.f32 %v1418_v38, %v445_v52 }
 0x11e   :  { %805 = vst [vmem:[#allocation3 + $0x10] sm:$0xff] %v741_v49  ;;  %837 = vst [vmem:[#allocation3 + $0x110] sm:$0xff] %v773_v50 }
 0x11f   :  { %806 = vst [vmem:[#allocation3 + $0x18] sm:$0xff] %v742_v53  ;;  %838 = vst [vmem:[#allocation3 + $0x118] sm:$0xff] %v774_v54  ;;  %v353_v55 = vpop.f32.mrb[4].mxu0  ;;  %v449_v56 = vpop.f32.mrb[4].mxu1 }
 0x120   :  { %v743_v57 = vadd.f32 %v1416_v37, %v353_v55  ;;  %v775_v58 = vadd.f32 %v1416_v37, %v449_v56  ;;  %v355_v59 = vpop.f32.mrb[5].mxu0  ;;  %v451_v60 = vpop.f32.mrb[5].mxu1 }
 0x121   :  { %v744_v61 = vadd.f32 %v1418_v38, %v355_v59  ;;  %v776_v62 = vadd.f32 %v1418_v38, %v451_v60 }
 0x122   :  { %807 = vst [vmem:[#allocation3 + $0x20] sm:$0xff] %v743_v57  ;;  %839 = vst [vmem:[#allocation3 + $0x120] sm:$0xff] %v775_v58 }
 0x123   :  { %808 = vst [vmem:[#allocation3 + $0x28] sm:$0xff] %v744_v61  ;;  %840 = vst [vmem:[#allocation3 + $0x128] sm:$0xff] %v776_v62  ;;  %v359_v63 = vpop.f32.mrb[6].mxu0  ;;  %v455_v0 = vpop.f32.mrb[6].mxu1 }
 0x124   :  { %v745_v1 = vadd.f32 %v1416_v37, %v359_v63  ;;  %v777_v2 = vadd.f32 %v1416_v37, %v455_v0  ;;  %v361_v3 = vpop.f32.mrb[7].mxu0  ;;  %v457_v4 = vpop.f32.mrb[7].mxu1 }
 0x125   :  { %v746_v5 = vadd.f32 %v1418_v38, %v361_v3  ;;  %v778_v6 = vadd.f32 %v1418_v38, %v457_v4 }
 0x126   :  { %809 = vst [vmem:[#allocation3 + $0x30] sm:$0xff] %v745_v1  ;;  %841 = vst [vmem:[#allocation3 + $0x130] sm:$0xff] %v777_v2 }
 0x127   :  { %810 = vst [vmem:[#allocation3 + $0x38] sm:$0xff] %v746_v5  ;;  %842 = vst [vmem:[#allocation3 + $0x138] sm:$0xff] %v778_v6  ;;  %v365_v7 = vpop.f32.mrb[8].mxu0  ;;  %v461_v8 = vpop.f32.mrb[8].mxu1 }
 0x128   :  { %v747_v9 = vadd.f32 %v1416_v37, %v365_v7  ;;  %v779_v10 = vadd.f32 %v1416_v37, %v461_v8  ;;  %v367_v11 = vpop.f32.mrb[9].mxu0  ;;  %v463_v12 = vpop.f32.mrb[9].mxu1 }
 0x129   :  { %v748_v13 = vadd.f32 %v1418_v38, %v367_v11  ;;  %v780_v14 = vadd.f32 %v1418_v38, %v463_v12 }
 0x12a   :  { %811 = vst [vmem:[#allocation3 + $0x40] sm:$0xff] %v747_v9  ;;  %843 = vst [vmem:[#allocation3 + $0x140] sm:$0xff] %v779_v10 }
 0x12b   :  { %812 = vst [vmem:[#allocation3 + $0x48] sm:$0xff] %v748_v13  ;;  %844 = vst [vmem:[#allocation3 + $0x148] sm:$0xff] %v780_v14  ;;  %v371_v15 = vpop.f32.mrb[10].mxu0  ;;  %v467_v16 = vpop.f32.mrb[10].mxu1 }
 0x12c   :  { %v749_v17 = vadd.f32 %v1416_v37, %v371_v15  ;;  %v781_v18 = vadd.f32 %v1416_v37, %v467_v16  ;;  %v373_v19 = vpop.f32.mrb[11].mxu0  ;;  %v469_v20 = vpop.f32.mrb[11].mxu1 }
 0x12d   :  { %v750_v21 = vadd.f32 %v1418_v38, %v373_v19  ;;  %v782_v22 = vadd.f32 %v1418_v38, %v469_v20 }
 0x12e   :  { %813 = vst [vmem:[#allocation3 + $0x50] sm:$0xff] %v749_v17  ;;  %845 = vst [vmem:[#allocation3 + $0x150] sm:$0xff] %v781_v18 }
 0x12f   :  { %814 = vst [vmem:[#allocation3 + $0x58] sm:$0xff] %v750_v21  ;;  %846 = vst [vmem:[#allocation3 + $0x158] sm:$0xff] %v782_v22  ;;  %v377_v23 = vpop.f32.mrb[12].mxu0  ;;  %v473_v24 = vpop.f32.mrb[12].mxu1 }
 0x130   :  { %v751_v25 = vadd.f32 %v1416_v37, %v377_v23  ;;  %v783_v26 = vadd.f32 %v1416_v37, %v473_v24  ;;  %v379_v27 = vpop.f32.mrb[13].mxu0  ;;  %v475_v28 = vpop.f32.mrb[13].mxu1 }
 0x131   :  { %v752_v29 = vadd.f32 %v1418_v38, %v379_v27  ;;  %v784_v30 = vadd.f32 %v1418_v38, %v475_v28 }
 0x132   :  { %815 = vst [vmem:[#allocation3 + $0x60] sm:$0xff] %v751_v25  ;;  %847 = vst [vmem:[#allocation3 + $0x160] sm:$0xff] %v783_v26 }
 0x133   :  { %816 = vst [vmem:[#allocation3 + $0x68] sm:$0xff] %v752_v29  ;;  %848 = vst [vmem:[#allocation3 + $0x168] sm:$0xff] %v784_v30  ;;  %v383_v31 = vpop.f32.mrb[14].mxu0  ;;  %v479_v32 = vpop.f32.mrb[14].mxu1 }
 0x134   :  { %v753_v33 = vadd.f32 %v1416_v37, %v383_v31  ;;  %v785_v34 = vadd.f32 %v1416_v37, %v479_v32  ;;  %v385_v35 = vpop.f32.mrb[15].mxu0  ;;  %v481_v36 = vpop.f32.mrb[15].mxu1 }
 0x135   :  { %v754_v39 = vadd.f32 %v1418_v38, %v385_v35  ;;  %v786_v40 = vadd.f32 %v1418_v38, %v481_v36 }
 0x136   :  { %817 = vst [vmem:[#allocation3 + $0x70] sm:$0xff] %v753_v33  ;;  %849 = vst [vmem:[#allocation3 + $0x170] sm:$0xff] %v785_v34 }
 0x137   :  { %818 = vst [vmem:[#allocation3 + $0x78] sm:$0xff] %v754_v39  ;;  %850 = vst [vmem:[#allocation3 + $0x178] sm:$0xff] %v786_v40  ;;  %v389_v41 = vpop.f32.mrb[16].mxu0  ;;  %v485_v42 = vpop.f32.mrb[16].mxu1 }
 0x138   :  { %v755_v43 = vadd.f32 %v1416_v37, %v389_v41  ;;  %v787_v44 = vadd.f32 %v1416_v37, %v485_v42  ;;  %v391_v45 = vpop.f32.mrb[17].mxu0  ;;  %v487_v46 = vpop.f32.mrb[17].mxu1 }
 0x139   :  { %v756_v47 = vadd.f32 %v1418_v38, %v391_v45  ;;  %v788_v48 = vadd.f32 %v1418_v38, %v487_v46 }
 0x13a   :  { %819 = vst [vmem:[#allocation3 + $0x80] sm:$0xff] %v755_v43  ;;  %851 = vst [vmem:[#allocation3 + $0x180] sm:$0xff] %v787_v44 }
 0x13b   :  { %820 = vst [vmem:[#allocation3 + $0x88] sm:$0xff] %v756_v47  ;;  %852 = vst [vmem:[#allocation3 + $0x188] sm:$0xff] %v788_v48  ;;  %v395_v49 = vpop.f32.mrb[18].mxu0  ;;  %v491_v50 = vpop.f32.mrb[18].mxu1 }
 0x13c   :  { %v757_v51 = vadd.f32 %v1416_v37, %v395_v49  ;;  %v789_v52 = vadd.f32 %v1416_v37, %v491_v50  ;;  %v397_v53 = vpop.f32.mrb[19].mxu0  ;;  %v493_v54 = vpop.f32.mrb[19].mxu1 }
 0x13d   :  { %v758_v55 = vadd.f32 %v1418_v38, %v397_v53  ;;  %v790_v56 = vadd.f32 %v1418_v38, %v493_v54 }
 0x13e   :  { %821 = vst [vmem:[#allocation3 + $0x90] sm:$0xff] %v757_v51  ;;  %853 = vst [vmem:[#allocation3 + $0x190] sm:$0xff] %v789_v52 }
 0x13f   :  { %822 = vst [vmem:[#allocation3 + $0x98] sm:$0xff] %v758_v55  ;;  %854 = vst [vmem:[#allocation3 + $0x198] sm:$0xff] %v790_v56  ;;  %v401_v57 = vpop.f32.mrb[20].mxu0  ;;  %v497_v58 = vpop.f32.mrb[20].mxu1 }
 0x140   :  { %v759_v59 = vadd.f32 %v1416_v37, %v401_v57  ;;  %v791_v60 = vadd.f32 %v1416_v37, %v497_v58  ;;  %v403_v61 = vpop.f32.mrb[21].mxu0  ;;  %v499_v62 = vpop.f32.mrb[21].mxu1 }
 0x141   :  { %v760_v63 = vadd.f32 %v1418_v38, %v403_v61  ;;  %v792_v0 = vadd.f32 %v1418_v38, %v499_v62 }
 0x142   :  { %823 = vst [vmem:[#allocation3 + $0xa0] sm:$0xff] %v759_v59  ;;  %855 = vst [vmem:[#allocation3 + $0x1a0] sm:$0xff] %v791_v60 }
 0x143   :  { %824 = vst [vmem:[#allocation3 + $0xa8] sm:$0xff] %v760_v63  ;;  %856 = vst [vmem:[#allocation3 + $0x1a8] sm:$0xff] %v792_v0  ;;  %v407_v1 = vpop.f32.mrb[22].mxu0  ;;  %v503_v2 = vpop.f32.mrb[22].mxu1 }
 0x144   :  { %v761_v3 = vadd.f32 %v1416_v37, %v407_v1  ;;  %v793_v4 = vadd.f32 %v1416_v37, %v503_v2  ;;  %v409_v5 = vpop.f32.mrb[23].mxu0  ;;  %v505_v6 = vpop.f32.mrb[23].mxu1 }
 0x145   :  { %v762_v7 = vadd.f32 %v1418_v38, %v409_v5  ;;  %v794_v8 = vadd.f32 %v1418_v38, %v505_v6 }
 0x146   :  { %825 = vst [vmem:[#allocation3 + $0xb0] sm:$0xff] %v761_v3  ;;  %857 = vst [vmem:[#allocation3 + $0x1b0] sm:$0xff] %v793_v4 }
 0x147   :  { %826 = vst [vmem:[#allocation3 + $0xb8] sm:$0xff] %v762_v7  ;;  %858 = vst [vmem:[#allocation3 + $0x1b8] sm:$0xff] %v794_v8  ;;  %v413_v9 = vpop.f32.mrb[24].mxu0  ;;  %v509_v10 = vpop.f32.mrb[24].mxu1 }
 0x148   :  { %v763_v11 = vadd.f32 %v1416_v37, %v413_v9  ;;  %v795_v12 = vadd.f32 %v1416_v37, %v509_v10  ;;  %v415_v13 = vpop.f32.mrb[25].mxu0  ;;  %v511_v14 = vpop.f32.mrb[25].mxu1 }
 0x149   :  { %v764_v15 = vadd.f32 %v1418_v38, %v415_v13  ;;  %v796_v16 = vadd.f32 %v1418_v38, %v511_v14 }
 0x14a   :  { %827 = vst [vmem:[#allocation3 + $0xc0] sm:$0xff] %v763_v11  ;;  %859 = vst [vmem:[#allocation3 + $0x1c0] sm:$0xff] %v795_v12 }
 0x14b   :  { %828 = vst [vmem:[#allocation3 + $0xc8] sm:$0xff] %v764_v15  ;;  %860 = vst [vmem:[#allocation3 + $0x1c8] sm:$0xff] %v796_v16  ;;  %v419_v17 = vpop.f32.mrb[26].mxu0  ;;  %v515_v18 = vpop.f32.mrb[26].mxu1 }
 0x14c   :  { %v765_v19 = vadd.f32 %v1416_v37, %v419_v17  ;;  %v797_v20 = vadd.f32 %v1416_v37, %v515_v18  ;;  %v421_v21 = vpop.f32.mrb[27].mxu0  ;;  %v517_v22 = vpop.f32.mrb[27].mxu1 }
 0x14d   :  { %v766_v23 = vadd.f32 %v1418_v38, %v421_v21  ;;  %v798_v24 = vadd.f32 %v1418_v38, %v517_v22 }
 0x14e   :  { %829 = vst [vmem:[#allocation3 + $0xd0] sm:$0xff] %v765_v19  ;;  %861 = vst [vmem:[#allocation3 + $0x1d0] sm:$0xff] %v797_v20 }
 0x14f   :  { %830 = vst [vmem:[#allocation3 + $0xd8] sm:$0xff] %v766_v23  ;;  %862 = vst [vmem:[#allocation3 + $0x1d8] sm:$0xff] %v798_v24  ;;  %v425_v25 = vpop.f32.mrb[28].mxu0  ;;  %v521_v26 = vpop.f32.mrb[28].mxu1 }
 0x150   :  { %v767_v27 = vadd.f32 %v1416_v37, %v425_v25  ;;  %v799_v28 = vadd.f32 %v1416_v37, %v521_v26  ;;  %v427_v29 = vpop.f32.mrb[29].mxu0  ;;  %v523_v30 = vpop.f32.mrb[29].mxu1 }
 0x151   :  { %v768_v31 = vadd.f32 %v1418_v38, %v427_v29  ;;  %v800_v32 = vadd.f32 %v1418_v38, %v523_v30 }
 0x152   :  { %831 = vst [vmem:[#allocation3 + $0xe0] sm:$0xff] %v767_v27  ;;  %863 = vst [vmem:[#allocation3 + $0x1e0] sm:$0xff] %v799_v28 }
 0x153   :  { %832 = vst [vmem:[#allocation3 + $0xe8] sm:$0xff] %v768_v31  ;;  %864 = vst [vmem:[#allocation3 + $0x1e8] sm:$0xff] %v800_v32  ;;  %v431_v33 = vpop.f32.mrb[30].mxu0  ;;  %v527_v34 = vpop.f32.mrb[30].mxu1 }
 0x154   :  { %v769_v35 = vadd.f32 %v1416_v37, %v431_v33  ;;  %v801_v36 = vadd.f32 %v1416_v37, %v527_v34  ;;  %v433_v39 = vpop.f32.mrb[31].mxu0  ;;  %v529_v40 = vpop.f32.mrb[31].mxu1 }
 0x155   :  { %v770_v41 = vadd.f32 %v1418_v38, %v433_v39  ;;  %v802_v42 = vadd.f32 %v1418_v38, %v529_v40 }
 0x156   :  { %833 = vst [vmem:[#allocation3 + $0xf0] sm:$0xff] %v769_v35  ;;  %865 = vst [vmem:[#allocation3 + $0x1f0] sm:$0xff] %v801_v36 }
 0x157   :  { %834 = vst [vmem:[#allocation3 + $0xf8] sm:$0xff] %v770_v41  ;;  %866 = vst [vmem:[#allocation3 + $0x1f8] sm:$0xff] %v802_v42 }
 0x158   :  { %993 = shalt.err (!%p990_p4)
}
 0x159   :  { %s994_s25 = scalar_lea.hbm %s1499_s3, 8192 }
 0x15a   :  { %p995_p5 = scmp.ne.s32.totalorder %s1499_s3, %s994_s25  ;;  %p998_p6 = scmp.lt.u32.totalorder %s994_s25, %s1499_s3 }
 0x15c   :  { %p1000_p7 = pnand %p998_p6, %p995_p5 }
 0x15e   :  { %1003 = shalt.err (!%p1000_p7)
}
 0x15f   :  { %s1007_s30 = smov 256   ;;  %s1008_s4 = smov 16  }
 0x160   :  { %878 = dma.vmem_to_hbm [thread:$0]  %s873_s2, 8192, %s1499_s3, [#allocation4], %s1007_s30, %s1007_s30, %s1008_s4  }
 0x161   :  { %1004 = dma.done.wait [#allocation4], 8192  }
 0x162   :  { %1005 = vsyncadd [#allocation4], 4294959104 }
 0x163   :  { %882 = vsyncpa [#allocation4], 1 }

// kernel: multi_head_attention.3
= control target key start
LH: loop header
LB: loop body
LE: loop exit
PB: predicated region body
PF: predicated region fallthrough
CT: control target
= control target key end

     0   :  { %s2355_s12 = smov 0   ;;  %s2357_s13 = smov 0   ;;  %s3331_s0 = inlined_call_operand.vmem [shape: f32[256,256], index: 0, kind: input, shape index: {}]   ;;  %s3332_s1 = inlined_call_operand.vmem [shape: f32[256,768], index: 1, kind: input, shape index: {}]   ;;  %s3333_s2 = inlined_call_operand.vmem [shape: f32[1,768], index: 2, kind: input, shape index: {}]   ;;  %s3334_s3 = inlined_call_operand.vmem [shape: f32[256,768], index: 3, kind: output, shape index: {}]  }
   0x1   :  { %s2359_s14 = smov 0   ;;  %s2361_s15 = smov 0  }
   0x2   :  { %s2363_s16 = smov 0  }
   0x3 LB: > { %s28_s17 = sadd.s32 1, %s2328_s15  ;;  %s2127_s18 = sadd.s32 4294967295, %s2332_s16   ;;  %s2332_s16 = sphi %s2363_s16, %s13_s16   ;;  %s2328_s15 = sphi %s2361_s15, %s3339_s15   ;;  %s2324_s14 = sphi %s2359_s14, %s3338_s14   ;;  %s2320_s13 = sphi %s2357_s13, %s3337_s13   ;;  %s2316_s12 = sphi %s2355_s12, %s3336_s12  }
   0x4   : > { %p30_p0 = scmp.ge.s32.totalorder %s28_s17, 2  ;;  %p76_p1 = scmp.ne.s32.totalorder %s2320_s13, %s2316_s12 }
   0x5   : > { %p77_p2 = scmp.eq.s32.totalorder %s2332_s16, 0  ;;  %p134_p4 = scmp.eq.s32.totalorder %s2127_s18, 1 }
   0x6   : > { %s3341_s17 = smov (%p30_p0, %s28_s17), 0  ;;  %s69_s20 = sadd.s32 1, %s2320_s13 }
   0x7   : > { %p78_p3 = por %p77_p2, %p76_p1  ;;  %s65_s19 = ssub.s32 %s2328_s15, %s3341_s17 }
   0x8   : > { %p67_p5 = scmp.eq.s32.totalorder %s65_s19, 0  ;;  %p2390_p6 = por %p134_p4, %p76_p1 }
   0x9   : > { %p2131_p7 = scmp.ge.s32.totalorder %s2332_s16, 2 }
   0xa   : > { %s2395_s22 = scalar_select %p67_p5, %s2320_s13, %s69_s20  }
   0xb   : > { %171 = sbr.rel (%p2131_p7) target bundleno = 71 (0x47), region = 20 }
  0x12   : > { %174 = sbr.rel (!%p78_p3) target bundleno = 71 (0x47), region = 24  ;;  %s176_s23 = sand.u32 (%p78_p3), 1, %s2320_s13  }
  0x13   : > { %s2137_s24 = smul.u32 (%p78_p3), 24, %s2328_s15 }
  0x14   : > { %s2251_s25 = smul.u32 (%p78_p3), 768, %s176_s23 }
  0x15   : > { %s2403_s28 = scalar_lea.vmem (%p78_p3), %s3332_s1, %s2137_s24 }
  0x16   : > { %v197_v0 = vld [vmem:[%s2403_s28] sm:$0xff] (%p78_p3)  ;;  %v199_v1 = vld [vmem:[%s2403_s28 + $0x8] sm:$0xff] (%p78_p3)  ;;  %v201_v2 = vld [vmem:[%s2403_s28 + $0x10] sm:$0xff] (%p78_p3)  ;;  %s2408_s29 = scalar_lea.vmem (%p78_p3), [#allocation3], %s2251_s25 }
  0x17   : > { %198 = vst [vmem:[%s2408_s29] sm:$0xff] (%p78_p3), %v197_v0  ;;  %200 = vst [vmem:[%s2408_s29 + $0x8] sm:$0xff] (%p78_p3), %v199_v1  ;;  %v203_v3 = vld [vmem:[%s2403_s28 + $0x30] sm:$0xff] (%p78_p3)  ;;  %v205_v4 = vld [vmem:[%s2403_s28 + $0x38] sm:$0xff] (%p78_p3) }
  0x18   : > { %202 = vst [vmem:[%s2408_s29 + $0x10] sm:$0xff] (%p78_p3), %v201_v2  ;;  %v207_v5 = vld [vmem:[%s2403_s28 + $0x40] sm:$0xff] (%p78_p3)  ;;  %204 = vst [vmem:[%s2408_s29 + $0x18] sm:$0xff] (%p78_p3), %v203_v3  ;;  %v211_v7 = vld [vmem:[%s2403_s28 + $0x68] sm:$0xff] (%p78_p3) }
  0x19   : > { %206 = vst [vmem:[%s2408_s29 + $0x20] sm:$0xff] %v205_v4  ;;  %208 = vst [vmem:[%s2408_s29 + $0x28] sm:$0xff] %v207_v5  ;;  %v209_v6 = vld [vmem:[%s2403_s28 + $0x60] sm:$0xff]  ;;  %v213_v8 = vld [vmem:[%s2403_s28 + $0x70] sm:$0xff] }
  0x1a   : > { %210 = vst [vmem:[%s2408_s29 + $0x30] sm:$0xff] %v209_v6  ;;  %212 = vst [vmem:[%s2408_s29 + $0x38] sm:$0xff] %v211_v7  ;;  %v215_v9 = vld [vmem:[%s2403_s28 + $0x90] sm:$0xff]  ;;  %v217_v10 = vld [vmem:[%s2403_s28 + $0x98] sm:$0xff] }
  0x1b   : > { %214 = vst [vmem:[%s2408_s29 + $0x40] sm:$0xff] %v213_v8  ;;  %v219_v11 = vld [vmem:[%s2403_s28 + $0xa0] sm:$0xff]  ;;  %216 = vst [vmem:[%s2408_s29 + $0x48] sm:$0xff] %v215_v9  ;;  %v223_v13 = vld [vmem:[%s2403_s28 + $0xc8] sm:$0xff] }
  0x1c   : > { %218 = vst [vmem:[%s2408_s29 + $0x50] sm:$0xff] %v217_v10  ;;  %220 = vst [vmem:[%s2408_s29 + $0x58] sm:$0xff] %v219_v11  ;;  %v221_v12 = vld [vmem:[%s2403_s28 + $0xc0] sm:$0xff]  ;;  %v225_v14 = vld [vmem:[%s2403_s28 + $0xd0] sm:$0xff] }
  0x1d   : > { %222 = vst [vmem:[%s2408_s29 + $0x60] sm:$0xff] %v221_v12  ;;  %224 = vst [vmem:[%s2408_s29 + $0x68] sm:$0xff] %v223_v13  ;;  %v227_v15 = vld [vmem:[%s2403_s28 + $0xf0] sm:$0xff]  ;;  %v229_v16 = vld [vmem:[%s2403_s28 + $0xf8] sm:$0xff] }
  0x1e   : > { %226 = vst [vmem:[%s2408_s29 + $0x70] sm:$0xff] %v225_v14  ;;  %v231_v17 = vld [vmem:[%s2403_s28 + $0x100] sm:$0xff]  ;;  %228 = vst [vmem:[%s2408_s29 + $0x78] sm:$0xff] %v227_v15  ;;  %v235_v19 = vld [vmem:[%s2403_s28 + $0x128] sm:$0xff] }
  0x1f   : > { %230 = vst [vmem:[%s2408_s29 + $0x80] sm:$0xff] %v229_v16  ;;  %232 = vst [vmem:[%s2408_s29 + $0x88] sm:$0xff] %v231_v17  ;;  %v233_v18 = vld [vmem:[%s2403_s28 + $0x120] sm:$0xff]  ;;  %v237_v20 = vld [vmem:[%s2403_s28 + $0x130] sm:$0xff] }
  0x20   : > { %234 = vst [vmem:[%s2408_s29 + $0x90] sm:$0xff] %v233_v18  ;;  %236 = vst [vmem:[%s2408_s29 + $0x98] sm:$0xff] %v235_v19  ;;  %v239_v21 = vld [vmem:[%s2403_s28 + $0x150] sm:$0xff]  ;;  %v241_v22 = vld [vmem:[%s2403_s28 + $0x158] sm:$0xff] }
  0x21   : > { %238 = vst [vmem:[%s2408_s29 + $0xa0] sm:$0xff] %v237_v20  ;;  %v243_v23 = vld [vmem:[%s2403_s28 + $0x160] sm:$0xff]  ;;  %240 = vst [vmem:[%s2408_s29 + $0xa8] sm:$0xff] %v239_v21  ;;  %v247_v25 = vld [vmem:[%s2403_s28 + $0x188] sm:$0xff] }
  0x22   : > { %242 = vst [vmem:[%s2408_s29 + $0xb0] sm:$0xff] %v241_v22  ;;  %244 = vst [vmem:[%s2408_s29 + $0xb8] sm:$0xff] %v243_v23  ;;  %v245_v24 = vld [vmem:[%s2403_s28 + $0x180] sm:$0xff]  ;;  %v249_v26 = vld [vmem:[%s2403_s28 + $0x190] sm:$0xff] }
  0x23   : > { %246 = vst [vmem:[%s2408_s29 + $0xc0] sm:$0xff] %v245_v24  ;;  %248 = vst [vmem:[%s2408_s29 + $0xc8] sm:$0xff] %v247_v25  ;;  %v251_v27 = vld [vmem:[%s2403_s28 + $0x1b0] sm:$0xff]  ;;  %v253_v28 = vld [vmem:[%s2403_s28 + $0x1b8] sm:$0xff] }
  0x24   : > { %250 = vst [vmem:[%s2408_s29 + $0xd0] sm:$0xff] %v249_v26  ;;  %v255_v29 = vld [vmem:[%s2403_s28 + $0x1c0] sm:$0xff]  ;;  %252 = vst [vmem:[%s2408_s29 + $0xd8] sm:$0xff] %v251_v27  ;;  %v259_v31 = vld [vmem:[%s2403_s28 + $0x1e8] sm:$0xff] }
  0x25   : > { %254 = vst [vmem:[%s2408_s29 + $0xe0] sm:$0xff] %v253_v28  ;;  %256 = vst [vmem:[%s2408_s29 + $0xe8] sm:$0xff] %v255_v29  ;;  %v257_v30 = vld [vmem:[%s2403_s28 + $0x1e0] sm:$0xff]  ;;  %v261_v32 = vld [vmem:[%s2403_s28 + $0x1f0] sm:$0xff] }
  0x26   : > { %258 = vst [vmem:[%s2408_s29 + $0xf0] sm:$0xff] %v257_v30  ;;  %260 = vst [vmem:[%s2408_s29 + $0xf8] sm:$0xff] %v259_v31  ;;  %v263_v33 = vld [vmem:[%s2403_s28 + $0x210] sm:$0xff]  ;;  %v265_v34 = vld [vmem:[%s2403_s28 + $0x218] sm:$0xff] }
  0x27   : > { %262 = vst [vmem:[%s2408_s29 + $0x100] sm:$0xff] %v261_v32  ;;  %v267_v35 = vld [vmem:[%s2403_s28 + $0x220] sm:$0xff]  ;;  %264 = vst [vmem:[%s2408_s29 + $0x108] sm:$0xff] %v263_v33  ;;  %v271_v37 = vld [vmem:[%s2403_s28 + $0x248] sm:$0xff] }
  0x28   : > { %266 = vst [vmem:[%s2408_s29 + $0x110] sm:$0xff] %v265_v34  ;;  %268 = vst [vmem:[%s2408_s29 + $0x118] sm:$0xff] %v267_v35  ;;  %v269_v36 = vld [vmem:[%s2403_s28 + $0x240] sm:$0xff]  ;;  %v273_v38 = vld [vmem:[%s2403_s28 + $0x250] sm:$0xff] }
  0x29   : > { %270 = vst [vmem:[%s2408_s29 + $0x120] sm:$0xff] %v269_v36  ;;  %272 = vst [vmem:[%s2408_s29 + $0x128] sm:$0xff] %v271_v37  ;;  %v275_v39 = vld [vmem:[%s2403_s28 + $0x270] sm:$0xff]  ;;  %v277_v40 = vld [vmem:[%s2403_s28 + $0x278] sm:$0xff] }
  0x2a   : > { %274 = vst [vmem:[%s2408_s29 + $0x130] sm:$0xff] %v273_v38  ;;  %v279_v41 = vld [vmem:[%s2403_s28 + $0x280] sm:$0xff]  ;;  %276 = vst [vmem:[%s2408_s29 + $0x138] sm:$0xff] %v275_v39  ;;  %v283_v43 = vld [vmem:[%s2403_s28 + $0x2a8] sm:$0xff] }
  0x2b   : > { %278 = vst [vmem:[%s2408_s29 + $0x140] sm:$0xff] %v277_v40  ;;  %280 = vst [vmem:[%s2408_s29 + $0x148] sm:$0xff] %v279_v41  ;;  %v281_v42 = vld [vmem:[%s2403_s28 + $0x2a0] sm:$0xff]  ;;  %v285_v44 = vld [vmem:[%s2403_s28 + $0x2b0] sm:$0xff] }
  0x2c   : > { %282 = vst [vmem:[%s2408_s29 + $0x150] sm:$0xff] %v281_v42  ;;  %284 = vst [vmem:[%s2408_s29 + $0x158] sm:$0xff] %v283_v43  ;;  %v287_v45 = vld [vmem:[%s2403_s28 + $0x2d0] sm:$0xff]  ;;  %v289_v46 = vld [vmem:[%s2403_s28 + $0x2d8] sm:$0xff] }
  0x2d   : > { %286 = vst [vmem:[%s2408_s29 + $0x160] sm:$0xff] %v285_v44  ;;  %v291_v47 = vld [vmem:[%s2403_s28 + $0x2e0] sm:$0xff]  ;;  %288 = vst [vmem:[%s2408_s29 + $0x168] sm:$0xff] %v287_v45  ;;  %v295_v49 = vld [vmem:[%s2403_s28 + $0x308] sm:$0xff] }
  0x2e   : > { %290 = vst [vmem:[%s2408_s29 + $0x170] sm:$0xff] %v289_v46  ;;  %292 = vst [vmem:[%s2408_s29 + $0x178] sm:$0xff] %v291_v47  ;;  %v293_v48 = vld [vmem:[%s2403_s28 + $0x300] sm:$0xff]  ;;  %v297_v50 = vld [vmem:[%s2403_s28 + $0x310] sm:$0xff] }
  0x2f   : > { %294 = vst [vmem:[%s2408_s29 + $0x180] sm:$0xff] %v293_v48  ;;  %296 = vst [vmem:[%s2408_s29 + $0x188] sm:$0xff] %v295_v49  ;;  %v299_v51 = vld [vmem:[%s2403_s28 + $0x330] sm:$0xff]  ;;  %v301_v52 = vld [vmem:[%s2403_s28 + $0x338] sm:$0xff] }
  0x30   : > { %298 = vst [vmem:[%s2408_s29 + $0x190] sm:$0xff] %v297_v50  ;;  %v303_v53 = vld [vmem:[%s2403_s28 + $0x340] sm:$0xff]  ;;  %300 = vst [vmem:[%s2408_s29 + $0x198] sm:$0xff] %v299_v51  ;;  %v307_v55 = vld [vmem:[%s2403_s28 + $0x368] sm:$0xff] }
  0x31   : > { %302 = vst [vmem:[%s2408_s29 + $0x1a0] sm:$0xff] %v301_v52  ;;  %304 = vst [vmem:[%s2408_s29 + $0x1a8] sm:$0xff] %v303_v53  ;;  %v305_v54 = vld [vmem:[%s2403_s28 + $0x360] sm:$0xff]  ;;  %v309_v56 = vld [vmem:[%s2403_s28 + $0x370] sm:$0xff] }
  0x32   : > { %306 = vst [vmem:[%s2408_s29 + $0x1b0] sm:$0xff] %v305_v54  ;;  %308 = vst [vmem:[%s2408_s29 + $0x1b8] sm:$0xff] %v307_v55  ;;  %v311_v57 = vld [vmem:[%s2403_s28 + $0x390] sm:$0xff]  ;;  %v313_v58 = vld [vmem:[%s2403_s28 + $0x398] sm:$0xff] }
  0x33   : > { %310 = vst [vmem:[%s2408_s29 + $0x1c0] sm:$0xff] %v309_v56  ;;  %v315_v59 = vld [vmem:[%s2403_s28 + $0x3a0] sm:$0xff]  ;;  %312 = vst [vmem:[%s2408_s29 + $0x1c8] sm:$0xff] %v311_v57  ;;  %v319_v61 = vld [vmem:[%s2403_s28 + $0x3c8] sm:$0xff] }
  0x34   : > { %314 = vst [vmem:[%s2408_s29 + $0x1d0] sm:$0xff] %v313_v58  ;;  %316 = vst [vmem:[%s2408_s29 + $0x1d8] sm:$0xff] %v315_v59  ;;  %v317_v60 = vld [vmem:[%s2403_s28 + $0x3c0] sm:$0xff]  ;;  %v321_v62 = vld [vmem:[%s2403_s28 + $0x3d0] sm:$0xff] }
  0x35   : > { %318 = vst [vmem:[%s2408_s29 + $0x1e0] sm:$0xff] %v317_v60  ;;  %320 = vst [vmem:[%s2408_s29 + $0x1e8] sm:$0xff] %v319_v61  ;;  %v323_v63 = vld [vmem:[%s2403_s28 + $0x3f0] sm:$0xff]  ;;  %v325_v0 = vld [vmem:[%s2403_s28 + $0x3f8] sm:$0xff] }
  0x36   : > { %322 = vst [vmem:[%s2408_s29 + $0x1f0] sm:$0xff] %v321_v62  ;;  %v327_v1 = vld [vmem:[%s2403_s28 + $0x400] sm:$0xff]  ;;  %324 = vst [vmem:[%s2408_s29 + $0x1f8] sm:$0xff] %v323_v63  ;;  %v331_v3 = vld [vmem:[%s2403_s28 + $0x428] sm:$0xff] }
  0x37   : > { %326 = vst [vmem:[%s2408_s29 + $0x200] sm:$0xff] %v325_v0  ;;  %328 = vst [vmem:[%s2408_s29 + $0x208] sm:$0xff] %v327_v1  ;;  %v329_v2 = vld [vmem:[%s2403_s28 + $0x420] sm:$0xff]  ;;  %v333_v4 = vld [vmem:[%s2403_s28 + $0x430] sm:$0xff] }
  0x38   : > { %330 = vst [vmem:[%s2408_s29 + $0x210] sm:$0xff] %v329_v2  ;;  %332 = vst [vmem:[%s2408_s29 + $0x218] sm:$0xff] %v331_v3  ;;  %v335_v5 = vld [vmem:[%s2403_s28 + $0x450] sm:$0xff]  ;;  %v337_v6 = vld [vmem:[%s2403_s28 + $0x458] sm:$0xff] }
  0x39   : > { %334 = vst [vmem:[%s2408_s29 + $0x220] sm:$0xff] %v333_v4  ;;  %v339_v7 = vld [vmem:[%s2403_s28 + $0x460] sm:$0xff]  ;;  %336 = vst [vmem:[%s2408_s29 + $0x228] sm:$0xff] %v335_v5  ;;  %v343_v9 = vld [vmem:[%s2403_s28 + $0x488] sm:$0xff] }
  0x3a   : > { %338 = vst [vmem:[%s2408_s29 + $0x230] sm:$0xff] %v337_v6  ;;  %340 = vst [vmem:[%s2408_s29 + $0x238] sm:$0xff] %v339_v7  ;;  %v341_v8 = vld [vmem:[%s2403_s28 + $0x480] sm:$0xff]  ;;  %v345_v10 = vld [vmem:[%s2403_s28 + $0x490] sm:$0xff] }
  0x3b   : > { %342 = vst [vmem:[%s2408_s29 + $0x240] sm:$0xff] %v341_v8  ;;  %344 = vst [vmem:[%s2408_s29 + $0x248] sm:$0xff] %v343_v9  ;;  %v347_v11 = vld [vmem:[%s2403_s28 + $0x4b0] sm:$0xff]  ;;  %v349_v12 = vld [vmem:[%s2403_s28 + $0x4b8] sm:$0xff] }
  0x3c   : > { %346 = vst [vmem:[%s2408_s29 + $0x250] sm:$0xff] %v345_v10  ;;  %v351_v13 = vld [vmem:[%s2403_s28 + $0x4c0] sm:$0xff]  ;;  %348 = vst [vmem:[%s2408_s29 + $0x258] sm:$0xff] %v347_v11  ;;  %v355_v15 = vld [vmem:[%s2403_s28 + $0x4e8] sm:$0xff] }
  0x3d   : > { %350 = vst [vmem:[%s2408_s29 + $0x260] sm:$0xff] %v349_v12  ;;  %352 = vst [vmem:[%s2408_s29 + $0x268] sm:$0xff] %v351_v13  ;;  %v353_v14 = vld [vmem:[%s2403_s28 + $0x4e0] sm:$0xff]  ;;  %v357_v16 = vld [vmem:[%s2403_s28 + $0x4f0] sm:$0xff] }
  0x3e   : > { %354 = vst [vmem:[%s2408_s29 + $0x270] sm:$0xff] %v353_v14  ;;  %356 = vst [vmem:[%s2408_s29 + $0x278] sm:$0xff] %v355_v15  ;;  %v359_v17 = vld [vmem:[%s2403_s28 + $0x510] sm:$0xff]  ;;  %v361_v18 = vld [vmem:[%s2403_s28 + $0x518] sm:$0xff] }
  0x3f   : > { %358 = vst [vmem:[%s2408_s29 + $0x280] sm:$0xff] %v357_v16  ;;  %v363_v19 = vld [vmem:[%s2403_s28 + $0x520] sm:$0xff]  ;;  %360 = vst [vmem:[%s2408_s29 + $0x288] sm:$0xff] %v359_v17  ;;  %v367_v21 = vld [vmem:[%s2403_s28 + $0x548] sm:$0xff] }
  0x40   : > { %362 = vst [vmem:[%s2408_s29 + $0x290] sm:$0xff] %v361_v18  ;;  %364 = vst [vmem:[%s2408_s29 + $0x298] sm:$0xff] %v363_v19  ;;  %v365_v20 = vld [vmem:[%s2403_s28 + $0x540] sm:$0xff]  ;;  %v369_v22 = vld [vmem:[%s2403_s28 + $0x550] sm:$0xff] }
  0x41   : > { %366 = vst [vmem:[%s2408_s29 + $0x2a0] sm:$0xff] %v365_v20  ;;  %368 = vst [vmem:[%s2408_s29 + $0x2a8] sm:$0xff] %v367_v21  ;;  %v371_v23 = vld [vmem:[%s2403_s28 + $0x570] sm:$0xff]  ;;  %v373_v24 = vld [vmem:[%s2403_s28 + $0x578] sm:$0xff] }
  0x42   : > { %370 = vst [vmem:[%s2408_s29 + $0x2b0] sm:$0xff] %v369_v22  ;;  %v375_v25 = vld [vmem:[%s2403_s28 + $0x580] sm:$0xff]  ;;  %372 = vst [vmem:[%s2408_s29 + $0x2b8] sm:$0xff] %v371_v23  ;;  %v379_v27 = vld [vmem:[%s2403_s28 + $0x5a8] sm:$0xff] }
  0x43   : > { %374 = vst [vmem:[%s2408_s29 + $0x2c0] sm:$0xff] %v373_v24  ;;  %376 = vst [vmem:[%s2408_s29 + $0x2c8] sm:$0xff] %v375_v25  ;;  %v377_v26 = vld [vmem:[%s2403_s28 + $0x5a0] sm:$0xff]  ;;  %v381_v28 = vld [vmem:[%s2403_s28 + $0x5b0] sm:$0xff] }
  0x44   : > { %378 = vst [vmem:[%s2408_s29 + $0x2d0] sm:$0xff] %v377_v26  ;;  %380 = vst [vmem:[%s2408_s29 + $0x2d8] sm:$0xff] %v379_v27  ;;  %v383_v29 = vld [vmem:[%s2403_s28 + $0x5d0] sm:$0xff]  ;;  %v385_v30 = vld [vmem:[%s2403_s28 + $0x5d8] sm:$0xff] }
  0x45   : > { %382 = vst [vmem:[%s2408_s29 + $0x2e0] sm:$0xff] %v381_v28  ;;  %v387_v31 = vld [vmem:[%s2403_s28 + $0x5e0] sm:$0xff]  ;;  %384 = vst [vmem:[%s2408_s29 + $0x2e8] sm:$0xff] %v383_v29 }
  0x46   : > { %386 = vst [vmem:[%s2408_s29 + $0x2f0] sm:$0xff] %v385_v30  ;;  %388 = vst [vmem:[%s2408_s29 + $0x2f8] sm:$0xff] %v387_v31 }
  0x47 PF: > { %p2133_p8 = scmp.ge.s32.totalorder %s2332_s16, 1  ;;  %p401_p9 = scmp.lt.s32.totalorder %s2332_s16, 3 }
  0x49   : > { %p402_p10 = pnand %p2133_p8, %p401_p9 }
  0x4a   : > { %s408_s30 = sand.u32 (!%p402_p10), 1, %s2316_s12   ;;  %v662_v32 = vld [vmem:[%s3331_s0 + $0x8] sm:$0xff] (!%p402_p10)  ;;  %v2334_v33 = vmov (!%p402_p10), 0.0|0.0   ;;  %s458_s27 = smul.u32 (!%p402_p10), 3, %s2324_s14 }
  0x4b   : > { %405 = sbr.rel (%p402_p10) target bundleno = 514 (0x202), region = 51  ;;  %2203 = vmatprep.subr.bf16.mxu1 (!%p402_p10), %v2334_v33  ;;  %885 = vmatprep.mubr.f32.mxu0 (!%p402_p10), %v662_v32 }
  0x4c   : > { %s2605_s6 = smul.u32 (!%p402_p10), 768, %s408_s30  ;;  %1142 = vmatprep.mubr.f32.mxu1 (!%p402_p10), %v662_v32  ;;  %p459_p11 = scmp.lt.s32.totalorder (!%p402_p10), %s458_s27, 5 }
  0x4e   : > { %s2609_s7 = scalar_lea.vmem (!%p402_p10), [#allocation3], %s2605_s6  ;;  %s2925_s4 = scalar_lea.vmem (!%p402_p10), [#allocation4], %s2605_s6 }
  0x4f   : > { %v726_v34 = vld [vmem:[%s2609_s7 + $0x8] sm:$0xff] (!%p402_p10)  ;;  %v729_v35 = vld [vmem:[%s2609_s7 + $0x20] sm:$0xff] (!%p402_p10)  ;;  %v728_v38 = vld [vmem:[%s2609_s7 + $0x18] sm:$0xff] (!%p402_p10) }
  0x50   : > { %v725_v36 = vld [vmem:[%s2609_s7] sm:$0xff] (!%p402_p10)  ;;  %v2139_v37 = vpack.c.bf16 (!%p402_p10), %v729_v35, %v726_v34  ;;  %v727_v39 = vld [vmem:[%s2609_s7 + $0x10] sm:$0xff] (!%p402_p10)  ;;  %v730_v40 = vld [vmem:[%s2609_s7 + $0x28] sm:$0xff] (!%p402_p10) }
  0x51   : > { %v2141_v41 = vpack.c.bf16 (!%p402_p10), %v728_v38, %v725_v36  ;;  %v2204_v42 = vpack.c.bf16 (!%p402_p10), %v730_v40, %v727_v39  ;;  %v732_v43 = vld [vmem:[%s2609_s7 + $0x38] sm:$0xff] (!%p402_p10)  ;;  %v735_v44 = vld [vmem:[%s2609_s7 + $0x50] sm:$0xff] (!%p402_p10)  ;;  %v734_v47 = vld [vmem:[%s2609_s7 + $0x48] sm:$0xff] (!%p402_p10) }
  0x52   : > { %v731_v45 = vld [vmem:[%s2609_s7 + $0x30] sm:$0xff]  ;;  %2140 = vmatprep.subr.bf16.mxu0 %v2139_v37  ;;  %v2143_v46 = vpack.c.bf16 %v735_v44, %v732_v43  ;;  %v733_v48 = vld [vmem:[%s2609_s7 + $0x40] sm:$0xff]  ;;  %v736_v49 = vld [vmem:[%s2609_s7 + $0x58] sm:$0xff]  ;;  %s3343_s27 = smov (!%p459_p11, %s458_s27), 5  ;;  %s2138_s6 = smul.u32 (%p2390_p6), 24, %s2324_s14 }
  0x53   : > { %2142 = vmatpush1.bf16.msra.mxu0 %v2141_v41  ;;  %2205 = vmatpush1.bf16.msra.mxu1 %v2204_v42  ;;  %v2145_v50 = vpack.c.bf16 %v734_v47, %v731_v45  ;;  %v2207_v51 = vpack.c.bf16 %v736_v49, %v733_v48  ;;  %v738_v52 = vld [vmem:[%s2609_s7 + $0x68] sm:$0xff]  ;;  %v741_v53 = vld [vmem:[%s2609_s7 + $0x80] sm:$0xff]  ;;  %v740_v56 = vld [vmem:[%s2609_s7 + $0x78] sm:$0xff]  ;;  %s461_s30 = scalar_lea.vmem %s3333_s2, %s3343_s27 }
  0x54   : > { %v737_v54 = vld [vmem:[%s2609_s7 + $0x60] sm:$0xff]  ;;  %2144 = vmatprep.subr.bf16.mxu0 %v2143_v46  ;;  %2206 = vmatprep.subr.bf16.mxu1 %v2334_v33  ;;  %v2147_v55 = vpack.c.bf16 %v741_v53, %v738_v52  ;;  %v739_v57 = vld [vmem:[%s2609_s7 + $0x70] sm:$0xff]  ;;  %v742_v58 = vld [vmem:[%s2609_s7 + $0x88] sm:$0xff] }
  0x55   : > { %v744_v59 = vld [vmem:[%s2609_s7 + $0x98] sm:$0xff]  ;;  %v747_v60 = vld [vmem:[%s2609_s7 + $0xb0] sm:$0xff]  ;;  %v2149_v61 = vpack.c.bf16 %v740_v56, %v737_v54  ;;  %v2210_v62 = vpack.c.bf16 %v742_v58, %v739_v57  ;;  %v746_v1 = vld [vmem:[%s2609_s7 + $0xa8] sm:$0xff] }
  0x56   : > { %v743_v63 = vld [vmem:[%s2609_s7 + $0x90] sm:$0xff]  ;;  %v2151_v0 = vpack.c.bf16 %v747_v60, %v744_v59  ;;  %v745_v2 = vld [vmem:[%s2609_s7 + $0xa0] sm:$0xff]  ;;  %v748_v3 = vld [vmem:[%s2609_s7 + $0xb8] sm:$0xff] }
  0x57   : > { %2146 = vmatpush1.bf16.msra.mxu0 %v2145_v50  ;;  %2208 = vmatpush1.bf16.msra.mxu1 %v2207_v51  ;;  %v750_v4 = vld [vmem:[%s2609_s7 + $0xc8] sm:$0xff]  ;;  %v753_v5 = vld [vmem:[%s2609_s7 + $0xe0] sm:$0xff]  ;;  %v2153_v6 = vpack.c.bf16 %v746_v1, %v743_v63  ;;  %v2213_v7 = vpack.c.bf16 %v748_v3, %v745_v2  ;;  %v752_v10 = vld [vmem:[%s2609_s7 + $0xd8] sm:$0xff] }
  0x58   : > { %2148 = vmatprep.subr.bf16.mxu0 %v2147_v55  ;;  %2209 = vmatprep.subr.bf16.mxu1 %v2334_v33  ;;  %v749_v8 = vld [vmem:[%s2609_s7 + $0xc0] sm:$0xff]  ;;  %v2155_v9 = vpack.c.bf16 %v753_v5, %v750_v4  ;;  %v751_v11 = vld [vmem:[%s2609_s7 + $0xd0] sm:$0xff]  ;;  %v754_v12 = vld [vmem:[%s2609_s7 + $0xe8] sm:$0xff] }
  0x59   : > { %v756_v13 = vld [vmem:[%s2609_s7 + $0xf8] sm:$0xff]  ;;  %v759_v14 = vld [vmem:[%s2609_s7 + $0x110] sm:$0xff]  ;;  %v2157_v15 = vpack.c.bf16 %v752_v10, %v749_v8  ;;  %v2216_v16 = vpack.c.bf16 %v754_v12, %v751_v11  ;;  %v758_v19 = vld [vmem:[%s2609_s7 + $0x108] sm:$0xff] }
  0x5a   : > { %v755_v17 = vld [vmem:[%s2609_s7 + $0xf0] sm:$0xff]  ;;  %v2159_v18 = vpack.c.bf16 %v759_v14, %v756_v13  ;;  %v757_v20 = vld [vmem:[%s2609_s7 + $0x100] sm:$0xff]  ;;  %v760_v21 = vld [vmem:[%s2609_s7 + $0x118] sm:$0xff] }
  0x5b   : > { %2150 = vmatpush1.bf16.msra.mxu0 %v2149_v61  ;;  %2211 = vmatpush1.bf16.msra.mxu1 %v2210_v62  ;;  %v762_v22 = vld [vmem:[%s2609_s7 + $0x128] sm:$0xff]  ;;  %v765_v23 = vld [vmem:[%s2609_s7 + $0x140] sm:$0xff]  ;;  %v2161_v24 = vpack.c.bf16 %v758_v19, %v755_v17  ;;  %v2219_v25 = vpack.c.bf16 %v760_v21, %v757_v20  ;;  %v764_v28 = vld [vmem:[%s2609_s7 + $0x138] sm:$0xff] }
  0x5c   : > { %2152 = vmatprep.subr.bf16.mxu0 %v2151_v0  ;;  %2212 = vmatprep.subr.bf16.mxu1 %v2334_v33  ;;  %v761_v26 = vld [vmem:[%s2609_s7 + $0x120] sm:$0xff]  ;;  %v2163_v27 = vpack.c.bf16 %v765_v23, %v762_v22  ;;  %v763_v29 = vld [vmem:[%s2609_s7 + $0x130] sm:$0xff]  ;;  %v766_v30 = vld [vmem:[%s2609_s7 + $0x148] sm:$0xff] }
  0x5d   : > { %v768_v31 = vld [vmem:[%s2609_s7 + $0x158] sm:$0xff]  ;;  %v771_v32 = vld [vmem:[%s2609_s7 + $0x170] sm:$0xff]  ;;  %v2165_v34 = vpack.c.bf16 %v764_v28, %v761_v26  ;;  %v2222_v35 = vpack.c.bf16 %v766_v30, %v763_v29  ;;  %v770_v38 = vld [vmem:[%s2609_s7 + $0x168] sm:$0xff] }
  0x5e   : > { %v767_v36 = vld [vmem:[%s2609_s7 + $0x150] sm:$0xff]  ;;  %v2167_v37 = vpack.c.bf16 %v771_v32, %v768_v31  ;;  %v769_v39 = vld [vmem:[%s2609_s7 + $0x160] sm:$0xff]  ;;  %v772_v40 = vld [vmem:[%s2609_s7 + $0x178] sm:$0xff] }
  0x5f   : > { %2154 = vmatpush1.bf16.msra.mxu0 %v2153_v6  ;;  %2214 = vmatpush1.bf16.msra.mxu1 %v2213_v7  ;;  %v774_v41 = vld [vmem:[%s2609_s7 + $0x188] sm:$0xff]  ;;  %v777_v42 = vld [vmem:[%s2609_s7 + $0x1a0] sm:$0xff]  ;;  %v2169_v43 = vpack.c.bf16 %v770_v38, %v767_v36  ;;  %v2225_v44 = vpack.c.bf16 %v772_v40, %v769_v39  ;;  %v776_v47 = vld [vmem:[%s2609_s7 + $0x198] sm:$0xff] }
  0x60   : > { %2156 = vmatprep.subr.bf16.mxu0 %v2155_v9  ;;  %2215 = vmatprep.subr.bf16.mxu1 %v2334_v33  ;;  %v773_v45 = vld [vmem:[%s2609_s7 + $0x180] sm:$0xff]  ;;  %v2171_v46 = vpack.c.bf16 %v777_v42, %v774_v41  ;;  %v775_v48 = vld [vmem:[%s2609_s7 + $0x190] sm:$0xff]  ;;  %v778_v49 = vld [vmem:[%s2609_s7 + $0x1a8] sm:$0xff] }
  0x61   : > { %v780_v50 = vld [vmem:[%s2609_s7 + $0x1b8] sm:$0xff]  ;;  %v783_v51 = vld [vmem:[%s2609_s7 + $0x1d0] sm:$0xff]  ;;  %v2173_v52 = vpack.c.bf16 %v776_v47, %v773_v45  ;;  %v2228_v53 = vpack.c.bf16 %v778_v49, %v775_v48  ;;  %v782_v56 = vld [vmem:[%s2609_s7 + $0x1c8] sm:$0xff] }
  0x62   : > { %v779_v54 = vld [vmem:[%s2609_s7 + $0x1b0] sm:$0xff]  ;;  %v2175_v55 = vpack.c.bf16 %v783_v51, %v780_v50  ;;  %v781_v57 = vld [vmem:[%s2609_s7 + $0x1c0] sm:$0xff]  ;;  %v784_v58 = vld [vmem:[%s2609_s7 + $0x1d8] sm:$0xff] }
  0x63   : > { %2158 = vmatpush1.bf16.msra.mxu0 %v2157_v15  ;;  %2217 = vmatpush1.bf16.msra.mxu1 %v2216_v16  ;;  %v786_v59 = vld [vmem:[%s2609_s7 + $0x1e8] sm:$0xff]  ;;  %v789_v60 = vld [vmem:[%s2609_s7 + $0x200] sm:$0xff]  ;;  %v2177_v61 = vpack.c.bf16 %v782_v56, %v779_v54  ;;  %v2231_v62 = vpack.c.bf16 %v784_v58, %v781_v57  ;;  %v788_v1 = vld [vmem:[%s2609_s7 + $0x1f8] sm:$0xff] }
  0x64   : > { %2160 = vmatprep.subr.bf16.mxu0 %v2159_v18  ;;  %2218 = vmatprep.subr.bf16.mxu1 %v2334_v33  ;;  %v785_v63 = vld [vmem:[%s2609_s7 + $0x1e0] sm:$0xff]  ;;  %v2179_v0 = vpack.c.bf16 %v789_v60, %v786_v59  ;;  %v787_v2 = vld [vmem:[%s2609_s7 + $0x1f0] sm:$0xff]  ;;  %v790_v3 = vld [vmem:[%s2609_s7 + $0x208] sm:$0xff] }
  0x65   : > { %v792_v4 = vld [vmem:[%s2609_s7 + $0x218] sm:$0xff]  ;;  %v795_v5 = vld [vmem:[%s2609_s7 + $0x230] sm:$0xff]  ;;  %v2181_v6 = vpack.c.bf16 %v788_v1, %v785_v63  ;;  %v2234_v7 = vpack.c.bf16 %v790_v3, %v787_v2  ;;  %v794_v10 = vld [vmem:[%s2609_s7 + $0x228] sm:$0xff] }
  0x66   : > { %v791_v8 = vld [vmem:[%s2609_s7 + $0x210] sm:$0xff]  ;;  %v2183_v9 = vpack.c.bf16 %v795_v5, %v792_v4  ;;  %v793_v11 = vld [vmem:[%s2609_s7 + $0x220] sm:$0xff]  ;;  %v796_v12 = vld [vmem:[%s2609_s7 + $0x238] sm:$0xff] }
  0x67   : > { %2162 = vmatpush1.bf16.msra.mxu0 %v2161_v24  ;;  %2220 = vmatpush1.bf16.msra.mxu1 %v2219_v25  ;;  %v798_v13 = vld [vmem:[%s2609_s7 + $0x248] sm:$0xff]  ;;  %v801_v14 = vld [vmem:[%s2609_s7 + $0x260] sm:$0xff]  ;;  %v2185_v15 = vpack.c.bf16 %v794_v10, %v791_v8  ;;  %v2237_v16 = vpack.c.bf16 %v796_v12, %v793_v11  ;;  %v800_v19 = vld [vmem:[%s2609_s7 + $0x258] sm:$0xff] }
  0x68   : > { %2164 = vmatprep.subr.bf16.mxu0 %v2163_v27  ;;  %2221 = vmatprep.subr.bf16.mxu1 %v2334_v33  ;;  %v797_v17 = vld [vmem:[%s2609_s7 + $0x240] sm:$0xff]  ;;  %v2187_v18 = vpack.c.bf16 %v801_v14, %v798_v13  ;;  %v799_v20 = vld [vmem:[%s2609_s7 + $0x250] sm:$0xff]  ;;  %v802_v21 = vld [vmem:[%s2609_s7 + $0x268] sm:$0xff] }
  0x69   : > { %v804_v22 = vld [vmem:[%s2609_s7 + $0x278] sm:$0xff]  ;;  %v807_v23 = vld [vmem:[%s2609_s7 + $0x290] sm:$0xff]  ;;  %v2189_v24 = vpack.c.bf16 %v800_v19, %v797_v17  ;;  %v2240_v25 = vpack.c.bf16 %v802_v21, %v799_v20  ;;  %v806_v28 = vld [vmem:[%s2609_s7 + $0x288] sm:$0xff] }
  0x6a   : > { %v803_v26 = vld [vmem:[%s2609_s7 + $0x270] sm:$0xff]  ;;  %v2191_v27 = vpack.c.bf16 %v807_v23, %v804_v22  ;;  %v805_v29 = vld [vmem:[%s2609_s7 + $0x280] sm:$0xff]  ;;  %v808_v30 = vld [vmem:[%s2609_s7 + $0x298] sm:$0xff] }
  0x6b   : > { %2166 = vmatpush1.bf16.msra.mxu0 %v2165_v34  ;;  %2223 = vmatpush1.bf16.msra.mxu1 %v2222_v35  ;;  %v810_v31 = vld [vmem:[%s2609_s7 + $0x2a8] sm:$0xff]  ;;  %v813_v32 = vld [vmem:[%s2609_s7 + $0x2c0] sm:$0xff]  ;;  %v2193_v34 = vpack.c.bf16 %v806_v28, %v803_v26  ;;  %v2243_v35 = vpack.c.bf16 %v808_v30, %v805_v29  ;;  %v812_v38 = vld [vmem:[%s2609_s7 + $0x2b8] sm:$0xff] }
  0x6c   : > { %2168 = vmatprep.subr.bf16.mxu0 %v2167_v37  ;;  %2224 = vmatprep.subr.bf16.mxu1 %v2334_v33  ;;  %v809_v36 = vld [vmem:[%s2609_s7 + $0x2a0] sm:$0xff]  ;;  %v2195_v37 = vpack.c.bf16 %v813_v32, %v810_v31  ;;  %v811_v39 = vld [vmem:[%s2609_s7 + $0x2b0] sm:$0xff]  ;;  %v814_v40 = vld [vmem:[%s2609_s7 + $0x2c8] sm:$0xff] }
  0x6d   : > { %v816_v41 = vld [vmem:[%s2609_s7 + $0x2d8] sm:$0xff]  ;;  %v819_v42 = vld [vmem:[%s2609_s7 + $0x2f0] sm:$0xff]  ;;  %v818_v47 = vld [vmem:[%s2609_s7 + $0x2e8] sm:$0xff] }
  0x6e   : > { %v815_v45 = vld [vmem:[%s2609_s7 + $0x2d0] sm:$0xff]  ;;  %v817_v48 = vld [vmem:[%s2609_s7 + $0x2e0] sm:$0xff]  ;;  %v820_v49 = vld [vmem:[%s2609_s7 + $0x2f8] sm:$0xff]  ;;  %s3128_s7 = scalar_lea.vmem (%p2390_p6), %s3334_s3, %s2138_s6 }
  0x6f   : > { %2170 = vmatpush1.bf16.msra.mxu0 %v2169_v43  ;;  %2226 = vmatpush1.bf16.msra.mxu1 %v2225_v44  ;;  %v2197_v43 = vpack.c.bf16 %v812_v38, %v809_v36  ;;  %v2246_v44 = vpack.c.bf16 %v814_v40, %v811_v39  ;;  %v2201_v50 = vpack.c.bf16 %v818_v47, %v815_v45  ;;  %v663_v54 = vld [vmem:[%s3331_s0 + $0x10] sm:$0xff]  ;;  %v668_v56 = vld [vmem:[%s3331_s0 + $0x38] sm:$0xff]  ;;  %v670_v58 = vld [vmem:[%s3331_s0 + $0x48] sm:$0xff] }
  0x70   : > { %2172 = vmatprep.subr.bf16.mxu0 %v2171_v46  ;;  %2227 = vmatprep.subr.bf16.mxu1 %v2334_v33  ;;  %v2199_v46 = vpack.c.bf16 %v819_v42, %v816_v41  ;;  %v2249_v51 = vpack.c.bf16 %v820_v49, %v817_v48  ;;  %v667_v57 = vld [vmem:[%s3331_s0 + $0x30] sm:$0xff]  ;;  %v669_v59 = vld [vmem:[%s3331_s0 + $0x40] sm:$0xff]  ;;  %v672_v60 = vld [vmem:[%s3331_s0 + $0x58] sm:$0xff] }
  0x71   : > { %v673_v63 = vld [vmem:[%s3331_s0 + $0x60] sm:$0xff]  ;;  %v675_v1 = vld [vmem:[%s3331_s0 + $0x70] sm:$0xff]  ;;  %v678_v2 = vld [vmem:[%s3331_s0 + $0x88] sm:$0xff] }
  0x72   : > { %v677_v3 = vld [vmem:[%s3331_s0 + $0x80] sm:$0xff]  ;;  %v680_v4 = vld [vmem:[%s3331_s0 + $0x98] sm:$0xff]  ;;  %v679_v5 = vld [vmem:[%s3331_s0 + $0x90] sm:$0xff] }
  0x73   : > { %2174 = vmatpush1.bf16.msra.mxu0 %v2173_v52  ;;  %2229 = vmatpush1.bf16.msra.mxu1 %v2228_v53  ;;  %v661_v52 = vld [vmem:[%s3331_s0] sm:$0xff]  ;;  %v664_v53 = vld [vmem:[%s3331_s0 + $0x18] sm:$0xff]  ;;  %v686_v10 = vld [vmem:[%s3331_s0 + $0xc8] sm:$0xff] }
  0x74   : > { %2176 = vmatprep.subr.bf16.mxu0 %v2175_v55  ;;  %2230 = vmatprep.subr.bf16.mxu1 %v2334_v33  ;;  %v665_v55 = vld [vmem:[%s3331_s0 + $0x20] sm:$0xff]  ;;  %v684_v8 = vld [vmem:[%s3331_s0 + $0xb8] sm:$0xff]  ;;  %v687_v13 = vld [vmem:[%s3331_s0 + $0xd0] sm:$0xff] }
  0x75   : > { %v685_v11 = vld [vmem:[%s3331_s0 + $0xc0] sm:$0xff]  ;;  %v688_v12 = vld [vmem:[%s3331_s0 + $0xd8] sm:$0xff]  ;;  %v690_v14 = vld [vmem:[%s3331_s0 + $0xe8] sm:$0xff] }
  0x76   : > { %v691_v17 = vld [vmem:[%s3331_s0 + $0xf0] sm:$0xff]  ;;  %v693_v19 = vld [vmem:[%s3331_s0 + $0x100] sm:$0xff]  ;;  %v696_v20 = vld [vmem:[%s3331_s0 + $0x118] sm:$0xff] }
  0x77   : > { %2178 = vmatpush1.bf16.msra.mxu0 %v2177_v61  ;;  %2232 = vmatpush1.bf16.msra.mxu1 %v2231_v62  ;;  %v671_v61 = vld [vmem:[%s3331_s0 + $0x50] sm:$0xff]  ;;  %v674_v62 = vld [vmem:[%s3331_s0 + $0x68] sm:$0xff]  ;;  %v697_v23 = vld [vmem:[%s3331_s0 + $0x120] sm:$0xff] }
  0x78   : > { %2180 = vmatprep.subr.bf16.mxu0 %v2179_v0  ;;  %2233 = vmatprep.subr.bf16.mxu1 %v2334_v33  ;;  %v676_v0 = vld [vmem:[%s3331_s0 + $0x78] sm:$0xff]  ;;  %v695_v21 = vld [vmem:[%s3331_s0 + $0x110] sm:$0xff]  ;;  %v698_v22 = vld [vmem:[%s3331_s0 + $0x128] sm:$0xff] }
  0x79   : > { %v702_v26 = vld [vmem:[%s3331_s0 + $0x148] sm:$0xff]  ;;  %v704_v28 = vld [vmem:[%s3331_s0 + $0x158] sm:$0xff]  ;;  %v703_v29 = vld [vmem:[%s3331_s0 + $0x150] sm:$0xff] }
  0x7a   : > { %v706_v30 = vld [vmem:[%s3331_s0 + $0x168] sm:$0xff]  ;;  %v705_v31 = vld [vmem:[%s3331_s0 + $0x160] sm:$0xff]  ;;  %v708_v32 = vld [vmem:[%s3331_s0 + $0x178] sm:$0xff] }
  0x7b   : > { %2182 = vmatpush1.bf16.msra.mxu0 %v2181_v6  ;;  %2235 = vmatpush1.bf16.msra.mxu1 %v2234_v7  ;;  %v682_v6 = vld [vmem:[%s3331_s0 + $0xa8] sm:$0xff]  ;;  %v681_v7 = vld [vmem:[%s3331_s0 + $0xa0] sm:$0xff]  ;;  %v711_v38 = vld [vmem:[%s3331_s0 + $0x190] sm:$0xff] }
  0x7c   : > { %2184 = vmatprep.subr.bf16.mxu0 %v2183_v9  ;;  %2236 = vmatprep.subr.bf16.mxu1 %v2334_v33  ;;  %v683_v9 = vld [vmem:[%s3331_s0 + $0xb0] sm:$0xff]  ;;  %v709_v36 = vld [vmem:[%s3331_s0 + $0x180] sm:$0xff]  ;;  %v714_v39 = vld [vmem:[%s3331_s0 + $0x1a8] sm:$0xff] }
  0x7d   : > { %v713_v40 = vld [vmem:[%s3331_s0 + $0x1a0] sm:$0xff]  ;;  %v716_v41 = vld [vmem:[%s3331_s0 + $0x1b8] sm:$0xff]  ;;  %v715_v42 = vld [vmem:[%s3331_s0 + $0x1b0] sm:$0xff] }
  0x7e   : > { %v720_v45 = vld [vmem:[%s3331_s0 + $0x1d8] sm:$0xff]  ;;  %v722_v47 = vld [vmem:[%s3331_s0 + $0x1e8] sm:$0xff]  ;;  %v721_v48 = vld [vmem:[%s3331_s0 + $0x1e0] sm:$0xff] }
  0x7f   : > { %2186 = vmatpush1.bf16.msra.mxu0 %v2185_v15  ;;  %2238 = vmatpush1.bf16.msra.mxu1 %v2237_v16  ;;  %v689_v15 = vld [vmem:[%s3331_s0 + $0xe0] sm:$0xff]  ;;  %v692_v16 = vld [vmem:[%s3331_s0 + $0xf8] sm:$0xff] }
  0x80   : > { %2188 = vmatprep.subr.bf16.mxu0 %v2187_v18  ;;  %2239 = vmatprep.subr.bf16.mxu1 %v2334_v33  ;;  %v694_v18 = vld [vmem:[%s3331_s0 + $0x108] sm:$0xff]  ;;  %v724_v49 = vld [vmem:[%s3331_s0 + $0x1f8] sm:$0xff] }
  0x83   : > { %2190 = vmatpush1.bf16.msra.mxu0 %v2189_v24  ;;  %2241 = vmatpush1.bf16.msra.mxu1 %v2240_v25  ;;  %v700_v24 = vld [vmem:[%s3331_s0 + $0x138] sm:$0xff]  ;;  %v699_v25 = vld [vmem:[%s3331_s0 + $0x130] sm:$0xff] }
  0x84   : > { %2192 = vmatprep.subr.bf16.mxu0 %v2191_v27  ;;  %2242 = vmatprep.subr.bf16.mxu1 %v2334_v33  ;;  %v701_v27 = vld [vmem:[%s3331_s0 + $0x140] sm:$0xff] }
  0x87   : > { %2194 = vmatpush1.bf16.msra.mxu0 %v2193_v34  ;;  %2244 = vmatpush1.bf16.msra.mxu1 %v2243_v35  ;;  %v707_v34 = vld [vmem:[%s3331_s0 + $0x170] sm:$0xff]  ;;  %v710_v35 = vld [vmem:[%s3331_s0 + $0x188] sm:$0xff] }
  0x88   : > { %2196 = vmatprep.subr.bf16.mxu0 %v2195_v37  ;;  %2245 = vmatprep.subr.bf16.mxu1 %v2334_v33  ;;  %v712_v37 = vld [vmem:[%s3331_s0 + $0x198] sm:$0xff] }
  0x8b   : > { %2198 = vmatpush1.bf16.msra.mxu0 %v2197_v43  ;;  %2247 = vmatpush1.bf16.msra.mxu1 %v2246_v44  ;;  %v718_v43 = vld [vmem:[%s3331_s0 + $0x1c8] sm:$0xff]  ;;  %v717_v44 = vld [vmem:[%s3331_s0 + $0x1c0] sm:$0xff] }
  0x8c   : > { %2200 = vmatprep.subr.bf16.mxu0 %v2199_v46  ;;  %2248 = vmatprep.subr.bf16.mxu1 %v2334_v33  ;;  %v666_v33 = vld [vmem:[%s3331_s0 + $0x28] sm:$0xff]  ;;  %v719_v46 = vld [vmem:[%s3331_s0 + $0x1d0] sm:$0xff] }
  0x8f   : > { %2202 = vmatpush1.bf16.msra.mxu0 %v2201_v50  ;;  %2250 = vmatpush1.bf16.msra.mxu1 %v2249_v51  ;;  %v723_v50 = vld [vmem:[%s3331_s0 + $0x1f0] sm:$0xff]  ;;  %v1596_v51 = vlaneseq }
  0x92   : > { %886 = vmatmul.mubr.f32.vlgmr.msra.gmra.mrb[0].mxu0 %v661_v52  ;;  %1143 = vmatmul.mubr.f32.vlgmr.msra.gmra.mrb[0].mxu1 %v661_v52  ;;  %v1597_v52 = vshrl.u32 %v1596_v51, 7 }
  0x93   : > { %891 = vmatprep.mubr.f32.mxu0 %v664_v53  ;;  %1147 = vmatprep.mubr.f32.mxu1 %v664_v53 }
  0x94   : > { %v1598_v53 = vsub.s32 0, %v1597_v52 }
  0x96   : > { %892 = vmatmul.mubr.f32.gmra.mrb[2].mxu0 %v663_v54  ;;  %1148 = vmatmul.mubr.f32.gmra.mrb[2].mxu1 %v663_v54  ;;  %v1606_v54 = vsub.s32 2, %v1597_v52 }
  0x97   : > { %897 = vmatprep.mubr.f32.mxu0 %v666_v33  ;;  %1152 = vmatprep.mubr.f32.mxu1 %v666_v33  ;;  %v1594_v33 = vld [vmem:[%s461_s30] sm:$0x7] }
  0x9a   : > { %898 = vmatmul.mubr.f32.gmra.mrb[4].mxu0 %v665_v55  ;;  %1153 = vmatmul.mubr.f32.gmra.mrb[4].mxu1 %v665_v55  ;;  %v1602_v55 = vsub.s32 1, %v1597_v52 }
  0x9b   : > { %903 = vmatprep.mubr.f32.mxu0 %v668_v56  ;;  %1157 = vmatprep.mubr.f32.mxu1 %v668_v56  ;;  %v2915_v56 = vrot.slane %v1594_v33, %v1598_v53 }
  0x9e   : > { %904 = vmatmul.mubr.f32.gmra.mrb[6].mxu0 %v667_v57  ;;  %1158 = vmatmul.mubr.f32.gmra.mrb[6].mxu1 %v667_v57  ;;  %v2917_v57 = vrot.slane %v1594_v33, %v1606_v54 }
  0x9f   : > { %909 = vmatprep.mubr.f32.mxu0 %v670_v58  ;;  %1162 = vmatprep.mubr.f32.mxu1 %v670_v58  ;;  %v2919_v58 = vrot.slane %v1594_v33, %v1602_v55 }
  0xa2   : > { %910 = vmatmul.mubr.f32.gmra.mrb[8].mxu0 %v669_v59  ;;  %1163 = vmatmul.mubr.f32.gmra.mrb[8].mxu1 %v669_v59 }
  0xa3   : > { %915 = vmatprep.mubr.f32.mxu0 %v672_v60  ;;  %1167 = vmatprep.mubr.f32.mxu1 %v672_v60 }
  0xa6   : > { %916 = vmatmul.mubr.f32.gmra.mrb[10].mxu0 %v671_v61  ;;  %1168 = vmatmul.mubr.f32.gmra.mrb[10].mxu1 %v671_v61 }
  0xa7   : > { %921 = vmatprep.mubr.f32.mxu0 %v674_v62  ;;  %1172 = vmatprep.mubr.f32.mxu1 %v674_v62 }
  0xaa   : > { %922 = vmatmul.mubr.f32.gmra.mrb[12].mxu0 %v673_v63  ;;  %1173 = vmatmul.mubr.f32.gmra.mrb[12].mxu1 %v673_v63 }
  0xab   : > { %927 = vmatprep.mubr.f32.mxu0 %v676_v0  ;;  %1177 = vmatprep.mubr.f32.mxu1 %v676_v0 }
  0xae   : > { %928 = vmatmul.mubr.f32.gmra.mrb[14].mxu0 %v675_v1  ;;  %1178 = vmatmul.mubr.f32.gmra.mrb[14].mxu1 %v675_v1 }
  0xaf   : > { %933 = vmatprep.mubr.f32.mxu0 %v678_v2  ;;  %1182 = vmatprep.mubr.f32.mxu1 %v678_v2 }
  0xb2   : > { %934 = vmatmul.mubr.f32.gmra.mrb[16].mxu0 %v677_v3  ;;  %1183 = vmatmul.mubr.f32.gmra.mrb[16].mxu1 %v677_v3 }
  0xb3   : > { %939 = vmatprep.mubr.f32.mxu0 %v680_v4  ;;  %1187 = vmatprep.mubr.f32.mxu1 %v680_v4 }
  0xb6   : > { %940 = vmatmul.mubr.f32.gmra.mrb[18].mxu0 %v679_v5  ;;  %1188 = vmatmul.mubr.f32.gmra.mrb[18].mxu1 %v679_v5 }
  0xb7   : > { %945 = vmatprep.mubr.f32.mxu0 %v682_v6  ;;  %1192 = vmatprep.mubr.f32.mxu1 %v682_v6 }
  0xba   : > { %946 = vmatmul.mubr.f32.gmra.mrb[20].mxu0 %v681_v7  ;;  %1193 = vmatmul.mubr.f32.gmra.mrb[20].mxu1 %v681_v7 }
  0xbb   : > { %951 = vmatprep.mubr.f32.mxu0 %v684_v8  ;;  %1197 = vmatprep.mubr.f32.mxu1 %v684_v8 }
  0xbe   : > { %952 = vmatmul.mubr.f32.gmra.mrb[22].mxu0 %v683_v9  ;;  %1198 = vmatmul.mubr.f32.gmra.mrb[22].mxu1 %v683_v9 }
  0xbf   : > { %957 = vmatprep.mubr.f32.mxu0 %v686_v10  ;;  %1202 = vmatprep.mubr.f32.mxu1 %v686_v10 }
  0xc2   : > { %958 = vmatmul.mubr.f32.gmra.mrb[24].mxu0 %v685_v11  ;;  %1203 = vmatmul.mubr.f32.gmra.mrb[24].mxu1 %v685_v11 }
  0xc3   : > { %963 = vmatprep.mubr.f32.mxu0 %v688_v12  ;;  %1207 = vmatprep.mubr.f32.mxu1 %v688_v12 }
  0xc6   : > { %964 = vmatmul.mubr.f32.gmra.mrb[26].mxu0 %v687_v13  ;;  %1208 = vmatmul.mubr.f32.gmra.mrb[26].mxu1 %v687_v13 }
  0xc7   : > { %969 = vmatprep.mubr.f32.mxu0 %v690_v14  ;;  %1212 = vmatprep.mubr.f32.mxu1 %v690_v14 }
  0xca   : > { %970 = vmatmul.mubr.f32.gmra.mrb[28].mxu0 %v689_v15  ;;  %1213 = vmatmul.mubr.f32.gmra.mrb[28].mxu1 %v689_v15 }
  0xcb   : > { %975 = vmatprep.mubr.f32.mxu0 %v692_v16  ;;  %1217 = vmatprep.mubr.f32.mxu1 %v692_v16 }
  0xce   : > { %976 = vmatmul.mubr.f32.gmra.mrb[30].mxu0 %v691_v17  ;;  %1218 = vmatmul.mubr.f32.gmra.mrb[30].mxu1 %v691_v17 }
  0xcf   : > { %981 = vmatprep.mubr.f32.mxu0 %v694_v18  ;;  %1222 = vmatprep.mubr.f32.mxu1 %v694_v18 }
  0xd2   : > { %982 = vmatmul.mubr.f32.gmra.mrb[32].mxu0 %v693_v19  ;;  %1223 = vmatmul.mubr.f32.gmra.mrb[32].mxu1 %v693_v19 }
  0xd3   : > { %987 = vmatprep.mubr.f32.mxu0 %v696_v20  ;;  %1227 = vmatprep.mubr.f32.mxu1 %v696_v20 }
  0xd6   : > { %988 = vmatmul.mubr.f32.gmra.mrb[34].mxu0 %v695_v21  ;;  %1228 = vmatmul.mubr.f32.gmra.mrb[34].mxu1 %v695_v21 }
  0xd7   : > { %993 = vmatprep.mubr.f32.mxu0 %v698_v22  ;;  %1232 = vmatprep.mubr.f32.mxu1 %v698_v22 }
  0xda   : > { %994 = vmatmul.mubr.f32.gmra.mrb[36].mxu0 %v697_v23  ;;  %1233 = vmatmul.mubr.f32.gmra.mrb[36].mxu1 %v697_v23 }
  0xdb   : > { %999 = vmatprep.mubr.f32.mxu0 %v700_v24  ;;  %1237 = vmatprep.mubr.f32.mxu1 %v700_v24 }
  0xde   : > { %1000 = vmatmul.mubr.f32.gmra.mrb[38].mxu0 %v699_v25  ;;  %1238 = vmatmul.mubr.f32.gmra.mrb[38].mxu1 %v699_v25 }
  0xdf   : > { %1005 = vmatprep.mubr.f32.mxu0 %v702_v26  ;;  %1242 = vmatprep.mubr.f32.mxu1 %v702_v26 }
  0xe2   : > { %1006 = vmatmul.mubr.f32.gmra.mrb[40].mxu0 %v701_v27  ;;  %1243 = vmatmul.mubr.f32.gmra.mrb[40].mxu1 %v701_v27 }
  0xe3   : > { %1011 = vmatprep.mubr.f32.mxu0 %v704_v28  ;;  %1247 = vmatprep.mubr.f32.mxu1 %v704_v28 }
  0xe6   : > { %1012 = vmatmul.mubr.f32.gmra.mrb[42].mxu0 %v703_v29  ;;  %1248 = vmatmul.mubr.f32.gmra.mrb[42].mxu1 %v703_v29 }
  0xe7   : > { %1017 = vmatprep.mubr.f32.mxu0 %v706_v30  ;;  %1252 = vmatprep.mubr.f32.mxu1 %v706_v30 }
  0xea   : > { %1018 = vmatmul.mubr.f32.gmra.mrb[44].mxu0 %v705_v31  ;;  %1253 = vmatmul.mubr.f32.gmra.mrb[44].mxu1 %v705_v31 }
  0xeb   : > { %1023 = vmatprep.mubr.f32.mxu0 %v708_v32  ;;  %1257 = vmatprep.mubr.f32.mxu1 %v708_v32 }
  0xee   : > { %1024 = vmatmul.mubr.f32.gmra.mrb[46].mxu0 %v707_v34  ;;  %1258 = vmatmul.mubr.f32.gmra.mrb[46].mxu1 %v707_v34 }
  0xef   : > { %1029 = vmatprep.mubr.f32.mxu0 %v710_v35  ;;  %1262 = vmatprep.mubr.f32.mxu1 %v710_v35 }
  0xf2   : > { %1030 = vmatmul.mubr.f32.gmra.mrb[48].mxu0 %v709_v36  ;;  %1263 = vmatmul.mubr.f32.gmra.mrb[48].mxu1 %v709_v36 }
  0xf3   : > { %1035 = vmatprep.mubr.f32.mxu0 %v712_v37  ;;  %1267 = vmatprep.mubr.f32.mxu1 %v712_v37 }
  0xf6   : > { %1036 = vmatmul.mubr.f32.gmra.mrb[50].mxu0 %v711_v38  ;;  %1268 = vmatmul.mubr.f32.gmra.mrb[50].mxu1 %v711_v38 }
  0xf7   : > { %1041 = vmatprep.mubr.f32.mxu0 %v714_v39  ;;  %1272 = vmatprep.mubr.f32.mxu1 %v714_v39 }
  0xfa   : > { %1042 = vmatmul.mubr.f32.gmra.mrb[52].mxu0 %v713_v40  ;;  %1273 = vmatmul.mubr.f32.gmra.mrb[52].mxu1 %v713_v40 }
  0xfb   : > { %1047 = vmatprep.mubr.f32.mxu0 %v716_v41  ;;  %1277 = vmatprep.mubr.f32.mxu1 %v716_v41 }
  0xfe   : > { %1048 = vmatmul.mubr.f32.gmra.mrb[54].mxu0 %v715_v42  ;;  %1278 = vmatmul.mubr.f32.gmra.mrb[54].mxu1 %v715_v42 }
  0xff   : > { %1053 = vmatprep.mubr.f32.mxu0 %v718_v43  ;;  %1282 = vmatprep.mubr.f32.mxu1 %v718_v43 }
 0x102   : > { %1054 = vmatmul.mubr.f32.gmra.mrb[56].mxu0 %v717_v44  ;;  %1283 = vmatmul.mubr.f32.gmra.mrb[56].mxu1 %v717_v44 }
 0x103   : > { %1059 = vmatprep.mubr.f32.mxu0 %v720_v45  ;;  %1287 = vmatprep.mubr.f32.mxu1 %v720_v45 }
 0x106   : > { %1060 = vmatmul.mubr.f32.gmra.mrb[58].mxu0 %v719_v46  ;;  %1288 = vmatmul.mubr.f32.gmra.mrb[58].mxu1 %v719_v46 }
 0x107   : > { %1065 = vmatprep.mubr.f32.mxu0 %v722_v47  ;;  %1292 = vmatprep.mubr.f32.mxu1 %v722_v47 }
 0x10a   : > { %1066 = vmatmul.mubr.f32.gmra.mrb[60].mxu0 %v721_v48  ;;  %1293 = vmatmul.mubr.f32.gmra.mrb[60].mxu1 %v721_v48 }
 0x10b   : > { %1071 = vmatprep.mubr.f32.mxu0 %v724_v49  ;;  %1297 = vmatprep.mubr.f32.mxu1 %v724_v49 }
 0x10e   : > { %1072 = vmatmul.mubr.f32.gmra.mrb[62].mxu0 %v723_v50  ;;  %1298 = vmatmul.mubr.f32.gmra.mrb[62].mxu1 %v723_v50 }
 0x165   : > { %v887_v59 = vpop.f32.mrb[0].mxu0  ;;  %v1144_v60 = vpop.f32.mrb[0].mxu1 }
 0x166   : > { %v1611_v61 = vadd.f32 %v2915_v56, %v887_v59  ;;  %v1613_v62 = vadd.f32 %v2917_v57, %v1144_v60  ;;  %v889_v63 = vpop.f32.mrb[1].mxu0  ;;  %v1146_v0 = vpop.f32.mrb[1].mxu1 }
 0x167   : > { %v1612_v1 = vadd.f32 %v2919_v58, %v889_v63 }
 0x168   : > { %1707 = vst [vmem:[%s2925_s4] sm:$0xff] %v1611_v61  ;;  %1709 = vst [vmem:[%s2925_s4 + $0x10] sm:$0xff] %v1613_v62 }
 0x169   : > { %1708 = vst [vmem:[%s2925_s4 + $0x8] sm:$0xff] %v1612_v1  ;;  %v893_v2 = vpop.f32.mrb[2].mxu0  ;;  %v1149_v3 = vpop.f32.mrb[2].mxu1 }
 0x16a   : > { %v1614_v4 = vadd.f32 %v2915_v56, %v893_v2  ;;  %v1616_v5 = vadd.f32 %v2917_v57, %v1149_v3  ;;  %v895_v6 = vpop.f32.mrb[3].mxu0  ;;  %v1151_v7 = vpop.f32.mrb[3].mxu1 }
 0x16b   : > { %v1615_v8 = vadd.f32 %v2919_v58, %v895_v6 }
 0x16c   : > { %1710 = vst [vmem:[%s2925_s4 + $0x18] sm:$0xff] %v1614_v4  ;;  %1712 = vst [vmem:[%s2925_s4 + $0x28] sm:$0xff] %v1616_v5 }
 0x16d   : > { %1711 = vst [vmem:[%s2925_s4 + $0x20] sm:$0xff] %v1615_v8  ;;  %v899_v9 = vpop.f32.mrb[4].mxu0  ;;  %v1154_v10 = vpop.f32.mrb[4].mxu1 }
 0x16e   : > { %v1617_v11 = vadd.f32 %v2915_v56, %v899_v9  ;;  %v1619_v12 = vadd.f32 %v2917_v57, %v1154_v10  ;;  %v901_v13 = vpop.f32.mrb[5].mxu0  ;;  %v1156_v14 = vpop.f32.mrb[5].mxu1 }
 0x16f   : > { %v1618_v15 = vadd.f32 %v2919_v58, %v901_v13 }
 0x170   : > { %1713 = vst [vmem:[%s2925_s4 + $0x30] sm:$0xff] %v1617_v11  ;;  %1715 = vst [vmem:[%s2925_s4 + $0x40] sm:$0xff] %v1619_v12 }
 0x171   : > { %1714 = vst [vmem:[%s2925_s4 + $0x38] sm:$0xff] %v1618_v15  ;;  %v905_v16 = vpop.f32.mrb[6].mxu0  ;;  %v1159_v17 = vpop.f32.mrb[6].mxu1 }
 0x172   : > { %v1620_v18 = vadd.f32 %v2915_v56, %v905_v16  ;;  %v1622_v19 = vadd.f32 %v2917_v57, %v1159_v17  ;;  %v907_v20 = vpop.f32.mrb[7].mxu0  ;;  %v1161_v21 = vpop.f32.mrb[7].mxu1 }
 0x173   : > { %v1621_v22 = vadd.f32 %v2919_v58, %v907_v20 }
 0x174   : > { %1716 = vst [vmem:[%s2925_s4 + $0x48] sm:$0xff] %v1620_v18  ;;  %1718 = vst [vmem:[%s2925_s4 + $0x58] sm:$0xff] %v1622_v19 }
 0x175   : > { %1717 = vst [vmem:[%s2925_s4 + $0x50] sm:$0xff] %v1621_v22  ;;  %v911_v23 = vpop.f32.mrb[8].mxu0  ;;  %v1164_v24 = vpop.f32.mrb[8].mxu1 }
 0x176   : > { %v1623_v25 = vadd.f32 %v2915_v56, %v911_v23  ;;  %v1625_v26 = vadd.f32 %v2917_v57, %v1164_v24  ;;  %v913_v27 = vpop.f32.mrb[9].mxu0  ;;  %v1166_v28 = vpop.f32.mrb[9].mxu1 }
 0x177   : > { %v1624_v29 = vadd.f32 %v2919_v58, %v913_v27 }
 0x178   : > { %1719 = vst [vmem:[%s2925_s4 + $0x60] sm:$0xff] %v1623_v25  ;;  %1721 = vst [vmem:[%s2925_s4 + $0x70] sm:$0xff] %v1625_v26 }
 0x179   : > { %1720 = vst [vmem:[%s2925_s4 + $0x68] sm:$0xff] %v1624_v29  ;;  %v917_v30 = vpop.f32.mrb[10].mxu0  ;;  %v1169_v31 = vpop.f32.mrb[10].mxu1 }
 0x17a   : > { %v1626_v32 = vadd.f32 %v2915_v56, %v917_v30  ;;  %v1628_v34 = vadd.f32 %v2917_v57, %v1169_v31  ;;  %v919_v35 = vpop.f32.mrb[11].mxu0  ;;  %v1171_v36 = vpop.f32.mrb[11].mxu1 }
 0x17b   : > { %v1627_v37 = vadd.f32 %v2919_v58, %v919_v35 }
 0x17c   : > { %1722 = vst [vmem:[%s2925_s4 + $0x78] sm:$0xff] %v1626_v32  ;;  %1724 = vst [vmem:[%s2925_s4 + $0x88] sm:$0xff] %v1628_v34 }
 0x17d   : > { %1723 = vst [vmem:[%s2925_s4 + $0x80] sm:$0xff] %v1627_v37  ;;  %v923_v38 = vpop.f32.mrb[12].mxu0  ;;  %v1174_v39 = vpop.f32.mrb[12].mxu1 }
 0x17e   : > { %v1629_v40 = vadd.f32 %v2915_v56, %v923_v38  ;;  %v1631_v41 = vadd.f32 %v2917_v57, %v1174_v39  ;;  %v925_v42 = vpop.f32.mrb[13].mxu0  ;;  %v1176_v43 = vpop.f32.mrb[13].mxu1 }
 0x17f   : > { %v1630_v44 = vadd.f32 %v2919_v58, %v925_v42 }
 0x180   : > { %1725 = vst [vmem:[%s2925_s4 + $0x90] sm:$0xff] %v1629_v40  ;;  %1727 = vst [vmem:[%s2925_s4 + $0xa0] sm:$0xff] %v1631_v41 }
 0x181   : > { %1726 = vst [vmem:[%s2925_s4 + $0x98] sm:$0xff] %v1630_v44  ;;  %v929_v45 = vpop.f32.mrb[14].mxu0  ;;  %v1179_v46 = vpop.f32.mrb[14].mxu1 }
 0x182   : > { %v1632_v47 = vadd.f32 %v2915_v56, %v929_v45  ;;  %v1634_v48 = vadd.f32 %v2917_v57, %v1179_v46  ;;  %v931_v49 = vpop.f32.mrb[15].mxu0  ;;  %v1181_v50 = vpop.f32.mrb[15].mxu1 }
 0x183   : > { %v1633_v51 = vadd.f32 %v2919_v58, %v931_v49 }
 0x184   : > { %1728 = vst [vmem:[%s2925_s4 + $0xa8] sm:$0xff] %v1632_v47  ;;  %1730 = vst [vmem:[%s2925_s4 + $0xb8] sm:$0xff] %v1634_v48 }
 0x185   : > { %1729 = vst [vmem:[%s2925_s4 + $0xb0] sm:$0xff] %v1633_v51  ;;  %v935_v52 = vpop.f32.mrb[16].mxu0  ;;  %v1184_v53 = vpop.f32.mrb[16].mxu1 }
 0x186   : > { %v1635_v54 = vadd.f32 %v2915_v56, %v935_v52  ;;  %v1637_v33 = vadd.f32 %v2917_v57, %v1184_v53  ;;  %v937_v55 = vpop.f32.mrb[17].mxu0  ;;  %v1186_v59 = vpop.f32.mrb[17].mxu1 }
 0x187   : > { %v1636_v60 = vadd.f32 %v2919_v58, %v937_v55 }
 0x188   : > { %1731 = vst [vmem:[%s2925_s4 + $0xc0] sm:$0xff] %v1635_v54  ;;  %1733 = vst [vmem:[%s2925_s4 + $0xd0] sm:$0xff] %v1637_v33 }
 0x189   : > { %1732 = vst [vmem:[%s2925_s4 + $0xc8] sm:$0xff] %v1636_v60  ;;  %v941_v61 = vpop.f32.mrb[18].mxu0  ;;  %v1189_v62 = vpop.f32.mrb[18].mxu1 }
 0x18a   : > { %v1638_v63 = vadd.f32 %v2915_v56, %v941_v61  ;;  %v1640_v0 = vadd.f32 %v2917_v57, %v1189_v62  ;;  %v943_v1 = vpop.f32.mrb[19].mxu0  ;;  %v1191_v2 = vpop.f32.mrb[19].mxu1 }
 0x18b   : > { %v1639_v3 = vadd.f32 %v2919_v58, %v943_v1 }
 0x18c   : > { %1734 = vst [vmem:[%s2925_s4 + $0xd8] sm:$0xff] %v1638_v63  ;;  %1736 = vst [vmem:[%s2925_s4 + $0xe8] sm:$0xff] %v1640_v0 }
 0x18d   : > { %1735 = vst [vmem:[%s2925_s4 + $0xe0] sm:$0xff] %v1639_v3  ;;  %v947_v4 = vpop.f32.mrb[20].mxu0  ;;  %v1194_v5 = vpop.f32.mrb[20].mxu1 }
 0x18e   : > { %v1641_v6 = vadd.f32 %v2915_v56, %v947_v4  ;;  %v1643_v7 = vadd.f32 %v2917_v57, %v1194_v5  ;;  %v949_v8 = vpop.f32.mrb[21].mxu0  ;;  %v1196_v9 = vpop.f32.mrb[21].mxu1 }
 0x18f   : > { %v1642_v10 = vadd.f32 %v2919_v58, %v949_v8 }
 0x190   : > { %1737 = vst [vmem:[%s2925_s4 + $0xf0] sm:$0xff] %v1641_v6  ;;  %1739 = vst [vmem:[%s2925_s4 + $0x100] sm:$0xff] %v1643_v7 }
 0x191   : > { %1738 = vst [vmem:[%s2925_s4 + $0xf8] sm:$0xff] %v1642_v10  ;;  %v953_v11 = vpop.f32.mrb[22].mxu0  ;;  %v1199_v12 = vpop.f32.mrb[22].mxu1 }
 0x192   : > { %v1644_v13 = vadd.f32 %v2915_v56, %v953_v11  ;;  %v1646_v14 = vadd.f32 %v2917_v57, %v1199_v12  ;;  %v955_v15 = vpop.f32.mrb[23].mxu0  ;;  %v1201_v16 = vpop.f32.mrb[23].mxu1 }
 0x193   : > { %v1645_v17 = vadd.f32 %v2919_v58, %v955_v15 }
 0x194   : > { %1740 = vst [vmem:[%s2925_s4 + $0x108] sm:$0xff] %v1644_v13  ;;  %1742 = vst [vmem:[%s2925_s4 + $0x118] sm:$0xff] %v1646_v14 }
 0x195   : > { %1741 = vst [vmem:[%s2925_s4 + $0x110] sm:$0xff] %v1645_v17  ;;  %v959_v18 = vpop.f32.mrb[24].mxu0  ;;  %v1204_v19 = vpop.f32.mrb[24].mxu1 }
 0x196   : > { %v1647_v20 = vadd.f32 %v2915_v56, %v959_v18  ;;  %v1649_v21 = vadd.f32 %v2917_v57, %v1204_v19  ;;  %v961_v22 = vpop.f32.mrb[25].mxu0  ;;  %v1206_v23 = vpop.f32.mrb[25].mxu1 }
 0x197   : > { %v1648_v24 = vadd.f32 %v2919_v58, %v961_v22 }
 0x198   : > { %1743 = vst [vmem:[%s2925_s4 + $0x120] sm:$0xff] %v1647_v20  ;;  %1745 = vst [vmem:[%s2925_s4 + $0x130] sm:$0xff] %v1649_v21 }
 0x199   : > { %1744 = vst [vmem:[%s2925_s4 + $0x128] sm:$0xff] %v1648_v24  ;;  %v965_v25 = vpop.f32.mrb[26].mxu0  ;;  %v1209_v26 = vpop.f32.mrb[26].mxu1 }
 0x19a   : > { %v1650_v27 = vadd.f32 %v2915_v56, %v965_v25  ;;  %v1652_v28 = vadd.f32 %v2917_v57, %v1209_v26  ;;  %v967_v29 = vpop.f32.mrb[27].mxu0  ;;  %v1211_v30 = vpop.f32.mrb[27].mxu1 }
 0x19b   : > { %v1651_v31 = vadd.f32 %v2919_v58, %v967_v29 }
 0x19c   : > { %1746 = vst [vmem:[%s2925_s4 + $0x138] sm:$0xff] %v1650_v27  ;;  %1748 = vst [vmem:[%s2925_s4 + $0x148] sm:$0xff] %v1652_v28 }
 0x19d   : > { %1747 = vst [vmem:[%s2925_s4 + $0x140] sm:$0xff] %v1651_v31  ;;  %v971_v32 = vpop.f32.mrb[28].mxu0  ;;  %v1214_v34 = vpop.f32.mrb[28].mxu1 }
 0x19e   : > { %v1653_v35 = vadd.f32 %v2915_v56, %v971_v32  ;;  %v1655_v36 = vadd.f32 %v2917_v57, %v1214_v34  ;;  %v973_v37 = vpop.f32.mrb[29].mxu0  ;;  %v1216_v38 = vpop.f32.mrb[29].mxu1 }
 0x19f   : > { %v1654_v39 = vadd.f32 %v2919_v58, %v973_v37 }
 0x1a0   : > { %1749 = vst [vmem:[%s2925_s4 + $0x150] sm:$0xff] %v1653_v35  ;;  %1751 = vst [vmem:[%s2925_s4 + $0x160] sm:$0xff] %v1655_v36 }
 0x1a1   : > { %1750 = vst [vmem:[%s2925_s4 + $0x158] sm:$0xff] %v1654_v39  ;;  %v977_v40 = vpop.f32.mrb[30].mxu0  ;;  %v1219_v41 = vpop.f32.mrb[30].mxu1 }
 0x1a2   : > { %v1656_v42 = vadd.f32 %v2915_v56, %v977_v40  ;;  %v1658_v43 = vadd.f32 %v2917_v57, %v1219_v41  ;;  %v979_v44 = vpop.f32.mrb[31].mxu0  ;;  %v1221_v45 = vpop.f32.mrb[31].mxu1 }
 0x1a3   : > { %v1657_v46 = vadd.f32 %v2919_v58, %v979_v44 }
 0x1a4   : > { %1752 = vst [vmem:[%s2925_s4 + $0x168] sm:$0xff] %v1656_v42  ;;  %1754 = vst [vmem:[%s2925_s4 + $0x178] sm:$0xff] %v1658_v43 }
 0x1a5   : > { %1753 = vst [vmem:[%s2925_s4 + $0x170] sm:$0xff] %v1657_v46  ;;  %v983_v47 = vpop.f32.mrb[32].mxu0  ;;  %v1224_v48 = vpop.f32.mrb[32].mxu1 }
 0x1a6   : > { %v1659_v49 = vadd.f32 %v2915_v56, %v983_v47  ;;  %v1661_v50 = vadd.f32 %v2917_v57, %v1224_v48  ;;  %v985_v51 = vpop.f32.mrb[33].mxu0  ;;  %v1226_v52 = vpop.f32.mrb[33].mxu1 }
 0x1a7   : > { %v1660_v53 = vadd.f32 %v2919_v58, %v985_v51 }
 0x1a8   : > { %1755 = vst [vmem:[%s2925_s4 + $0x180] sm:$0xff] %v1659_v49  ;;  %1757 = vst [vmem:[%s2925_s4 + $0x190] sm:$0xff] %v1661_v50 }
 0x1a9   : > { %1756 = vst [vmem:[%s2925_s4 + $0x188] sm:$0xff] %v1660_v53  ;;  %v989_v54 = vpop.f32.mrb[34].mxu0  ;;  %v1229_v33 = vpop.f32.mrb[34].mxu1 }
 0x1aa   : > { %v1662_v55 = vadd.f32 %v2915_v56, %v989_v54  ;;  %v1664_v59 = vadd.f32 %v2917_v57, %v1229_v33  ;;  %v991_v60 = vpop.f32.mrb[35].mxu0  ;;  %v1231_v61 = vpop.f32.mrb[35].mxu1 }
 0x1ab   : > { %v1663_v62 = vadd.f32 %v2919_v58, %v991_v60 }
 0x1ac   : > { %1758 = vst [vmem:[%s2925_s4 + $0x198] sm:$0xff] %v1662_v55  ;;  %1760 = vst [vmem:[%s2925_s4 + $0x1a8] sm:$0xff] %v1664_v59 }
 0x1ad   : > { %1759 = vst [vmem:[%s2925_s4 + $0x1a0] sm:$0xff] %v1663_v62  ;;  %v995_v63 = vpop.f32.mrb[36].mxu0  ;;  %v1234_v0 = vpop.f32.mrb[36].mxu1 }
 0x1ae   : > { %v1665_v1 = vadd.f32 %v2915_v56, %v995_v63  ;;  %v1667_v2 = vadd.f32 %v2917_v57, %v1234_v0  ;;  %v997_v3 = vpop.f32.mrb[37].mxu0  ;;  %v1236_v4 = vpop.f32.mrb[37].mxu1 }
 0x1af   : > { %v1666_v5 = vadd.f32 %v2919_v58, %v997_v3 }
 0x1b0   : > { %1761 = vst [vmem:[%s2925_s4 + $0x1b0] sm:$0xff] %v1665_v1  ;;  %1763 = vst [vmem:[%s2925_s4 + $0x1c0] sm:$0xff] %v1667_v2 }
 0x1b1   : > { %1762 = vst [vmem:[%s2925_s4 + $0x1b8] sm:$0xff] %v1666_v5  ;;  %v1001_v6 = vpop.f32.mrb[38].mxu0  ;;  %v1239_v7 = vpop.f32.mrb[38].mxu1 }
 0x1b2   : > { %v1668_v8 = vadd.f32 %v2915_v56, %v1001_v6  ;;  %v1670_v9 = vadd.f32 %v2917_v57, %v1239_v7  ;;  %v1003_v10 = vpop.f32.mrb[39].mxu0  ;;  %v1241_v11 = vpop.f32.mrb[39].mxu1 }
 0x1b3   : > { %v1669_v12 = vadd.f32 %v2919_v58, %v1003_v10 }
 0x1b4   : > { %1764 = vst [vmem:[%s2925_s4 + $0x1c8] sm:$0xff] %v1668_v8  ;;  %1766 = vst [vmem:[%s2925_s4 + $0x1d8] sm:$0xff] %v1670_v9 }
 0x1b5   : > { %1765 = vst [vmem:[%s2925_s4 + $0x1d0] sm:$0xff] %v1669_v12  ;;  %v1007_v13 = vpop.f32.mrb[40].mxu0  ;;  %v1244_v14 = vpop.f32.mrb[40].mxu1 }
 0x1b6   : > { %v1671_v15 = vadd.f32 %v2915_v56, %v1007_v13  ;;  %v1673_v16 = vadd.f32 %v2917_v57, %v1244_v14  ;;  %v1009_v17 = vpop.f32.mrb[41].mxu0  ;;  %v1246_v18 = vpop.f32.mrb[41].mxu1 }
 0x1b7   : > { %v1672_v19 = vadd.f32 %v2919_v58, %v1009_v17 }
 0x1b8   : > { %1767 = vst [vmem:[%s2925_s4 + $0x1e0] sm:$0xff] %v1671_v15  ;;  %1769 = vst [vmem:[%s2925_s4 + $0x1f0] sm:$0xff] %v1673_v16 }
 0x1b9   : > { %1768 = vst [vmem:[%s2925_s4 + $0x1e8] sm:$0xff] %v1672_v19  ;;  %v1013_v20 = vpop.f32.mrb[42].mxu0  ;;  %v1249_v21 = vpop.f32.mrb[42].mxu1 }
 0x1ba   : > { %v1674_v22 = vadd.f32 %v2915_v56, %v1013_v20  ;;  %v1676_v23 = vadd.f32 %v2917_v57, %v1249_v21  ;;  %v1015_v24 = vpop.f32.mrb[43].mxu0  ;;  %v1251_v25 = vpop.f32.mrb[43].mxu1 }
 0x1bb   : > { %v1675_v26 = vadd.f32 %v2919_v58, %v1015_v24 }
 0x1bc   : > { %1770 = vst [vmem:[%s2925_s4 + $0x1f8] sm:$0xff] %v1674_v22  ;;  %1772 = vst [vmem:[%s2925_s4 + $0x208] sm:$0xff] %v1676_v23 }
 0x1bd   : > { %1771 = vst [vmem:[%s2925_s4 + $0x200] sm:$0xff] %v1675_v26  ;;  %v1019_v27 = vpop.f32.mrb[44].mxu0  ;;  %v1254_v28 = vpop.f32.mrb[44].mxu1 }
 0x1be   : > { %v1677_v29 = vadd.f32 %v2915_v56, %v1019_v27  ;;  %v1679_v30 = vadd.f32 %v2917_v57, %v1254_v28  ;;  %v1021_v31 = vpop.f32.mrb[45].mxu0  ;;  %v1256_v32 = vpop.f32.mrb[45].mxu1 }
 0x1bf   : > { %v1678_v34 = vadd.f32 %v2919_v58, %v1021_v31 }
 0x1c0   : > { %1773 = vst [vmem:[%s2925_s4 + $0x210] sm:$0xff] %v1677_v29  ;;  %1775 = vst [vmem:[%s2925_s4 + $0x220] sm:$0xff] %v1679_v30 }
 0x1c1   : > { %1774 = vst [vmem:[%s2925_s4 + $0x218] sm:$0xff] %v1678_v34  ;;  %v1025_v35 = vpop.f32.mrb[46].mxu0  ;;  %v1259_v36 = vpop.f32.mrb[46].mxu1 }
 0x1c2   : > { %v1680_v37 = vadd.f32 %v2915_v56, %v1025_v35  ;;  %v1682_v38 = vadd.f32 %v2917_v57, %v1259_v36  ;;  %v1027_v39 = vpop.f32.mrb[47].mxu0  ;;  %v1261_v40 = vpop.f32.mrb[47].mxu1 }
 0x1c3   : > { %v1681_v41 = vadd.f32 %v2919_v58, %v1027_v39  ;;  %v1838_v39 = vld [vmem:[%s2925_s4 + $0x28] sm:$0xff] (%p2390_p6)  ;;  %v1840_v40 = vld [vmem:[%s2925_s4 + $0x30] sm:$0xff] (%p2390_p6) }
 0x1c4   : > { %1776 = vst [vmem:[%s2925_s4 + $0x228] sm:$0xff] %v1680_v37  ;;  %1778 = vst [vmem:[%s2925_s4 + $0x238] sm:$0xff] %v1682_v38  ;;  %v1834_v37 = vld [vmem:[%s2925_s4 + $0x18] sm:$0xff] (%p2390_p6)  ;;  %v1836_v38 = vld [vmem:[%s2925_s4 + $0x20] sm:$0xff] (%p2390_p6) }
 0x1c5   : > { %1777 = vst [vmem:[%s2925_s4 + $0x230] sm:$0xff] %v1681_v41  ;;  %v1031_v42 = vpop.f32.mrb[48].mxu0  ;;  %v1264_v43 = vpop.f32.mrb[48].mxu1  ;;  %v1842_v41 = vld [vmem:[%s2925_s4 + $0x38] sm:$0xff] (%p2390_p6)  ;;  %1835 = vst [vmem:[%s3128_s7 + $0x30] sm:$0xff] (%p2390_p6), %v1834_v37 }
 0x1c6   : > { %v1683_v44 = vadd.f32 %v2915_v56, %v1031_v42  ;;  %v1685_v45 = vadd.f32 %v2917_v57, %v1264_v43  ;;  %v1033_v46 = vpop.f32.mrb[49].mxu0  ;;  %v1266_v47 = vpop.f32.mrb[49].mxu1  ;;  %v1844_v42 = vld [vmem:[%s2925_s4 + $0x40] sm:$0xff] (%p2390_p6)  ;;  %1837 = vst [vmem:[%s3128_s7 + $0x38] sm:$0xff] (%p2390_p6), %v1836_v38  ;;  %1839 = vst [vmem:[%s3128_s7 + $0x40] sm:$0xff] (%p2390_p6), %v1838_v39  ;;  %v1846_v43 = vld [vmem:[%s2925_s4 + $0x48] sm:$0xff] (%p2390_p6) }
 0x1c7   : > { %v1684_v48 = vadd.f32 %v2919_v58, %v1033_v46  ;;  %1841 = vst [vmem:[%s3128_s7 + $0x60] sm:$0xff] (%p2390_p6), %v1840_v40  ;;  %1843 = vst [vmem:[%s3128_s7 + $0x68] sm:$0xff] (%p2390_p6), %v1842_v41  ;;  %v1852_v46 = vld [vmem:[%s2925_s4 + $0x60] sm:$0xff] (%p2390_p6)  ;;  %v1854_v47 = vld [vmem:[%s2925_s4 + $0x68] sm:$0xff] (%p2390_p6) }
 0x1c8   : > { %1779 = vst [vmem:[%s2925_s4 + $0x240] sm:$0xff] %v1683_v44  ;;  %1781 = vst [vmem:[%s2925_s4 + $0x250] sm:$0xff] %v1685_v45  ;;  %v1848_v44 = vld [vmem:[%s2925_s4 + $0x50] sm:$0xff] (%p2390_p6)  ;;  %v1850_v45 = vld [vmem:[%s2925_s4 + $0x58] sm:$0xff] (%p2390_p6) }
 0x1c9   : > { %1780 = vst [vmem:[%s2925_s4 + $0x248] sm:$0xff] %v1684_v48  ;;  %v1037_v49 = vpop.f32.mrb[50].mxu0  ;;  %v1269_v50 = vpop.f32.mrb[50].mxu1  ;;  %1845 = vst [vmem:[%s3128_s7 + $0x70] sm:$0xff] (%p2390_p6), %v1844_v42  ;;  %v1856_v48 = vld [vmem:[%s2925_s4 + $0x70] sm:$0xff] (%p2390_p6)  ;;  %v1962_v37 = vld [vmem:[%s2925_s4 + $0x218] sm:$0xff] (%p2390_p6) }
 0x1ca   : > { %v1686_v51 = vadd.f32 %v2915_v56, %v1037_v49  ;;  %v1688_v52 = vadd.f32 %v2917_v57, %v1269_v50  ;;  %v1039_v53 = vpop.f32.mrb[51].mxu0  ;;  %v1271_v54 = vpop.f32.mrb[51].mxu1  ;;  %1847 = vst [vmem:[%s3128_s7 + $0x90] sm:$0xff] (%p2390_p6), %v1846_v43  ;;  %1849 = vst [vmem:[%s3128_s7 + $0x98] sm:$0xff] (%p2390_p6), %v1848_v44  ;;  %v1858_v49 = vld [vmem:[%s2925_s4 + $0x78] sm:$0xff] (%p2390_p6)  ;;  %v1860_v50 = vld [vmem:[%s2925_s4 + $0x80] sm:$0xff] (%p2390_p6) }
 0x1cb   : > { %v1687_v33 = vadd.f32 %v2919_v58, %v1039_v53  ;;  %1851 = vst [vmem:[%s3128_s7 + $0xa0] sm:$0xff] (%p2390_p6), %v1850_v45  ;;  %1853 = vst [vmem:[%s3128_s7 + $0xc0] sm:$0xff] (%p2390_p6), %v1852_v46  ;;  %v1866_v53 = vld [vmem:[%s2925_s4 + $0x98] sm:$0xff] (%p2390_p6)  ;;  %v1868_v54 = vld [vmem:[%s2925_s4 + $0xa0] sm:$0xff] (%p2390_p6) }
 0x1cc   : > { %1782 = vst [vmem:[%s2925_s4 + $0x258] sm:$0xff] %v1686_v51  ;;  %1784 = vst [vmem:[%s2925_s4 + $0x268] sm:$0xff] %v1688_v52  ;;  %v1862_v51 = vld [vmem:[%s2925_s4 + $0x88] sm:$0xff] (%p2390_p6)  ;;  %v1864_v52 = vld [vmem:[%s2925_s4 + $0x90] sm:$0xff] (%p2390_p6) }
 0x1cd   : > { %1783 = vst [vmem:[%s2925_s4 + $0x260] sm:$0xff] %v1687_v33  ;;  %v1043_v55 = vpop.f32.mrb[52].mxu0  ;;  %v1274_v59 = vpop.f32.mrb[52].mxu1  ;;  %1855 = vst [vmem:[%s3128_s7 + $0xc8] sm:$0xff] (%p2390_p6), %v1854_v47  ;;  %v1870_v33 = vld [vmem:[%s2925_s4 + $0xa8] sm:$0xff] (%p2390_p6)  ;;  %v1964_v38 = vld [vmem:[%s2925_s4 + $0x220] sm:$0xff] (%p2390_p6) }
 0x1ce   : > { %v1689_v60 = vadd.f32 %v2915_v56, %v1043_v55  ;;  %v1691_v61 = vadd.f32 %v2917_v57, %v1274_v59  ;;  %v1045_v62 = vpop.f32.mrb[53].mxu0  ;;  %v1276_v63 = vpop.f32.mrb[53].mxu1  ;;  %1857 = vst [vmem:[%s3128_s7 + $0xd0] sm:$0xff] (%p2390_p6), %v1856_v48  ;;  %1859 = vst [vmem:[%s3128_s7 + $0xf0] sm:$0xff] (%p2390_p6), %v1858_v49  ;;  %v1872_v55 = vld [vmem:[%s2925_s4 + $0xb0] sm:$0xff] (%p2390_p6)  ;;  %v1874_v59 = vld [vmem:[%s2925_s4 + $0xb8] sm:$0xff] (%p2390_p6) }
 0x1cf   : > { %v1690_v0 = vadd.f32 %v2919_v58, %v1045_v62  ;;  %1861 = vst [vmem:[%s3128_s7 + $0xf8] sm:$0xff] (%p2390_p6), %v1860_v50  ;;  %1863 = vst [vmem:[%s3128_s7 + $0x100] sm:$0xff] (%p2390_p6), %v1862_v51  ;;  %v1880_v62 = vld [vmem:[%s2925_s4 + $0xd0] sm:$0xff] (%p2390_p6)  ;;  %v1882_v63 = vld [vmem:[%s2925_s4 + $0xd8] sm:$0xff] (%p2390_p6) }
 0x1d0   : > { %1785 = vst [vmem:[%s2925_s4 + $0x270] sm:$0xff] %v1689_v60  ;;  %1787 = vst [vmem:[%s2925_s4 + $0x280] sm:$0xff] %v1691_v61  ;;  %v1876_v60 = vld [vmem:[%s2925_s4 + $0xc0] sm:$0xff] (%p2390_p6)  ;;  %v1878_v61 = vld [vmem:[%s2925_s4 + $0xc8] sm:$0xff] (%p2390_p6) }
 0x1d1   : > { %1786 = vst [vmem:[%s2925_s4 + $0x278] sm:$0xff] %v1690_v0  ;;  %v1049_v1 = vpop.f32.mrb[54].mxu0  ;;  %v1279_v2 = vpop.f32.mrb[54].mxu1  ;;  %1865 = vst [vmem:[%s3128_s7 + $0x120] sm:$0xff] (%p2390_p6), %v1864_v52  ;;  %v1884_v0 = vld [vmem:[%s2925_s4 + $0xe0] sm:$0xff] (%p2390_p6)  ;;  %v1966_v39 = vld [vmem:[%s2925_s4 + $0x228] sm:$0xff] (%p2390_p6) }
 0x1d2   : > { %v1692_v3 = vadd.f32 %v2915_v56, %v1049_v1  ;;  %v1694_v4 = vadd.f32 %v2917_v57, %v1279_v2  ;;  %v1051_v5 = vpop.f32.mrb[55].mxu0  ;;  %v1281_v6 = vpop.f32.mrb[55].mxu1  ;;  %1867 = vst [vmem:[%s3128_s7 + $0x128] sm:$0xff] (%p2390_p6), %v1866_v53  ;;  %1869 = vst [vmem:[%s3128_s7 + $0x130] sm:$0xff] (%p2390_p6), %v1868_v54  ;;  %v1886_v1 = vld [vmem:[%s2925_s4 + $0xe8] sm:$0xff] (%p2390_p6)  ;;  %v1888_v2 = vld [vmem:[%s2925_s4 + $0xf0] sm:$0xff] (%p2390_p6) }
 0x1d3   : > { %v1693_v7 = vadd.f32 %v2919_v58, %v1051_v5  ;;  %1871 = vst [vmem:[%s3128_s7 + $0x150] sm:$0xff] (%p2390_p6), %v1870_v33  ;;  %1873 = vst [vmem:[%s3128_s7 + $0x158] sm:$0xff] (%p2390_p6), %v1872_v55  ;;  %v1894_v5 = vld [vmem:[%s2925_s4 + $0x108] sm:$0xff] (%p2390_p6)  ;;  %v1896_v6 = vld [vmem:[%s2925_s4 + $0x110] sm:$0xff] (%p2390_p6) }
 0x1d4   : > { %1788 = vst [vmem:[%s2925_s4 + $0x288] sm:$0xff] %v1692_v3  ;;  %1790 = vst [vmem:[%s2925_s4 + $0x298] sm:$0xff] %v1694_v4  ;;  %v1890_v3 = vld [vmem:[%s2925_s4 + $0xf8] sm:$0xff] (%p2390_p6)  ;;  %v1892_v4 = vld [vmem:[%s2925_s4 + $0x100] sm:$0xff] (%p2390_p6) }
 0x1d5   : > { %1789 = vst [vmem:[%s2925_s4 + $0x290] sm:$0xff] %v1693_v7  ;;  %v1055_v8 = vpop.f32.mrb[56].mxu0  ;;  %v1284_v9 = vpop.f32.mrb[56].mxu1  ;;  %1875 = vst [vmem:[%s3128_s7 + $0x160] sm:$0xff] (%p2390_p6), %v1874_v59  ;;  %v1898_v7 = vld [vmem:[%s2925_s4 + $0x118] sm:$0xff] (%p2390_p6)  ;;  %v1968_v40 = vld [vmem:[%s2925_s4 + $0x230] sm:$0xff] (%p2390_p6) }
 0x1d6   : > { %v1695_v10 = vadd.f32 %v2915_v56, %v1055_v8  ;;  %v1697_v11 = vadd.f32 %v2917_v57, %v1284_v9  ;;  %v1057_v12 = vpop.f32.mrb[57].mxu0  ;;  %v1286_v13 = vpop.f32.mrb[57].mxu1  ;;  %1877 = vst [vmem:[%s3128_s7 + $0x180] sm:$0xff] (%p2390_p6), %v1876_v60  ;;  %1879 = vst [vmem:[%s3128_s7 + $0x188] sm:$0xff] (%p2390_p6), %v1878_v61  ;;  %v1900_v8 = vld [vmem:[%s2925_s4 + $0x120] sm:$0xff] (%p2390_p6)  ;;  %v1902_v9 = vld [vmem:[%s2925_s4 + $0x128] sm:$0xff] (%p2390_p6) }
 0x1d7   : > { %v1696_v14 = vadd.f32 %v2919_v58, %v1057_v12  ;;  %1881 = vst [vmem:[%s3128_s7 + $0x190] sm:$0xff] (%p2390_p6), %v1880_v62  ;;  %1883 = vst [vmem:[%s3128_s7 + $0x1b0] sm:$0xff] (%p2390_p6), %v1882_v63  ;;  %v1908_v12 = vld [vmem:[%s2925_s4 + $0x140] sm:$0xff] (%p2390_p6)  ;;  %v1910_v13 = vld [vmem:[%s2925_s4 + $0x148] sm:$0xff] (%p2390_p6) }
 0x1d8   : > { %1791 = vst [vmem:[%s2925_s4 + $0x2a0] sm:$0xff] %v1695_v10  ;;  %1793 = vst [vmem:[%s2925_s4 + $0x2b0] sm:$0xff] %v1697_v11  ;;  %v1904_v10 = vld [vmem:[%s2925_s4 + $0x130] sm:$0xff] (%p2390_p6)  ;;  %v1906_v11 = vld [vmem:[%s2925_s4 + $0x138] sm:$0xff] (%p2390_p6) }
 0x1d9   : > { %1792 = vst [vmem:[%s2925_s4 + $0x2a8] sm:$0xff] %v1696_v14  ;;  %v1061_v15 = vpop.f32.mrb[58].mxu0  ;;  %v1289_v16 = vpop.f32.mrb[58].mxu1  ;;  %1885 = vst [vmem:[%s3128_s7 + $0x1b8] sm:$0xff] (%p2390_p6), %v1884_v0  ;;  %v1912_v14 = vld [vmem:[%s2925_s4 + $0x150] sm:$0xff] (%p2390_p6)  ;;  %v1970_v41 = vld [vmem:[%s2925_s4 + $0x238] sm:$0xff] (%p2390_p6) }
 0x1da   : > { %v1698_v17 = vadd.f32 %v2915_v56, %v1061_v15  ;;  %v1700_v18 = vadd.f32 %v2917_v57, %v1289_v16  ;;  %v1063_v19 = vpop.f32.mrb[59].mxu0  ;;  %v1291_v20 = vpop.f32.mrb[59].mxu1  ;;  %1887 = vst [vmem:[%s3128_s7 + $0x1c0] sm:$0xff] (%p2390_p6), %v1886_v1  ;;  %1889 = vst [vmem:[%s3128_s7 + $0x1e0] sm:$0xff] (%p2390_p6), %v1888_v2  ;;  %v1914_v15 = vld [vmem:[%s2925_s4 + $0x158] sm:$0xff] (%p2390_p6)  ;;  %v1916_v16 = vld [vmem:[%s2925_s4 + $0x160] sm:$0xff] (%p2390_p6) }
 0x1db   : > { %v1699_v21 = vadd.f32 %v2919_v58, %v1063_v19  ;;  %1891 = vst [vmem:[%s3128_s7 + $0x1e8] sm:$0xff] (%p2390_p6), %v1890_v3  ;;  %1893 = vst [vmem:[%s3128_s7 + $0x1f0] sm:$0xff] (%p2390_p6), %v1892_v4  ;;  %v1922_v19 = vld [vmem:[%s2925_s4 + $0x178] sm:$0xff] (%p2390_p6)  ;;  %v1924_v20 = vld [vmem:[%s2925_s4 + $0x180] sm:$0xff] (%p2390_p6) }
 0x1dc   : > { %1794 = vst [vmem:[%s2925_s4 + $0x2b8] sm:$0xff] %v1698_v17  ;;  %1796 = vst [vmem:[%s2925_s4 + $0x2c8] sm:$0xff] %v1700_v18  ;;  %v1918_v17 = vld [vmem:[%s2925_s4 + $0x168] sm:$0xff] (%p2390_p6)  ;;  %v1920_v18 = vld [vmem:[%s2925_s4 + $0x170] sm:$0xff] (%p2390_p6) }
 0x1dd   : > { %1795 = vst [vmem:[%s2925_s4 + $0x2c0] sm:$0xff] %v1699_v21  ;;  %v1067_v22 = vpop.f32.mrb[60].mxu0  ;;  %v1294_v23 = vpop.f32.mrb[60].mxu1  ;;  %1895 = vst [vmem:[%s3128_s7 + $0x210] sm:$0xff] (%p2390_p6), %v1894_v5  ;;  %v1926_v21 = vld [vmem:[%s2925_s4 + $0x188] sm:$0xff] (%p2390_p6)  ;;  %v1972_v42 = vld [vmem:[%s2925_s4 + $0x240] sm:$0xff] (%p2390_p6) }
 0x1de   : > { %v1701_v24 = vadd.f32 %v2915_v56, %v1067_v22  ;;  %v1703_v25 = vadd.f32 %v2917_v57, %v1294_v23  ;;  %v1069_v26 = vpop.f32.mrb[61].mxu0  ;;  %v1296_v27 = vpop.f32.mrb[61].mxu1  ;;  %1897 = vst [vmem:[%s3128_s7 + $0x218] sm:$0xff] (%p2390_p6), %v1896_v6  ;;  %1899 = vst [vmem:[%s3128_s7 + $0x220] sm:$0xff] (%p2390_p6), %v1898_v7  ;;  %v1928_v22 = vld [vmem:[%s2925_s4 + $0x190] sm:$0xff] (%p2390_p6)  ;;  %v1930_v23 = vld [vmem:[%s2925_s4 + $0x198] sm:$0xff] (%p2390_p6) }
 0x1df   : > { %v1702_v28 = vadd.f32 %v2919_v58, %v1069_v26  ;;  %1809 = sbr.rel (!%p2390_p6) target bundleno = 514 (0x202), region = 67  ;;  %1901 = vst [vmem:[%s3128_s7 + $0x240] sm:$0xff] (%p2390_p6), %v1900_v8  ;;  %1903 = vst [vmem:[%s3128_s7 + $0x248] sm:$0xff] (%p2390_p6), %v1902_v9  ;;  %v1936_v26 = vld [vmem:[%s2925_s4 + $0x1b0] sm:$0xff] (%p2390_p6)  ;;  %v1938_v27 = vld [vmem:[%s2925_s4 + $0x1b8] sm:$0xff] (%p2390_p6) }
 0x1e0   : > { %1797 = vst [vmem:[%s2925_s4 + $0x2d0] sm:$0xff] %v1701_v24  ;;  %1799 = vst [vmem:[%s2925_s4 + $0x2e0] sm:$0xff] %v1703_v25  ;;  %v1932_v24 = vld [vmem:[%s2925_s4 + $0x1a0] sm:$0xff] (%p2390_p6)  ;;  %v1934_v25 = vld [vmem:[%s2925_s4 + $0x1a8] sm:$0xff] (%p2390_p6) }
 0x1e1   : > { %1798 = vst [vmem:[%s2925_s4 + $0x2d8] sm:$0xff] %v1702_v28  ;;  %v1073_v29 = vpop.f32.mrb[62].mxu0  ;;  %v1299_v30 = vpop.f32.mrb[62].mxu1  ;;  %1905 = vst [vmem:[%s3128_s7 + $0x250] sm:$0xff] (%p2390_p6), %v1904_v10  ;;  %v1940_v28 = vld [vmem:[%s2925_s4 + $0x1c0] sm:$0xff] (%p2390_p6)  ;;  %v1974_v43 = vld [vmem:[%s2925_s4 + $0x248] sm:$0xff] (%p2390_p6) }
 0x1e2   : > { %v1704_v31 = vadd.f32 %v2915_v56, %v1073_v29  ;;  %v1706_v32 = vadd.f32 %v2917_v57, %v1299_v30  ;;  %v1075_v34 = vpop.f32.mrb[63].mxu0  ;;  %v1301_v35 = vpop.f32.mrb[63].mxu1  ;;  %v1828_v56 = vld [vmem:[%s2925_s4] sm:$0xff] (%p2390_p6)  ;;  %v1830_v57 = vld [vmem:[%s2925_s4 + $0x8] sm:$0xff] (%p2390_p6)  ;;  %1907 = vst [vmem:[%s3128_s7 + $0x270] sm:$0xff] (%p2390_p6), %v1906_v11  ;;  %1909 = vst [vmem:[%s3128_s7 + $0x278] sm:$0xff] (%p2390_p6), %v1908_v12 }
 0x1e3   : > { %v1705_v36 = vadd.f32 %v2919_v58, %v1075_v34  ;;  %v1832_v58 = vld [vmem:[%s2925_s4 + $0x10] sm:$0xff] (%p2390_p6)  ;;  %1829 = vst [vmem:[%s3128_s7] sm:$0xff] (%p2390_p6), %v1828_v56  ;;  %1831 = vst [vmem:[%s3128_s7 + $0x8] sm:$0xff] (%p2390_p6), %v1830_v57  ;;  %v1942_v29 = vld [vmem:[%s2925_s4 + $0x1c8] sm:$0xff] (%p2390_p6) }
 0x1e4   : > { %1800 = vst [vmem:[%s2925_s4 + $0x2e8] sm:$0xff] %v1704_v31  ;;  %1802 = vst [vmem:[%s2925_s4 + $0x2f8] sm:$0xff] %v1706_v32  ;;  %v1944_v30 = vld [vmem:[%s2925_s4 + $0x1d0] sm:$0xff] (%p2390_p6)  ;;  %v1946_v31 = vld [vmem:[%s2925_s4 + $0x1d8] sm:$0xff] (%p2390_p6) }
 0x1e5   : > { %1801 = vst [vmem:[%s2925_s4 + $0x2f0] sm:$0xff] %v1705_v36  ;;  %1833 = vst [vmem:[%s3128_s7 + $0x10] sm:$0xff] (%p2390_p6), %v1832_v58  ;;  %v1948_v32 = vld [vmem:[%s2925_s4 + $0x1e0] sm:$0xff] (%p2390_p6)  ;;  %v1950_v34 = vld [vmem:[%s2925_s4 + $0x1e8] sm:$0xff] (%p2390_p6) }
 0x1e6   : > { %1911 = vst [vmem:[%s3128_s7 + $0x280] sm:$0xff] %v1910_v13  ;;  %1913 = vst [vmem:[%s3128_s7 + $0x2a0] sm:$0xff] %v1912_v14  ;;  %v1952_v35 = vld [vmem:[%s2925_s4 + $0x1f0] sm:$0xff]  ;;  %v1954_v36 = vld [vmem:[%s2925_s4 + $0x1f8] sm:$0xff] }
 0x1e7   : > { %1915 = vst [vmem:[%s3128_s7 + $0x2a8] sm:$0xff] %v1914_v15  ;;  %1917 = vst [vmem:[%s3128_s7 + $0x2b0] sm:$0xff] %v1916_v16  ;;  %v1956_v56 = vld [vmem:[%s2925_s4 + $0x200] sm:$0xff]  ;;  %v1958_v57 = vld [vmem:[%s2925_s4 + $0x208] sm:$0xff] }
 0x1e8   : > { %1919 = vst [vmem:[%s3128_s7 + $0x2d0] sm:$0xff] %v1918_v17  ;;  %1921 = vst [vmem:[%s3128_s7 + $0x2d8] sm:$0xff] %v1920_v18  ;;  %v1960_v58 = vld [vmem:[%s2925_s4 + $0x210] sm:$0xff]  ;;  %v1978_v45 = vld [vmem:[%s2925_s4 + $0x258] sm:$0xff] }
 0x1e9   : > { %1923 = vst [vmem:[%s3128_s7 + $0x2e0] sm:$0xff] %v1922_v19  ;;  %1925 = vst [vmem:[%s3128_s7 + $0x300] sm:$0xff] %v1924_v20  ;;  %v1976_v44 = vld [vmem:[%s2925_s4 + $0x250] sm:$0xff]  ;;  %v1980_v46 = vld [vmem:[%s2925_s4 + $0x260] sm:$0xff] }
 0x1ea   : > { %1927 = vst [vmem:[%s3128_s7 + $0x308] sm:$0xff] %v1926_v21  ;;  %1929 = vst [vmem:[%s3128_s7 + $0x310] sm:$0xff] %v1928_v22  ;;  %v1982_v47 = vld [vmem:[%s2925_s4 + $0x268] sm:$0xff]  ;;  %v1984_v48 = vld [vmem:[%s2925_s4 + $0x270] sm:$0xff] }
 0x1eb   : > { %1931 = vst [vmem:[%s3128_s7 + $0x330] sm:$0xff] %v1930_v23  ;;  %1933 = vst [vmem:[%s3128_s7 + $0x338] sm:$0xff] %v1932_v24  ;;  %v1986_v49 = vld [vmem:[%s2925_s4 + $0x278] sm:$0xff]  ;;  %v1988_v50 = vld [vmem:[%s2925_s4 + $0x280] sm:$0xff] }
 0x1ec   : > { %1935 = vst [vmem:[%s3128_s7 + $0x340] sm:$0xff] %v1934_v25  ;;  %1937 = vst [vmem:[%s3128_s7 + $0x360] sm:$0xff] %v1936_v26  ;;  %v1990_v51 = vld [vmem:[%s2925_s4 + $0x288] sm:$0xff]  ;;  %v1992_v52 = vld [vmem:[%s2925_s4 + $0x290] sm:$0xff] }
 0x1ed   : > { %1939 = vst [vmem:[%s3128_s7 + $0x368] sm:$0xff] %v1938_v27  ;;  %1941 = vst [vmem:[%s3128_s7 + $0x370] sm:$0xff] %v1940_v28  ;;  %v1994_v53 = vld [vmem:[%s2925_s4 + $0x298] sm:$0xff]  ;;  %v1996_v54 = vld [vmem:[%s2925_s4 + $0x2a0] sm:$0xff] }
 0x1ee   : > { %1943 = vst [vmem:[%s3128_s7 + $0x390] sm:$0xff] %v1942_v29  ;;  %1945 = vst [vmem:[%s3128_s7 + $0x398] sm:$0xff] %v1944_v30  ;;  %v1998_v33 = vld [vmem:[%s2925_s4 + $0x2a8] sm:$0xff]  ;;  %v2000_v55 = vld [vmem:[%s2925_s4 + $0x2b0] sm:$0xff] }
 0x1ef   : > { %1947 = vst [vmem:[%s3128_s7 + $0x3a0] sm:$0xff] %v1946_v31  ;;  %1949 = vst [vmem:[%s3128_s7 + $0x3c0] sm:$0xff] %v1948_v32  ;;  %v2002_v59 = vld [vmem:[%s2925_s4 + $0x2b8] sm:$0xff]  ;;  %v2004_v60 = vld [vmem:[%s2925_s4 + $0x2c0] sm:$0xff] }
 0x1f0   : > { %1951 = vst [vmem:[%s3128_s7 + $0x3c8] sm:$0xff] %v1950_v34  ;;  %1953 = vst [vmem:[%s3128_s7 + $0x3d0] sm:$0xff] %v1952_v35  ;;  %v2006_v61 = vld [vmem:[%s2925_s4 + $0x2c8] sm:$0xff]  ;;  %v2008_v62 = vld [vmem:[%s2925_s4 + $0x2d0] sm:$0xff] }
 0x1f1   : > { %1955 = vst [vmem:[%s3128_s7 + $0x3f0] sm:$0xff] %v1954_v36  ;;  %1957 = vst [vmem:[%s3128_s7 + $0x3f8] sm:$0xff] %v1956_v56  ;;  %v2010_v63 = vld [vmem:[%s2925_s4 + $0x2d8] sm:$0xff]  ;;  %v2012_v0 = vld [vmem:[%s2925_s4 + $0x2e0] sm:$0xff] }
 0x1f2   : > { %1959 = vst [vmem:[%s3128_s7 + $0x400] sm:$0xff] %v1958_v57  ;;  %1961 = vst [vmem:[%s3128_s7 + $0x420] sm:$0xff] %v1960_v58  ;;  %v2014_v1 = vld [vmem:[%s2925_s4 + $0x2e8] sm:$0xff]  ;;  %v2016_v2 = vld [vmem:[%s2925_s4 + $0x2f0] sm:$0xff] }
 0x1f3   : > { %1963 = vst [vmem:[%s3128_s7 + $0x428] sm:$0xff] %v1962_v37  ;;  %1965 = vst [vmem:[%s3128_s7 + $0x430] sm:$0xff] %v1964_v38  ;;  %v2018_v3 = vld [vmem:[%s2925_s4 + $0x2f8] sm:$0xff] }
 0x1f4   : > { %1967 = vst [vmem:[%s3128_s7 + $0x450] sm:$0xff] %v1966_v39  ;;  %1969 = vst [vmem:[%s3128_s7 + $0x458] sm:$0xff] %v1968_v40 }
 0x1f5   : > { %1971 = vst [vmem:[%s3128_s7 + $0x460] sm:$0xff] %v1970_v41  ;;  %1973 = vst [vmem:[%s3128_s7 + $0x480] sm:$0xff] %v1972_v42 }
 0x1f6   : > { %1975 = vst [vmem:[%s3128_s7 + $0x488] sm:$0xff] %v1974_v43  ;;  %1977 = vst [vmem:[%s3128_s7 + $0x490] sm:$0xff] %v1976_v44 }
 0x1f7   : > { %1979 = vst [vmem:[%s3128_s7 + $0x4b0] sm:$0xff] %v1978_v45  ;;  %1981 = vst [vmem:[%s3128_s7 + $0x4b8] sm:$0xff] %v1980_v46 }
 0x1f8   : > { %1983 = vst [vmem:[%s3128_s7 + $0x4c0] sm:$0xff] %v1982_v47  ;;  %1985 = vst [vmem:[%s3128_s7 + $0x4e0] sm:$0xff] %v1984_v48 }
 0x1f9   : > { %1987 = vst [vmem:[%s3128_s7 + $0x4e8] sm:$0xff] %v1986_v49  ;;  %1989 = vst [vmem:[%s3128_s7 + $0x4f0] sm:$0xff] %v1988_v50 }
 0x1fa   : > { %1991 = vst [vmem:[%s3128_s7 + $0x510] sm:$0xff] %v1990_v51  ;;  %1993 = vst [vmem:[%s3128_s7 + $0x518] sm:$0xff] %v1992_v52 }
 0x1fb   : > { %1995 = vst [vmem:[%s3128_s7 + $0x520] sm:$0xff] %v1994_v53  ;;  %1997 = vst [vmem:[%s3128_s7 + $0x540] sm:$0xff] %v1996_v54 }
 0x1fc   : > { %1999 = vst [vmem:[%s3128_s7 + $0x548] sm:$0xff] %v1998_v33  ;;  %2001 = vst [vmem:[%s3128_s7 + $0x550] sm:$0xff] %v2000_v55 }
 0x1fd   : > { %2003 = vst [vmem:[%s3128_s7 + $0x570] sm:$0xff] %v2002_v59  ;;  %2005 = vst [vmem:[%s3128_s7 + $0x578] sm:$0xff] %v2004_v60 }
 0x1fe   : > { %2007 = vst [vmem:[%s3128_s7 + $0x580] sm:$0xff] %v2006_v61  ;;  %2009 = vst [vmem:[%s3128_s7 + $0x5a0] sm:$0xff] %v2008_v62 }
 0x1ff   : > { %2011 = vst [vmem:[%s3128_s7 + $0x5a8] sm:$0xff] %v2010_v63  ;;  %2013 = vst [vmem:[%s3128_s7 + $0x5b0] sm:$0xff] %v2012_v0 }
 0x200   : > { %2015 = vst [vmem:[%s3128_s7 + $0x5d0] sm:$0xff] %v2014_v1  ;;  %2017 = vst [vmem:[%s3128_s7 + $0x5d8] sm:$0xff] %v2016_v2 }
 0x201   : > { %2019 = vst [vmem:[%s3128_s7 + $0x5e0] sm:$0xff] %v2018_v3 }
 0x202 PF: > { %s13_s16 = sadd.s32 1, %s2332_s16   ;;  %s3336_s12 = smov %s2320_s13 }
 0x203   : > { %p10_p12 = scmp.ge.s32.totalorder %s13_s16, 4   ;;  %s3337_s13 = smov %s2395_s22 }
 0x204   : > { %s3338_s14 = smov %s2328_s15  ;;  %s3339_s15 = smov %s3341_s17 }
 0x205   :  { %12 = sbr.rel (!%p10_p12) target bundleno = 3 (0x3), region = 127 }

</bundles_post_ra>
